<compile_context>
chip_gen: v7x
topology: tpu7x:2x2x1
jax: 0.10.0
libtpu: 0.0.40
codegen_flags: <defaults>
</compile_context>

<pallas_src>
import functools

import jax
import jax.numpy as jnp
import numpy as np
from jax.experimental import pallas as pl
from jax.experimental.pallas import tpu as pltpu


def _round_up(x, m):
    return (x + m - 1) // m * m


def _entity_attn_kernel(e1_ref, e2_ref,            # (TB, 1) int32
                        act_ref,                   # (TB, L, 2H+2P)  matmul dtype
                        w_act_ref,                 # (2H+2P, Ap)     matmul dtype
                        w_ent_ref,                 # (4*2H, Ap)      matmul dtype
                        lt_ref, lt_t_ref,          # (T, 2H), (2H, T) matmul dtype
                        v_ref,                     # (1, Ap)         f32
                        z_ref,                     # out: (TB, 2H)   f32
                        *, approx_recip):
    f32 = jnp.float32
    TB, L, D = act_ref.shape
    H2 = lt_ref.shape[1]
    mmdt = act_ref.dtype

    act = act_ref[...]                             # (TB, L, D)
    hid_f = act[:, :, :H2].astype(f32)             # (TB, L, 2H); f32 for VPU/XLU math

    # ---- vectorized entity gather: one-hot over L, VPU multiply + sublane reduce ----
    pos_iota = jax.lax.broadcasted_iota(jnp.int32, (TB, L), 1)
    m1 = (pos_iota == e1_ref[...]).astype(f32)     # (TB, L)
    m2 = (pos_iota == e2_ref[...]).astype(f32)
    hid_e1 = jnp.sum(m1[:, :, None] * hid_f, axis=1)   # (TB, 2H) exact row select
    hid_e2 = jnp.sum(m2[:, :, None] * hid_f, axis=1)

    # ---- latent entity types: tiny MXU dots + lane softmax ----
    def latent_type(e_mm):                         # (TB, 2H) in matmul dtype
        logits = jnp.dot(e_mm, lt_t_ref[...], preferred_element_type=f32)    # (TB, T)
        logits = logits - jnp.max(logits, axis=-1, keepdims=True)
        p = jnp.exp(logits)
        p = p * pl.reciprocal(jnp.sum(p, axis=-1, keepdims=True), approx=approx_recip)
        return jnp.dot(p.astype(mmdt), lt_ref[...], preferred_element_type=f32)  # (TB, 2H)

    e1_mm = hid_e1.astype(mmdt)
    e2_mm = hid_e2.astype(mmdt)
    t1_mm = latent_type(e1_mm).astype(mmdt)
    t2_mm = latent_type(e2_mm).astype(mmdt)

    # ---- u1: one fused (TB*L, D) @ (D, Ap) MXU dot over every row of the block ----
    u1 = jnp.dot(act.reshape(TB * L, D), w_act_ref[...],
                 preferred_element_type=f32)       # (TB*L, Ap)

    # ---- u2: four K=2H dots against static sub-views of W_ent (no lane concat) ----
    u2 = (jnp.dot(e1_mm, w_ent_ref[0 * H2:1 * H2, :], preferred_element_type=f32)
          + jnp.dot(t1_mm, w_ent_ref[1 * H2:2 * H2, :], preferred_element_type=f32)
          + jnp.dot(e2_mm, w_ent_ref[2 * H2:3 * H2, :], preferred_element_type=f32)
          + jnp.dot(t2_mm, w_ent_ref[3 * H2:4 * H2, :], preferred_element_type=f32))  # (TB, Ap)

    Ap = u2.shape[-1]
    u = jnp.tanh(u1.reshape(TB, L, Ap) + u2[:, None, :])    # (TB, L, Ap) f32

    # ---- attention over the sequence (softmax over L per example) ----
    scores = jnp.sum(u * v_ref[...][None, :, :], axis=-1)   # (TB, L); padded Ap lanes are zero
    scores = scores - jnp.max(scores, axis=-1, keepdims=True)
    es = jnp.exp(scores)
    alpha = es * pl.reciprocal(jnp.sum(es, axis=-1, keepdims=True), approx=approx_recip)

    # ---- z = alpha^T @ hidden per example: VPU multiply + sublane reduce ----
    z = jnp.sum(alpha[:, :, None] * hid_f, axis=1)           # (TB, 2H)
    z_ref[...] = z.astype(z_ref.dtype)


def entity_aware_attention(hidden, pos1_emb, pos2_emb, entity1_idx, entity2_idx,
                           w_hid, w_ent, latent_types, v, *,
                           block_b=32, matmul_dtype=jnp.bfloat16, approx_recip=True):
    """hidden: (B, L, 2H); pos*_emb: (B, L, P); entity*_idx: (B,) int.
    w_hid: (A, 2H+2P) torch nn.Linear layout; w_ent: (A, 8H); latent_types: (T, 2H); v: (A, 1).
    Returns z: (B, 2H) float32."""
    B, L, H2 = hidden.shape
    P = pos1_emb.shape[-1]
    A = w_hid.shape[0]
    T = latent_types.shape[0]
    D = H2 + 2 * P
    assert w_ent.shape[1] == 4 * H2
    Ap = _round_up(A, 128)
    f32 = jnp.float32
    mmdt = matmul_dtype

    TB = min(block_b, B)
    Bp = _round_up(B, TB)

    # Fused activation [hidden | pos1 | pos2]; contraction dim left UNPADDED so HBM
    # traffic stays at the true 2H+2P lanes (the MXU handles short K natively).
    act = jnp.concatenate([hidden, pos1_emb, pos2_emb], axis=-1).astype(mmdt)   # (B, L, D)
    e1 = entity1_idx.astype(jnp.int32).reshape(B, 1)
    e2 = entity2_idx.astype(jnp.int32).reshape(B, 1)
    if Bp != B:  # pad ragged batch with zero rows (sliced off the output below)
        act = jnp.pad(act, ((0, Bp - B), (0, 0), (0, 0)))
        e1 = jnp.pad(e1, ((0, Bp - B), (0, 0)))
        e2 = jnp.pad(e2, ((0, Bp - B), (0, 0)))

    # Weights: nn.Linear computes x @ W.T; transpose once, zero-pad ONLY the output
    # (A) lane dim so u1/u2 and the score dot are lane-dense.
    w_act = jnp.zeros((D, Ap), mmdt).at[:, :A].set(w_hid.T.astype(mmdt))         # (D, Ap)
    w_ent_p = jnp.zeros((4 * H2, Ap), mmdt).at[:, :A].set(w_ent.T.astype(mmdt))  # (4*2H, Ap)
    lt = latent_types.astype(mmdt)                                               # (T, 2H)
    lt_t = latent_types.T.astype(mmdt)                                           # (2H, T)
    v_row = jnp.zeros((1, Ap), f32).at[0, :A].set(v[:, 0].astype(f32))           # (1, Ap)

    const2d = lambda g: (0, 0)

    grid_spec = pltpu.PrefetchScalarGridSpec(
        num_scalar_prefetch=0,
        grid=(Bp // TB,),
        in_specs=[
            pl.BlockSpec((TB, 1), lambda g: (g, 0)),        # entity-1 indices
            pl.BlockSpec((TB, 1), lambda g: (g, 0)),        # entity-2 indices
            pl.BlockSpec((TB, L, D), lambda g: (g, 0, 0)),  # [hidden | pos1 | pos2]
            pl.BlockSpec((D, Ap), const2d),                 # W_hid^T (A-padded)
            pl.BlockSpec((4 * H2, Ap), const2d),            # W_ent^T (A-padded)
            pl.BlockSpec((T, H2), const2d),                 # latent types
            pl.BlockSpec((H2, T), const2d),                 # latent types^T
            pl.BlockSpec((1, Ap), const2d),                 # v as lane-dense row
        ],
        out_specs=pl.BlockSpec((TB, H2), lambda g: (g, 0)),
    )

    z = pl.pallas_call(
        functools.partial(_entity_attn_kernel, approx_recip=approx_recip),
        grid_spec=grid_spec,
        out_shape=jax.ShapeDtypeStruct((Bp, H2), f32),
        compiler_params=pltpu.CompilerParams(
            dimension_semantics=("parallel",)),             # batch blocks -> megacore / 2 TCs
    )(e1, e2, act, w_act, w_ent_p, lt, lt_t, v_row)

    return z[:B]                                            # drop batch padding


def _reference(hidden, pos1_emb, pos2_emb, e1_idx, e2_idx, w_hid, w_ent, lt, v):
    B = hidden.shape[0]
    hid_e1 = hidden[jnp.arange(B), e1_idx][:, None, :]       # (B, 1, 2H)
    hid_e2 = hidden[jnp.arange(B), e2_idx][:, None, :]

    def latent_type(h):
        a = jax.nn.softmax(jnp.einsum('bld,td->blt', h, lt), axis=-1)
        return jnp.einsum('blt,td->bld', a, lt)

    e1_type = latent_type(hid_e1)
    e2_type = latent_type(hid_e2)
    u1 = jnp.concatenate([hidden, pos1_emb, pos2_emb], -1) @ w_hid.T
    u2 = jnp.concatenate([hid_e1, e1_type, hid_e2, e2_type], -1) @ w_ent.T
    u = jnp.tanh(u1 + u2)
    alpha = jax.nn.softmax(jnp.squeeze(u @ v), axis=-1)[..., None]    # (B, L, 1)
    z = jnp.einsum('blo,bld->bod', alpha, hidden)[:, 0, :]            # (B, 2H)
    return z


if __name__ == "__main__":
    # Module-consistent small shapes: hidden_dim=16 -> 2H=32, pos_emb_dim=8,
    # attention_dim=16, num_latent_types=3, seq L=8, batch B=64 (2 grid blocks of 32
    # -> M = 256 rows per u1 matmul, even grid for v7x's two TensorCores).
    B, L, hidden_dim, pos_dim, attn_dim, n_types = 64, 8, 16, 8, 16, 3
    H2 = 2 * hidden_dim

    key = jax.random.PRNGKey(0)
    ks = jax.random.split(key, 9)
    hidden = jax.random.normal(ks[0], (B, L, H2), jnp.float32)
    pos1_emb = jax.random.normal(ks[1], (B, L, pos_dim), jnp.float32)
    pos2_emb = jax.random.normal(ks[2], (B, L, pos_dim), jnp.float32)

    # Torch-Linear layout: (out_features, in_features); no biases in the module.
    w_hid = 0.1 * jax.random.normal(ks[3], (attn_dim, H2 + 2 * pos_dim), jnp.float32)
    w_ent = 0.1 * jax.random.normal(ks[4], (attn_dim, 8 * hidden_dim), jnp.float32)
    latent_types = 0.1 * jax.random.normal(ks[5], (n_types, H2), jnp.float32)
    v = 0.1 * jax.random.normal(ks[6], (attn_dim, 1), jnp.float32)
    entity1_idx = jax.random.randint(ks[7], (B,), 0, L, dtype=jnp.int32)
    entity2_idx = jax.random.randint(ks[8], (B,), 0, L, dtype=jnp.int32)

    z_ref = _reference(hidden, pos1_emb, pos2_emb, entity1_idx, entity2_idx,
                       w_hid, w_ent, latent_types, v)

    # 1) exact-mode kernel (f32 MXU operands, exact reciprocal) -> tight check.
    z_f32 = entity_aware_attention(hidden, pos1_emb, pos2_emb, entity1_idx, entity2_idx,
                                   w_hid, w_ent, latent_types, v,
                                   block_b=32, matmul_dtype=jnp.float32,
                                   approx_recip=False)
    z_f32 = jax.block_until_ready(z_f32)
    np.testing.assert_allclose(np.asarray(z_f32), np.asarray(z_ref), rtol=1e-4, atol=1e-4)

    # 2) production mode (bf16 MXU operands + EUP approx reciprocal) -> loose check.
    z_bf16 = entity_aware_attention(hidden, pos1_emb, pos2_emb, entity1_idx, entity2_idx,
                                    w_hid, w_ent, latent_types, v, block_b=32)
    z_bf16 = jax.block_until_ready(z_bf16)
    np.testing.assert_allclose(np.asarray(z_bf16), np.asarray(z_ref), rtol=5e-2, atol=5e-2)

    print("KERNEL_OK")
</pallas_src>

<mosaic_0001>
module attributes {stable_mosaic.version = 11 : i64} {
  func.func @_entity_attn_kernel(%arg0: i32, %arg1: memref<32x1xi32, #tpu.memory_space<vmem>>, %arg2: memref<32x1xi32, #tpu.memory_space<vmem>>, %arg3: memref<32x8x48xf32, #tpu.memory_space<vmem>>, %arg4: memref<48x128xf32, #tpu.memory_space<vmem>>, %arg5: memref<128x128xf32, #tpu.memory_space<vmem>>, %arg6: memref<3x32xf32, #tpu.memory_space<vmem>>, %arg7: memref<32x3xf32, #tpu.memory_space<vmem>>, %arg8: memref<1x128xf32, #tpu.memory_space<vmem>>, %arg9: memref<32x32xf32, #tpu.memory_space<vmem>>) attributes {dimension_semantics = [#tpu.dimension_semantics<parallel>], iteration_bounds = array<i64: 2>, scalar_prefetch = 0 : i64, scratch_operands = 0 : i64, tpu.core_type = #tpu.core_type<tc>, window_params = [{transform_indices = @transform_0, window_bounds = array<i64: 32, 1>}, {transform_indices = @transform_1, window_bounds = array<i64: 32, 1>}, {transform_indices = @transform_2, window_bounds = array<i64: 32, 8, 48>}, {pipeline_mode = #tpu.pipeline_mode<synchronous>, transform_indices = @transform_3, window_bounds = array<i64: 48, 128>}, {pipeline_mode = #tpu.pipeline_mode<synchronous>, transform_indices = @transform_4, window_bounds = array<i64: 128, 128>}, {pipeline_mode = #tpu.pipeline_mode<synchronous>, transform_indices = @transform_5, window_bounds = array<i64: 3, 32>}, {pipeline_mode = #tpu.pipeline_mode<synchronous>, transform_indices = @transform_6, window_bounds = array<i64: 32, 3>}, {pipeline_mode = #tpu.pipeline_mode<synchronous>, transform_indices = @transform_7, window_bounds = array<i64: 1, 128>}, {transform_indices = @transform_8, window_bounds = array<i64: 32, 32>}]} {
    %c0 = arith.constant 0 : index
    %c0_0 = arith.constant 0 : index
    %c0_1 = arith.constant 0 : index
    %0 = vector.load %arg3[%c0, %c0_0, %c0_1] : memref<32x8x48xf32, #tpu.memory_space<vmem>>, vector<32x8x48xf32>
    %1 = vector.extract_strided_slice %0 {offsets = [0, 0, 0], sizes = [32, 8, 32], strides = [1, 1, 1]} : vector<32x8x48xf32> to vector<32x8x32xf32>
    %2 = tpu.iota {dimensions = array<i32: 1>} : vector<32x8xi32>
    %c0_2 = arith.constant 0 : index
    %c0_3 = arith.constant 0 : index
    %3 = vector.load %arg1[%c0_2, %c0_3] : memref<32x1xi32, #tpu.memory_space<vmem>>, vector<32x1xi32>
    %4 = vector.broadcast %3 : vector<32x1xi32> to vector<32x8xi32>
    %5 = arith.cmpi eq, %2, %4 : vector<32x8xi32>
    %6 = arith.extui %5 : vector<32x8xi1> to vector<32x8xi32>
    %7 = arith.sitofp %6 : vector<32x8xi32> to vector<32x8xf32>
    %c0_4 = arith.constant 0 : index
    %c0_5 = arith.constant 0 : index
    %8 = vector.load %arg2[%c0_4, %c0_5] : memref<32x1xi32, #tpu.memory_space<vmem>>, vector<32x1xi32>
    %9 = vector.broadcast %8 : vector<32x1xi32> to vector<32x8xi32>
    %10 = arith.cmpi eq, %2, %9 : vector<32x8xi32>
    %11 = arith.extui %10 : vector<32x8xi1> to vector<32x8xi32>
    %12 = arith.sitofp %11 : vector<32x8xi32> to vector<32x8xf32>
    %13 = vector.shape_cast %7 : vector<32x8xf32> to vector<32x8x1xf32>
    %14 = vector.broadcast %13 : vector<32x8x1xf32> to vector<32x8x32xf32>
    %15 = arith.mulf %14, %1 : vector<32x8x32xf32>
    %cst = arith.constant dense<0.000000e+00> : vector<32x32xf32>
    %16 = vector.multi_reduction <add>, %15, %cst [1] : vector<32x8x32xf32> to vector<32x32xf32>
    %17 = vector.shape_cast %12 : vector<32x8xf32> to vector<32x8x1xf32>
    %18 = vector.broadcast %17 : vector<32x8x1xf32> to vector<32x8x32xf32>
    %19 = arith.mulf %18, %1 : vector<32x8x32xf32>
    %cst_6 = arith.constant dense<0.000000e+00> : vector<32x32xf32>
    %20 = vector.multi_reduction <add>, %19, %cst_6 [1] : vector<32x8x32xf32> to vector<32x32xf32>
    %c0_7 = arith.constant 0 : index
    %c0_8 = arith.constant 0 : index
    %21 = vector.load %arg7[%c0_7, %c0_8] : memref<32x3xf32, #tpu.memory_space<vmem>>, vector<32x3xf32>
    %cst_9 = arith.constant dense<0.000000e+00> : vector<32x3xf32>
    %22 = tpu.matmul %16, %21, %cst_9 {dimension_numbers = #tpu.dot_dimension_numbers<[1], [0], [0], [1], [0, 0, 1, 1], [], []>} : vector<32x32xf32>, vector<32x3xf32>, vector<32x3xf32> -> vector<32x3xf32>
    %cst_10 = arith.constant dense<0xFF800000> : vector<32xf32>
    %23 = vector.multi_reduction <maximumf>, %22, %cst_10 [1] : vector<32x3xf32> to vector<32xf32>
    %24 = vector.shape_cast %23 : vector<32xf32> to vector<32x1xf32>
    %25 = vector.broadcast %24 : vector<32x1xf32> to vector<32x3xf32>
    %26 = arith.subf %22, %25 : vector<32x3xf32>
    %27 = math.exp %26 : vector<32x3xf32>
    %cst_11 = arith.constant dense<0.000000e+00> : vector<32xf32>
    %28 = vector.multi_reduction <add>, %27, %cst_11 [1] : vector<32x3xf32> to vector<32xf32>
    %29 = vector.shape_cast %28 : vector<32xf32> to vector<32x1xf32>
    %30 = tpu.reciprocal %29 : vector<32x1xf32> -> vector<32x1xf32>
    %31 = vector.broadcast %30 : vector<32x1xf32> to vector<32x3xf32>
    %32 = arith.mulf %27, %31 : vector<32x3xf32>
    %c0_12 = arith.constant 0 : index
    %c0_13 = arith.constant 0 : index
    %33 = vector.load %arg6[%c0_12, %c0_13] : memref<3x32xf32, #tpu.memory_space<vmem>>, vector<3x32xf32>
    %cst_14 = arith.constant dense<0.000000e+00> : vector<32x32xf32>
    %34 = tpu.matmul %32, %33, %cst_14 {dimension_numbers = #tpu.dot_dimension_numbers<[1], [0], [0], [1], [0, 0, 1, 1], [], []>} : vector<32x3xf32>, vector<3x32xf32>, vector<32x32xf32> -> vector<32x32xf32>
    %c0_15 = arith.constant 0 : index
    %c0_16 = arith.constant 0 : index
    %35 = vector.load %arg7[%c0_15, %c0_16] : memref<32x3xf32, #tpu.memory_space<vmem>>, vector<32x3xf32>
    %cst_17 = arith.constant dense<0.000000e+00> : vector<32x3xf32>
    %36 = tpu.matmul %20, %35, %cst_17 {dimension_numbers = #tpu.dot_dimension_numbers<[1], [0], [0], [1], [0, 0, 1, 1], [], []>} : vector<32x32xf32>, vector<32x3xf32>, vector<32x3xf32> -> vector<32x3xf32>
    %cst_18 = arith.constant dense<0xFF800000> : vector<32xf32>
    %37 = vector.multi_reduction <maximumf>, %36, %cst_18 [1] : vector<32x3xf32> to vector<32xf32>
    %38 = vector.shape_cast %37 : vector<32xf32> to vector<32x1xf32>
    %39 = vector.broadcast %38 : vector<32x1xf32> to vector<32x3xf32>
    %40 = arith.subf %36, %39 : vector<32x3xf32>
    %41 = math.exp %40 : vector<32x3xf32>
    %cst_19 = arith.constant dense<0.000000e+00> : vector<32xf32>
    %42 = vector.multi_reduction <add>, %41, %cst_19 [1] : vector<32x3xf32> to vector<32xf32>
    %43 = vector.shape_cast %42 : vector<32xf32> to vector<32x1xf32>
    %44 = tpu.reciprocal %43 : vector<32x1xf32> -> vector<32x1xf32>
    %45 = vector.broadcast %44 : vector<32x1xf32> to vector<32x3xf32>
    %46 = arith.mulf %41, %45 : vector<32x3xf32>
    %c0_20 = arith.constant 0 : index
    %c0_21 = arith.constant 0 : index
    %47 = vector.load %arg6[%c0_20, %c0_21] : memref<3x32xf32, #tpu.memory_space<vmem>>, vector<3x32xf32>
    %cst_22 = arith.constant dense<0.000000e+00> : vector<32x32xf32>
    %48 = tpu.matmul %46, %47, %cst_22 {dimension_numbers = #tpu.dot_dimension_numbers<[1], [0], [0], [1], [0, 0, 1, 1], [], []>} : vector<32x3xf32>, vector<3x32xf32>, vector<32x32xf32> -> vector<32x32xf32>
    %49 = vector.shape_cast %0 : vector<32x8x48xf32> to vector<256x48xf32>
    %c0_23 = arith.constant 0 : index
    %c0_24 = arith.constant 0 : index
    %50 = vector.load %arg4[%c0_23, %c0_24] : memref<48x128xf32, #tpu.memory_space<vmem>>, vector<48x128xf32>
    %cst_25 = arith.constant dense<0.000000e+00> : vector<256x128xf32>
    %51 = tpu.matmul %49, %50, %cst_25 {dimension_numbers = #tpu.dot_dimension_numbers<[1], [0], [0], [1], [0, 0, 1, 1], [], []>} : vector<256x48xf32>, vector<48x128xf32>, vector<256x128xf32> -> vector<256x128xf32>
    %c0_26 = arith.constant 0 : index
    %c0_27 = arith.constant 0 : index
    %52 = vector.load %arg5[%c0_26, %c0_27] : memref<128x128xf32, #tpu.memory_space<vmem>>, vector<32x128xf32>
    %cst_28 = arith.constant dense<0.000000e+00> : vector<32x128xf32>
    %53 = tpu.matmul %16, %52, %cst_28 {dimension_numbers = #tpu.dot_dimension_numbers<[1], [0], [0], [1], [0, 0, 1, 1], [], []>} : vector<32x32xf32>, vector<32x128xf32>, vector<32x128xf32> -> vector<32x128xf32>
    %c32 = arith.constant 32 : index
    %c0_29 = arith.constant 0 : index
    %54 = vector.load %arg5[%c32, %c0_29] : memref<128x128xf32, #tpu.memory_space<vmem>>, vector<32x128xf32>
    %cst_30 = arith.constant dense<0.000000e+00> : vector<32x128xf32>
    %55 = tpu.matmul %34, %54, %cst_30 {dimension_numbers = #tpu.dot_dimension_numbers<[1], [0], [0], [1], [0, 0, 1, 1], [], []>} : vector<32x32xf32>, vector<32x128xf32>, vector<32x128xf32> -> vector<32x128xf32>
    %56 = arith.addf %53, %55 : vector<32x128xf32>
    %c64 = arith.constant 64 : index
    %c0_31 = arith.constant 0 : index
    %57 = vector.load %arg5[%c64, %c0_31] : memref<128x128xf32, #tpu.memory_space<vmem>>, vector<32x128xf32>
    %cst_32 = arith.constant dense<0.000000e+00> : vector<32x128xf32>
    %58 = tpu.matmul %20, %57, %cst_32 {dimension_numbers = #tpu.dot_dimension_numbers<[1], [0], [0], [1], [0, 0, 1, 1], [], []>} : vector<32x32xf32>, vector<32x128xf32>, vector<32x128xf32> -> vector<32x128xf32>
    %59 = arith.addf %56, %58 : vector<32x128xf32>
    %c96 = arith.constant 96 : index
    %c0_33 = arith.constant 0 : index
    %60 = vector.load %arg5[%c96, %c0_33] : memref<128x128xf32, #tpu.memory_space<vmem>>, vector<32x128xf32>
    %cst_34 = arith.constant dense<0.000000e+00> : vector<32x128xf32>
    %61 = tpu.matmul %48, %60, %cst_34 {dimension_numbers = #tpu.dot_dimension_numbers<[1], [0], [0], [1], [0, 0, 1, 1], [], []>} : vector<32x32xf32>, vector<32x128xf32>, vector<32x128xf32> -> vector<32x128xf32>
    %62 = arith.addf %59, %61 : vector<32x128xf32>
    %63 = vector.shape_cast %51 : vector<256x128xf32> to vector<32x8x128xf32>
    %64 = vector.shape_cast %62 : vector<32x128xf32> to vector<32x1x128xf32>
    %65 = vector.broadcast %64 : vector<32x1x128xf32> to vector<32x8x128xf32>
    %66 = arith.addf %63, %65 : vector<32x8x128xf32>
    %67 = math.tanh %66 : vector<32x8x128xf32>
    %c0_35 = arith.constant 0 : index
    %c0_36 = arith.constant 0 : index
    %68 = vector.load %arg8[%c0_35, %c0_36] : memref<1x128xf32, #tpu.memory_space<vmem>>, vector<1x128xf32>
    %69 = vector.shape_cast %68 : vector<1x128xf32> to vector<1x1x128xf32>
    %70 = vector.broadcast %69 : vector<1x1x128xf32> to vector<32x8x128xf32>
    %71 = arith.mulf %67, %70 : vector<32x8x128xf32>
    %cst_37 = arith.constant dense<0.000000e+00> : vector<32x8xf32>
    %72 = vector.multi_reduction <add>, %71, %cst_37 [2] : vector<32x8x128xf32> to vector<32x8xf32>
    %cst_38 = arith.constant dense<0xFF800000> : vector<32xf32>
    %73 = vector.multi_reduction <maximumf>, %72, %cst_38 [1] : vector<32x8xf32> to vector<32xf32>
    %74 = vector.shape_cast %73 : vector<32xf32> to vector<32x1xf32>
    %75 = vector.broadcast %74 : vector<32x1xf32> to vector<32x8xf32>
    %76 = arith.subf %72, %75 : vector<32x8xf32>
    %77 = math.exp %76 : vector<32x8xf32>
    %cst_39 = arith.constant dense<0.000000e+00> : vector<32xf32>
    %78 = vector.multi_reduction <add>, %77, %cst_39 [1] : vector<32x8xf32> to vector<32xf32>
    %79 = vector.shape_cast %78 : vector<32xf32> to vector<32x1xf32>
    %80 = tpu.reciprocal %79 : vector<32x1xf32> -> vector<32x1xf32>
    %81 = vector.broadcast %80 : vector<32x1xf32> to vector<32x8xf32>
    %82 = arith.mulf %77, %81 : vector<32x8xf32>
    %83 = vector.shape_cast %82 : vector<32x8xf32> to vector<32x8x1xf32>
    %84 = vector.broadcast %83 : vector<32x8x1xf32> to vector<32x8x32xf32>
    %85 = arith.mulf %84, %1 : vector<32x8x32xf32>
    %cst_40 = arith.constant dense<0.000000e+00> : vector<32x32xf32>
    %86 = vector.multi_reduction <add>, %85, %cst_40 [1] : vector<32x8x32xf32> to vector<32x32xf32>
    %c0_41 = arith.constant 0 : index
    %c0_42 = arith.constant 0 : index
    %87 = vector.load %arg9[%c0_41, %c0_42] : memref<32x32xf32, #tpu.memory_space<vmem>>, vector<32x32xf32>
    tpu.vector_store %arg9[%c0_41, %c0_42], %86 {strides = array<i32>} : memref<32x32xf32, #tpu.memory_space<vmem>>, vector<32x32xf32>,
    return
  }
  func.func @transform_0(%arg0: i32) -> (i32, i32) {
    %c0_i32 = arith.constant 0 : i32
    %c0_i32_0 = arith.constant 0 : i32
    return %arg0, %c0_i32 : i32, i32
  }
  func.func @transform_1(%arg0: i32) -> (i32, i32) {
    %c0_i32 = arith.constant 0 : i32
    %c0_i32_0 = arith.constant 0 : i32
    return %arg0, %c0_i32 : i32, i32
  }
  func.func @transform_2(%arg0: i32) -> (i32, i32, i32) {
    %c0_i32 = arith.constant 0 : i32
    %c0_i32_0 = arith.constant 0 : i32
    %c0_i32_1 = arith.constant 0 : i32
    return %arg0, %c0_i32, %c0_i32_0 : i32, i32, i32
  }
  func.func @transform_3(%arg0: i32) -> (i32, i32) {
    %c0_i32 = arith.constant 0 : i32
    %c0_i32_0 = arith.constant 0 : i32
    %c0_i32_1 = arith.constant 0 : i32
    return %c0_i32, %c0_i32_0 : i32, i32
  }
  func.func @transform_4(%arg0: i32) -> (i32, i32) {
    %c0_i32 = arith.constant 0 : i32
    %c0_i32_0 = arith.constant 0 : i32
    %c0_i32_1 = arith.constant 0 : i32
    return %c0_i32, %c0_i32_0 : i32, i32
  }
  func.func @transform_5(%arg0: i32) -> (i32, i32) {
    %c0_i32 = arith.constant 0 : i32
    %c0_i32_0 = arith.constant 0 : i32
    %c0_i32_1 = arith.constant 0 : i32
    return %c0_i32, %c0_i32_0 : i32, i32
  }
  func.func @transform_6(%arg0: i32) -> (i32, i32) {
    %c0_i32 = arith.constant 0 : i32
    %c0_i32_0 = arith.constant 0 : i32
    %c0_i32_1 = arith.constant 0 : i32
    return %c0_i32, %c0_i32_0 : i32, i32
  }
  func.func @transform_7(%arg0: i32) -> (i32, i32) {
    %c0_i32 = arith.constant 0 : i32
    %c0_i32_0 = arith.constant 0 : i32
    %c0_i32_1 = arith.constant 0 : i32
    return %c0_i32, %c0_i32_0 : i32, i32
  }
  func.func @transform_8(%arg0: i32) -> (i32, i32) {
    %c0_i32 = arith.constant 0 : i32
    %c0_i32_0 = arith.constant 0 : i32
    return %arg0, %c0_i32 : i32, i32
  }
}

</mosaic_0001>

<bundles_post_ra>
// kernel: tpu_custom_call.1
= control target key start
LH: loop header
LB: loop body
LE: loop exit
PB: predicated region body
PF: predicated region fallthrough
CT: control target
= control target key end

     0   :  { %s5506_s27 = smov 0   ;;  %s7220_s0 = inlined_call_operand.vmem [shape: s32[64,1], index: 0, kind: input, shape index: {}]   ;;  %s7221_s1 = inlined_call_operand.vmem [shape: s32[64,1], index: 1, kind: input, shape index: {}]   ;;  %s7222_s2 = inlined_call_operand.vmem [shape: f32[64,8,48], index: 2, kind: input, shape index: {}]   ;;  %s7223_s3 = inlined_call_operand.vmem [shape: f32[48,128], index: 3, kind: input, shape index: {}]   ;;  %s7224_s4 = inlined_call_operand.vmem [shape: f32[128,128], index: 4, kind: input, shape index: {}]   ;;  %s7225_s5 = inlined_call_operand.vmem [shape: f32[3,32], index: 5, kind: input, shape index: {}]   ;;  %s7226_s6 = inlined_call_operand.vmem [shape: f32[32,3], index: 6, kind: input, shape index: {}]   ;;  %s7227_s7 = inlined_call_operand.vmem [shape: f32[1,128], index: 7, kind: input, shape index: {}]   ;;  %s7228_s8 = inlined_call_operand.vmem [shape: f32[64,32], index: 8, kind: output, shape index: {}]  }
   0x1 LB: > { %s4781_s28 = sadd.s32 4294967295, %s5456_s27   ;;  %p4785_p0 = scmp.ge.s32.totalorder %s5456_s27, 1  ;;  %s5456_s27 = sphi %s5506_s27, %s18_s27  }
   0x2   : > { %p285_p1 = scmp.lt.s32.totalorder %s5456_s27, 3 }
   0x4   : > { %p286_p2 = pnand %p4785_p0, %p285_p1 }
   0x6   : > { %289 = sbr.rel (%p286_p2) target bundleno = 2735 (0xaaf), region = 52 }
   0xd   : > { %s4786_s29 = sshll.u32 %s4781_s28, 2  ;;  %v5458_v0 = vmov 0   ;;  %v385_v5 = vlaneseq  ;;  %v7229_v11 = vmov 0.0   ;;  %v1404_v47 = vld [vmem:[%s7226_s6] sm:$0xff]  ;;  %v1405_v48 = vld [vmem:[%s7226_s6 + $0x8] sm:$0xff]  ;;  %v1406_v62 = vld [vmem:[%s7226_s6 + $0x10] sm:$0xff] }
   0xe   : > { %5216 = vset.pattern.permute.xlu0 %v5458_v0  ;;  %p330_p3 = scmp.lt.s32.totalorder %s4786_s29, 7  ;;  %5217 = vset.pattern.permute.xlu1 %v5458_v0  ;;  %v5588_v51 = vpack.c.bf16 %v1405_v48, %v1404_v47  ;;  %v1407_v63 = vld [vmem:[%s7226_s6 + $0x18] sm:$0xff]  ;;  %s4790_s23 = sshll.u32 %s4781_s28, 5  ;;  %vm699_vm4 = vcmask 261120   ;;  %vm1440_vm5 = vcmask 1041409   ;;  %vm1442_vm6 = vcmask 1042434  }
   0xf   : > { %v5522_v6 = vshrl.u32 %v385_v5, 7  ;;  %v5524_v7 = vand.u32 127, %v385_v5  ;;  %v5610_v0 = vpack.c.bf16 %v1407_v63, %v1406_v62  ;;  %p342_p4 = scmp.lt.s32.totalorder %s4790_s23, 63  ;;  %vm1444_vm7 = vcmask 1043459  }
  0x10   : > { %s7333_s29 = smov (!%p330_p3, %s4786_s29), 7  ;;  %5128 = vmatprep.subr.bf16.mxu0 %v5588_v51  ;;  %vm1446_vm8 = vcmask 1044484   ;;  %vm1448_vm9 = vcmask 1045509   ;;  %vm1450_vm10 = vcmask 1046534   ;;  %vm1452_vm11 = vcmask 1047559  }
  0x11   : > { %s5516_s30 = sshll.u32 %s7333_s29, 3  ;;  %7271 = vst [vmem:[#allocation2_spill] sm:$0xff] %v5522_v6  ;;  %7272 = vst [vmem:[#allocation3_spill] sm:$0xff] %v5524_v7  ;;  %v5527_v8 = vsub.s32 0, %v5522_v6  ;;  %v5530_v9 = vsub.s32 1, %v5522_v6  ;;  %v5535_v13 = vsub.s32 2, %v5522_v6  ;;  %5130 = vmatpush3.bf16.msra.mxu0 %v5588_v51 }
  0x12   : > { %s333_s11 = scalar_lea.vmem %s7220_s0, %s5516_s30  ;;  %v5542_v18 = vsub.s32 3, %v5522_v6  ;;  %v5547_v21 = vsub.s32 4, %v5522_v6  ;;  %v5552_v25 = vsub.s32 5, %v5522_v6  ;;  %v5562_v32 = vsub.s32 6, %v5522_v6  ;;  %s339_s18 = scalar_lea.vmem %s7221_s1, %s5516_s30  ;;  %7281 = vst [vmem:[#allocation12_spill] sm:$0xff] %v5610_v0  ;;  %5132 = vmatprep.subr.bf16.mxu0 %v5610_v0 }
  0x13   : > { %v387_v1 = vld [vmem:[%s333_s11] sm:$0xff]  ;;  %v389_v2 = vld [vmem:[%s333_s11 + $0x10] sm:$0xff]  ;;  %v388_v3 = vld [vmem:[%s333_s11 + $0x8] sm:$0xff]  ;;  %7273 = vst [vmem:[#allocation4_spill] sm:$0xff] %v5527_v8  ;;  %v5572_v40 = vsub.s32 7, %v5522_v6  ;;  %s7335_s23 = smov (!%p342_p4, %s4790_s23), 63  ;;  %s7133_s20 = scalar_lea.vmem %s7228_s8, %s5516_s30 }
  0x14   : > { %392 = vperm.xlu0 %5216, %v387_v1   ;;  %398 = vperm.xlu1 %5217, %v389_v2   ;;  %v390_v4 = vld [vmem:[%s333_s11 + $0x18] sm:$0xff]  ;;  %7274 = vst [vmem:[#allocation5_spill] sm:$0xff] %v5530_v9  ;;  %7275 = vst [vmem:[#allocation6_spill] sm:$0xff] %v5535_v13  ;;  %v416_v60 = vld [vmem:[%s339_s18 + $0x8] sm:$0xff]  ;;  %s4791_s24 = sshll.u32 %s7335_s23, 3 }
  0x15   : > { %7276 = vst [vmem:[#allocation7_spill] sm:$0xff] %v5542_v18  ;;  %7277 = vst [vmem:[#allocation8_spill] sm:$0xff] %v5547_v21  ;;  %v415_v61 = vld [vmem:[%s339_s18] sm:$0xff]  ;;  %v417_v1 = vld [vmem:[%s339_s18 + $0x10] sm:$0xff]  ;;  %5134 = vmatpush3.bf16.msra.mxu0 %v5610_v0  ;;  %s5619_s29 = scalar_lea.vmem %s7222_s2, %s4791_s24 }
  0x16   : > { %7278 = vst [vmem:[#allocation9_spill] sm:$0xff] %v5552_v25  ;;  %7279 = vst [vmem:[#allocation10_spill] sm:$0xff] %v5562_v32  ;;  %v418_v2 = vld [vmem:[%s339_s18 + $0x18] sm:$0xff]  ;;  %v5653_v47 = vld [vmem:[%s5619_s29 + $0x50] sm:$0xff] }
  0x17   : > { %7280 = vst [vmem:[#allocation11_spill] sm:$0xff] %v5572_v40 }
  0x18   : > { %395 = vperm.xlu0 %5216, %v388_v3   ;;  %401 = vperm.xlu1 %5217, %v390_v4   ;;  %v5622_v3 = vld [vmem:[%s5619_s29 + $0x8] sm:$0xff]  ;;  %v5625_v4 = vld [vmem:[%s5619_s29] sm:$0xff] }
  0x93   : > { %v393_v10 = vpop.permute.xlu0 %392  ;;  %v399_v24 = vpop.permute.xlu1 %398 }
  0x94   : > { %vm403_vm0 = vcmp.eq.s32.totalorder %v5524_v7, %v393_v10  ;;  %vm405_vm2 = vcmp.eq.s32.totalorder %v5524_v7, %v399_v24 }
  0x95   : > { %v4794_v12 = vsel %vm403_vm0, 1.0, %v7229_v11  ;;  %v4796_v28 = vsel %vm405_vm2, 1.0, %v7229_v11  ;;  %vm1568_vm0 = vcmask 23552   ;;  %vm2015_vm2 = vcmask 392192  }
  0x96   : > { %v453_v14 = vrot.slane %v4794_v12, %v5530_v9  ;;  %v446_v15 = vrot.slane %v4794_v12, %v5527_v8  ;;  %v460_v19 = vrot.slane %v4794_v12, %v5535_v13  ;;  %v467_v23 = vrot.slane %v4794_v12, %v5542_v18 }
  0x97   : > { %v396_v16 = vpop.permute.xlu0 %395  ;;  %v474_v27 = vrot.slane %v4794_v12, %v5547_v21  ;;  %v481_v30 = vrot.slane %v4794_v12, %v5552_v25  ;;  %v558_v31 = vrot.slane %v4796_v28, %v5527_v8  ;;  %v402_v34 = vpop.permute.xlu1 %401  ;;  %v565_v35 = vrot.slane %v4796_v28, %v5530_v9 }
  0x98   : > { %vm404_vm1 = vcmp.eq.s32.totalorder %v5524_v7, %v396_v16  ;;  %455 = vbcast.lane.b32.xlu1 %v453_v14, 256  ;;  %448 = vbcast.lane.b32.xlu0 %v446_v15, 256  ;;  %v488_v36 = vrot.slane %v4794_v12, %v5562_v32  ;;  %vm406_vm3 = vcmp.eq.s32.totalorder %v5524_v7, %v402_v34  ;;  %v5630_v15 = vld [vmem:[%s5619_s29 + $0x40] sm:$0xff]  ;;  %v5633_v16 = vld [vmem:[%s5619_s29 + $0x10] sm:$0xff] }
  0x99   : > { %v4795_v17 = vsel %vm404_vm1, 1.0, %v7229_v11  ;;  %v572_v38 = vrot.slane %v4796_v28, %v5535_v13  ;;  %v4797_v39 = vsel %vm406_vm3, 1.0, %v7229_v11  ;;  %v495_v43 = vrot.slane %v4794_v12, %v5572_v40 }
  0x9a   : > { %v502_v20 = vrot.slane %v4795_v17, %v5527_v8  ;;  %v509_v22 = vrot.slane %v4795_v17, %v5530_v9  ;;  %v516_v26 = vrot.slane %v4795_v17, %v5535_v13  ;;  %v523_v29 = vrot.slane %v4795_v17, %v5542_v18 }
  0x9b   : > { %v530_v33 = vrot.slane %v4795_v17, %v5547_v21  ;;  %v537_v37 = vrot.slane %v4795_v17, %v5552_v25  ;;  %v614_v41 = vrot.slane %v4797_v39, %v5527_v8  ;;  %v621_v42 = vrot.slane %v4797_v39, %v5530_v9 }
  0x9c   : > { %462 = vbcast.lane.b32.xlu0 %v460_v19, 256  ;;  %504 = vbcast.lane.b32.xlu1 %v502_v20, 256  ;;  %v544_v44 = vrot.slane %v4795_v17, %v5562_v32  ;;  %v579_v45 = vrot.slane %v4796_v28, %v5542_v18  ;;  %v628_v46 = vrot.slane %v4797_v39, %v5535_v13  ;;  %vm1626_vm1 = vcmask 1042432  }
  0x9d   : > { %v551_v49 = vrot.slane %v4795_v17, %v5572_v40  ;;  %v586_v50 = vrot.slane %v4796_v28, %v5547_v21  ;;  %v635_v52 = vrot.slane %v4797_v39, %v5542_v18  ;;  %v593_v53 = vrot.slane %v4796_v28, %v5552_v25 }
  0x9e   : > { %v642_v54 = vrot.slane %v4797_v39, %v5547_v21  ;;  %v600_v55 = vrot.slane %v4796_v28, %v5562_v32  ;;  %v649_v56 = vrot.slane %v4797_v39, %v5552_v25  ;;  %v607_v57 = vrot.slane %v4796_v28, %v5572_v40 }
  0x9f   : > { %v656_v58 = vrot.slane %v4797_v39, %v5562_v32  ;;  %v663_v59 = vrot.slane %v4797_v39, %v5572_v40  ;;  %vm3444_vm3 = vcmask 64512  }
  0xa0   : > { %511 = vbcast.lane.b32.xlu0 %v509_v22, 256  ;;  %469 = vbcast.lane.b32.xlu1 %v467_v23, 256 }
  0xa4   : > { %518 = vbcast.lane.b32.xlu0 %v516_v26, 256  ;;  %476 = vbcast.lane.b32.xlu1 %v474_v27, 256 }
  0xa8   : > { %525 = vbcast.lane.b32.xlu0 %v523_v29, 256  ;;  %483 = vbcast.lane.b32.xlu1 %v481_v30, 256  ;;  %v5640_v30 = vld [vmem:[%s5619_s29 + $0x18] sm:$0xff] }
  0xac   : > { %532 = vbcast.lane.b32.xlu0 %v530_v33, 256  ;;  %560 = vbcast.lane.b32.xlu1 %v558_v31, 256  ;;  %v5643_v31 = vld [vmem:[%s5619_s29 + $0x48] sm:$0xff] }
  0xb0   : > { %567 = vbcast.lane.b32.xlu0 %v565_v35, 256  ;;  %490 = vbcast.lane.b32.xlu1 %v488_v36, 256 }
  0xb4   : > { %539 = vbcast.lane.b32.xlu0 %v537_v37, 256  ;;  %574 = vbcast.lane.b32.xlu1 %v572_v38, 256 }
  0xb8   : > { %616 = vbcast.lane.b32.xlu0 %v614_v41, 256  ;;  %623 = vbcast.lane.b32.xlu1 %v621_v42, 256 }
  0xbc   : > { %497 = vbcast.lane.b32.xlu0 %v495_v43, 256  ;;  %546 = vbcast.lane.b32.xlu1 %v544_v44, 256 }
  0xc0   : > { %581 = vbcast.lane.b32.xlu0 %v579_v45, 256  ;;  %630 = vbcast.lane.b32.xlu1 %v628_v46, 256  ;;  %v5650_v46 = vld [vmem:[%s5619_s29 + $0x20] sm:$0xff] }
  0xc4   : > { %553 = vbcast.lane.b32.xlu0 %v551_v49, 256  ;;  %588 = vbcast.lane.b32.xlu1 %v586_v50, 256 }
  0xc8   : > { %637 = vbcast.lane.b32.xlu0 %v635_v52, 256  ;;  %595 = vbcast.lane.b32.xlu1 %v593_v53, 256 }
  0xcc   : > { %644 = vbcast.lane.b32.xlu0 %v642_v54, 256  ;;  %602 = vbcast.lane.b32.xlu1 %v600_v55, 256 }
  0xd0   : > { %651 = vbcast.lane.b32.xlu0 %v649_v56, 256  ;;  %609 = vbcast.lane.b32.xlu1 %v607_v57, 256 }
  0xd4   : > { %658 = vbcast.lane.b32.xlu0 %v656_v58, 256  ;;  %665 = vbcast.lane.b32.xlu1 %v663_v59, 256 }
  0xd8   : > { %423 = vperm.xlu0 %5216, %v416_v60   ;;  %420 = vperm.xlu1 %5217, %v415_v61   ;;  %v5660_v61 = vld [vmem:[%s5619_s29 + $0x28] sm:$0xff] }
  0xd9   : > { %7282 = vst [vmem:[#allocation13_spill] sm:$0xff] %v5660_v61 }
  0xdc   : > { %426 = vperm.xlu1 %5217, %v417_v1  }
  0xe0   : > { %429 = vperm.xlu1 %5217, %v418_v2  }
 0x10a   : > { %v456_v5 = vpop.permute.xlu1 %455  ;;  %v449_v10 = vpop.permute.xlu0 %448 }
 0x10b   : > { %v668_v12 = vmul.f32 %v456_v5, %v5622_v3  ;;  %v667_v14 = vmul.f32 %v449_v10, %v5625_v4  ;;  %v5665_v5 = vld [vmem:[%s5619_s29 + $0x58] sm:$0xff] }
 0x10d   : > { %v707_v17 = vsel %vm699_vm4, %v668_v12, 0.0  ;;  %v700_v19 = vsel %vm699_vm4, %v667_v14, 0.0 }
 0x10e   : > { %v708_v20 = vrot.slane %v707_v17, 4  ;;  %v701_v22 = vrot.slane %v700_v19, 4  ;;  %v505_v23 = vpop.permute.xlu1 %504  ;;  %v463_v24 = vpop.permute.xlu0 %462 }
 0x10f   : > { %v675_v26 = vmul.f32 %v505_v23, %v5630_v15  ;;  %v669_v27 = vmul.f32 %v463_v24, %v5633_v16 }
 0x110   : > { %v709_v28 = vadd.f32 %v708_v20, %v707_v17  ;;  %v702_v29 = vadd.f32 %v701_v22, %v700_v19 }
 0x111   : > { %v756_v33 = vsel %vm699_vm4, %v675_v26, 0.0  ;;  %v714_v34 = vsel %vm699_vm4, %v669_v27, 0.0 }
 0x112   : > { %v757_v35 = vrot.slane %v756_v33, 4  ;;  %v715_v36 = vrot.slane %v714_v34, 4  ;;  %v470_v37 = vpop.permute.xlu1 %469  ;;  %v512_v38 = vpop.permute.xlu0 %511  ;;  %v710_v42 = vrot.slane %v709_v28, 2  ;;  %v703_v43 = vrot.slane %v702_v29, 2 }
 0x113   : > { %v670_v39 = vmul.f32 %v470_v37, %v5640_v30  ;;  %v676_v41 = vmul.f32 %v512_v38, %v5643_v31  ;;  %v5674_v37 = vld [vmem:[%s5619_s29 + $0x60] sm:$0xff] }
 0x114   : > { %v758_v44 = vadd.f32 %v757_v35, %v756_v33  ;;  %v716_v45 = vadd.f32 %v715_v36, %v714_v34  ;;  %v711_v58 = vadd.f32 %v710_v42, %v709_v28  ;;  %v704_v59 = vadd.f32 %v703_v43, %v702_v29  ;;  %v5671_v36 = vld [vmem:[%s5619_s29 + $0x80] sm:$0xff]  ;;  %7284 = vst [vmem:[#allocation15_spill] sm:$0xff] %v5674_v37 }
 0x115   : > { %v721_v48 = vsel %vm699_vm4, %v670_v39, 0.0  ;;  %v763_v49 = vsel %vm699_vm4, %v676_v41, 0.0  ;;  %7283 = vst [vmem:[#allocation14_spill] sm:$0xff] %v5671_v36 }
 0x116   : > { %v717_v50 = vrot.slane %v716_v45, 2  ;;  %v477_v52 = vpop.permute.xlu1 %476  ;;  %v519_v53 = vpop.permute.xlu0 %518  ;;  %v722_v54 = vrot.slane %v721_v48, 4  ;;  %v764_v55 = vrot.slane %v763_v49, 4  ;;  %v759_v60 = vrot.slane %v758_v44, 2 }
 0x117   : > { %v671_v56 = vmul.f32 %v477_v52, %v5650_v46  ;;  %v677_v57 = vmul.f32 %v519_v53, %v5653_v47  ;;  %v712_v24 = vrot.slane %v711_v58, 1  ;;  %v705_v26 = vrot.slane %v704_v59, 1 }
 0x118   : > { %v723_v62 = vadd.f32 %v722_v54, %v721_v48  ;;  %v765_v63 = vadd.f32 %v764_v55, %v763_v49  ;;  %v718_v10 = vadd.f32 %v717_v50, %v716_v45  ;;  %v760_v29 = vadd.f32 %v759_v60, %v758_v44 }
 0x119   : > { %v728_v1 = vsel %vm699_vm4, %v671_v56, 0.0  ;;  %v770_v2 = vsel %vm699_vm4, %v677_v57, 0.0  ;;  %v713_v56 = vadd.f32 %v712_v24, %v711_v58 }
 0x11a   : > { %v729_v12 = vrot.slane %v728_v1, 4  ;;  %v484_v14 = vpop.permute.xlu1 %483  ;;  %v526_v17 = vpop.permute.xlu0 %525  ;;  %v724_v19 = vrot.slane %v723_v62, 2  ;;  %v766_v20 = vrot.slane %v765_v63, 2  ;;  %v771_v22 = vrot.slane %v770_v2, 4 }
 0x11b   : > { %v672_v23 = vmul.f32 %v484_v14, %v5660_v61  ;;  %v678_v28 = vmul.f32 %v526_v17, %v5665_v5  ;;  %v719_v38 = vrot.slane %v718_v10, 1  ;;  %v761_v57 = vrot.slane %v760_v29, 1 }
 0x11c   : > { %v730_v27 = vadd.f32 %v729_v12, %v728_v1  ;;  %v767_v33 = vadd.f32 %v766_v20, %v765_v63  ;;  %v772_v34 = vadd.f32 %v771_v22, %v770_v2  ;;  %v725_v48 = vadd.f32 %v724_v19, %v723_v62  ;;  %v5680_v1 = vld [vmem:[%s5619_s29 + $0x30] sm:$0xff]  ;;  %v5685_v19 = vld [vmem:[%s5619_s29 + $0x88] sm:$0xff] }
 0x11d   : > { %v735_v35 = vsel %vm699_vm4, %v672_v23, 0.0  ;;  %v777_v42 = vsel %vm699_vm4, %v678_v28, 0.0  ;;  %7285 = vst [vmem:[#allocation16_spill] sm:$0xff] %v5680_v1  ;;  %v706_v2 = vadd.f32 %v705_v26, %v704_v59  ;;  %7286 = vst [vmem:[#allocation17_spill] sm:$0xff] %v5685_v19  ;;  %v720_v22 = vadd.f32 %v719_v38, %v718_v10 }
 0x11e   : > { %v731_v39 = vrot.slane %v730_v27, 2  ;;  %v736_v41 = vrot.slane %v735_v35, 4  ;;  %v561_v43 = vpop.permute.xlu1 %560  ;;  %v533_v45 = vpop.permute.xlu0 %532  ;;  %v768_v49 = vrot.slane %v767_v33, 1  ;;  %v773_v50 = vrot.slane %v772_v34, 2 }
 0x11f   : > { %v778_v44 = vrot.slane %v777_v42, 4  ;;  %v683_v54 = vmul.f32 %v561_v43, %v5671_v36  ;;  %v679_v55 = vmul.f32 %v533_v45, %v5674_v37  ;;  %v726_v23 = vrot.slane %v725_v48, 1 }
 0x120   : > { %v732_v52 = vadd.f32 %v731_v39, %v730_v27  ;;  %v737_v53 = vadd.f32 %v736_v41, %v735_v35  ;;  %v774_v60 = vadd.f32 %v773_v50, %v772_v34  ;;  %v769_v27 = vadd.f32 %v768_v49, %v767_v33 }
 0x121   : > { %v779_v63 = vadd.f32 %v778_v44, %v777_v42  ;;  %v812_v62 = vsel %vm699_vm4, %v683_v54, 0.0  ;;  %v784_v14 = vsel %vm699_vm4, %v679_v55, 0.0  ;;  %v762_v26 = vadd.f32 %v761_v57, %v760_v29  ;;  %v5690_v42 = vld [vmem:[%s5619_s29 + $0x90] sm:$0xff]  ;;  %v5696_v54 = vld [vmem:[%s5619_s29 + $0x68] sm:$0xff] }
 0x122   : > { %v738_v12 = vrot.slane %v737_v53, 2  ;;  %v491_v17 = vpop.permute.xlu1 %490  ;;  %v568_v20 = vpop.permute.xlu0 %567  ;;  %v813_v58 = vrot.slane %v812_v62, 4  ;;  %v733_v24 = vrot.slane %v732_v52, 1  ;;  %v775_v28 = vrot.slane %v774_v60, 1  ;;  %7287 = vst [vmem:[#allocation18_spill] sm:$0xff] %v5690_v42  ;;  %7288 = vst [vmem:[#allocation19_spill] sm:$0xff] %v5696_v54 }
 0x123   : > { %v785_v34 = vrot.slane %v784_v14, 4  ;;  %v673_v59 = vmul.f32 %v491_v17, %v5680_v1  ;;  %v780_v35 = vrot.slane %v779_v63, 2  ;;  %v684_v41 = vmul.f32 %v568_v20, %v5685_v19  ;;  %v378_v20 = vld [vmem:[%s5619_s29 + $0xc8] sm:$0xff] }
 0x124   : > { %v814_v39 = vadd.f32 %v813_v58, %v812_v62  ;;  %v1441_v43 = vsel %vm1440_vm5, %v713_v56, %v706_v2  ;;  %v739_v45 = vadd.f32 %v738_v12, %v737_v53  ;;  %v727_v50 = vadd.f32 %v726_v23, %v725_v48  ;;  %v5705_v48 = vld [vmem:[%s5619_s29 + $0xc0] sm:$0xff] }
 0x125   : > { %v786_v10 = vadd.f32 %v785_v34, %v784_v14  ;;  %v742_v33 = vsel %vm699_vm4, %v673_v59, 0.0  ;;  %v1454_v44 = vsel %vm1440_vm5, %v769_v27, %v762_v26  ;;  %v1443_v55 = vsel %vm1442_vm6, %v720_v22, %v1441_v43  ;;  %7289 = vst [vmem:[#allocation20_spill] sm:$0xff] %v5705_v48 }
 0x126   : > { %v575_v38 = vpop.permute.xlu1 %574  ;;  %v540_v49 = vpop.permute.xlu0 %539  ;;  %v743_v29 = vrot.slane %v742_v33, 4  ;;  %v5699_v57 = vadd.f32 %v733_v24, %v732_v52  ;;  %v776_v62 = vadd.f32 %v775_v28, %v774_v60  ;;  %v819_v53 = vsel %vm699_vm4, %v684_v41, 0.0 }
 0x127   : > { %v685_v56 = vmul.f32 %v575_v38, %v5690_v42  ;;  %v781_v2 = vadd.f32 %v780_v35, %v779_v63  ;;  %v815_v12 = vrot.slane %v814_v39, 2  ;;  %v820_v17 = vrot.slane %v819_v53, 4 }
 0x128   : > { %v744_v14 = vadd.f32 %v743_v29, %v742_v33  ;;  %v740_v23 = vrot.slane %v739_v45, 1  ;;  %v787_v27 = vrot.slane %v786_v10, 2  ;;  %v680_v22 = vmul.f32 %v540_v49, %v5696_v54  ;;  %v367_v29 = vld [vmem:[%s5619_s29 + $0x70] sm:$0xff] }
 0x129   : > { %v826_v58 = vsel %vm699_vm4, %v685_v56, 0.0  ;;  %v821_v28 = vadd.f32 %v820_v17, %v819_v53  ;;  %v1445_v63 = vsel %vm1444_vm7, %v727_v50, %v1443_v55  ;;  %v5711_v59 = vsel %vm1442_vm6, %v776_v62, %v1454_v44  ;;  %v5717_v56 = vld [vmem:[%s5619_s29 + $0x38] sm:$0xff] }
 0x12a   : > { %v624_v52 = vpop.permute.xlu1 %623  ;;  %v617_v60 = vpop.permute.xlu0 %616  ;;  %v745_v24 = vrot.slane %v744_v14, 2  ;;  %v827_v34 = vrot.slane %v826_v58, 4  ;;  %v791_v26 = vsel %vm699_vm4, %v680_v22, 0.0  ;;  %v782_v43 = vrot.slane %v781_v2, 1  ;;  %7290 = vst [vmem:[#allocation21_spill] sm:$0xff] %v5717_v56 }
 0x12b   : > { %v692_v35 = vmul.f32 %v624_v52, %v378_v20  ;;  %v691_v41 = vmul.f32 %v617_v60, %v5705_v48  ;;  %v816_v33 = vadd.f32 %v815_v12, %v814_v39  ;;  %v822_v38 = vrot.slane %v821_v28, 2 }
 0x12c   : > { %v828_v49 = vadd.f32 %v827_v34, %v826_v58  ;;  %v788_v53 = vadd.f32 %v787_v27, %v786_v10  ;;  %v792_v17 = vrot.slane %v791_v26, 4  ;;  %v746_v22 = vadd.f32 %v745_v24, %v744_v14 }
 0x12d   : > { %v875_v50 = vsel %vm699_vm4, %v692_v35, 0.0  ;;  %v868_v44 = vsel %vm699_vm4, %v691_v41, 0.0  ;;  %v823_v20 = vadd.f32 %v822_v38, %v821_v28  ;;  %v5722_v34 = vadd.f32 %v740_v23, %v739_v45  ;;  %v5725_v35 = vld [vmem:[%s5619_s29 + $0xd0] sm:$0xff] }
 0x12e   : > { %v547_v55 = vpop.permute.xlu1 %546  ;;  %v498_v62 = vpop.permute.xlu0 %497  ;;  %v829_v52 = vrot.slane %v828_v49, 2  ;;  %v876_v60 = vrot.slane %v875_v50, 4  ;;  %v793_v11 = vadd.f32 %v792_v17, %v791_v26  ;;  %v869_v39 = vrot.slane %v868_v44, 4  ;;  %7291 = vst [vmem:[#allocation22_spill] sm:$0xff] %v5725_v35 }
 0x12f   : > { %v681_v12 = vmul.f32 %v547_v55, %v367_v29  ;;  %v674_v58 = vmul.f32 %v498_v62, %v5717_v56  ;;  %v824_v10 = vrot.slane %v823_v20, 1  ;;  %v817_v26 = vrot.slane %v816_v33, 1  ;;  %v5739_v56 = vld [vmem:[%s5619_s29 + $0xa0] sm:$0xff] }
 0x130   : > { %v830_v27 = vadd.f32 %v829_v52, %v828_v49  ;;  %v877_v6 = vadd.f32 %v876_v60, %v875_v50  ;;  %v794_v0 = vrot.slane %v793_v11, 2  ;;  %v870_v41 = vadd.f32 %v869_v39, %v868_v44  ;;  %v5733_v60 = vld [vmem:[%s5619_s29 + $0x98] sm:$0xff]  ;;  %7293 = vst [vmem:[#allocation24_spill] sm:$0xff] %v5739_v56 }
 0x131   : > { %v798_v42 = vsel %vm699_vm4, %v681_v12, 0.0  ;;  %v749_v14 = vsel %vm699_vm4, %v674_v58, 0.0  ;;  %v789_v38 = vrot.slane %v788_v53, 1  ;;  %v747_v23 = vrot.slane %v746_v22, 1  ;;  %7292 = vst [vmem:[#allocation23_spill] sm:$0xff] %v5733_v60 }
 0x132   : > { %v631_v24 = vpop.permute.xlu1 %630  ;;  %v582_v28 = vpop.permute.xlu0 %581  ;;  %v831_v29 = vrot.slane %v830_v27, 1  ;;  %v799_v45 = vrot.slane %v798_v42, 4  ;;  %v878_v17 = vrot.slane %v877_v6, 2  ;;  %v750_v49 = vrot.slane %v749_v14, 4 }
 0x133   : > { %v693_v50 = vmul.f32 %v631_v24, %v5725_v35  ;;  %v5730_v55 = vadd.f32 %v782_v43, %v781_v2  ;;  %v825_v44 = vadd.f32 %v824_v10, %v823_v20  ;;  %v871_v62 = vrot.slane %v870_v41, 2  ;;  %v5746_v24 = vld [vmem:[%s5619_s29 + $0x78] sm:$0xff] }
 0x134   : > { %v800_v52 = vadd.f32 %v799_v45, %v798_v42  ;;  %v5735_v39 = vadd.f32 %v794_v0, %v793_v11  ;;  %v751_v12 = vadd.f32 %v750_v49, %v749_v14  ;;  %v5743_v2 = vsel %vm1446_vm8, %v5699_v57, %v1445_v63  ;;  %7294 = vst [vmem:[#allocation25_spill] sm:$0xff] %v5746_v24  ;;  %v5756_v63 = vld [vmem:[%s5619_s29 + $0xa8] sm:$0xff] }
 0x135   : > { %v882_v58 = vsel %vm699_vm4, %v693_v50, 0.0  ;;  %v818_v43 = vadd.f32 %v817_v26, %v816_v33  ;;  %v832_v20 = vadd.f32 %v831_v29, %v830_v27  ;;  %v5748_v11 = vadd.f32 %v789_v38, %v788_v53  ;;  %7295 = vst [vmem:[#allocation26_spill] sm:$0xff] %v5756_v63  ;;  %v5766_v29 = vld [vmem:[%s5619_s29 + $0xd8] sm:$0xff] }
 0x136   : > { %v589_v48 = vpop.permute.xlu1 %588  ;;  %v554_v1 = vpop.permute.xlu0 %553  ;;  %v801_v10 = vrot.slane %v800_v52, 2  ;;  %v883_v42 = vrot.slane %v882_v58, 4  ;;  %v879_v0 = vadd.f32 %v878_v17, %v877_v6  ;;  %v686_v14 = vmul.f32 %v582_v28, %v5733_v60  ;;  %7296 = vst [vmem:[#allocation27_spill] sm:$0xff] %v5766_v29 }
 0x137   : > { %v5751_v45 = vadd.f32 %v747_v23, %v746_v22  ;;  %v1461_v49 = vsel %vm1440_vm5, %v825_v44, %v818_v43  ;;  %v872_v50 = vadd.f32 %v871_v62, %v870_v41  ;;  %v752_v35 = vrot.slane %v751_v12, 2 }
 0x138   : > { %v687_v57 = vmul.f32 %v589_v48, %v5739_v56  ;;  %v796_v33 = vrot.slane %v5735_v39, 1  ;;  %v802_v27 = vadd.f32 %v801_v10, %v800_v52  ;;  %v833_v53 = vsel %vm699_vm4, %v686_v14, 0.0  ;;  %v5771_v14 = vld [vmem:[%s5619_s29 + $0xb0] sm:$0xff] }
 0x139   : > { %v682_v6 = vmul.f32 %v554_v1, %v5746_v24  ;;  %v5762_v28 = vsel %vm1442_vm6, %v832_v20, %v1461_v49  ;;  %v884_v41 = vadd.f32 %v883_v42, %v882_v58  ;;  %v834_v38 = vrot.slane %v833_v53, 4  ;;  %7297 = vst [vmem:[#allocation28_spill] sm:$0xff] %v5771_v14  ;;  %v5774_v20 = vld [vmem:[%s5619_s29 + $0xe0] sm:$0xff] }
 0x13a   : > { %v596_v26 = vpop.permute.xlu1 %595  ;;  %v638_v22 = vpop.permute.xlu0 %637  ;;  %v840_v48 = vsel %vm699_vm4, %v687_v57, 0.0  ;;  %v880_v23 = vrot.slane %v879_v0, 1  ;;  %v873_v1 = vrot.slane %v872_v50, 1  ;;  %v753_v52 = vadd.f32 %v752_v35, %v751_v12  ;;  %7298 = vst [vmem:[#allocation29_spill] sm:$0xff] %v5774_v20 }
 0x13b   : > { %v841_v17 = vrot.slane %v840_v48, 4  ;;  %v805_v44 = vsel %vm699_vm4, %v682_v6, 0.0  ;;  %v688_v62 = vmul.f32 %v596_v26, %v5756_v63  ;;  %v835_v43 = vadd.f32 %v834_v38, %v833_v53 }
 0x13c   : > { %v806_v10 = vrot.slane %v805_v44, 4  ;;  %v803_v58 = vrot.slane %v802_v27, 1  ;;  %v694_v57 = vmul.f32 %v638_v22, %v5766_v29  ;;  %v885_v26 = vrot.slane %v884_v41, 2 }
 0x13d   : > { %v842_v42 = vadd.f32 %v841_v17, %v840_v48  ;;  %v847_v49 = vsel %vm699_vm4, %v688_v62, 0.0  ;;  %v836_v63 = vrot.slane %v835_v43, 2  ;;  %v754_v62 = vrot.slane %v753_v52, 1 }
 0x13e   : > { %v603_v24 = vpop.permute.xlu1 %602  ;;  %v645_v6 = vpop.permute.xlu0 %644  ;;  %v807_v56 = vadd.f32 %v806_v10, %v805_v44  ;;  %v848_v35 = vrot.slane %v847_v49, 4  ;;  %v889_v53 = vsel %vm699_vm4, %v694_v57, 0.0  ;;  %v5784_v57 = vadd.f32 %v796_v33, %v5735_v39 }
 0x13f   : > { %v843_v12 = vrot.slane %v842_v42, 2  ;;  %v689_v38 = vmul.f32 %v603_v24, %v5771_v14  ;;  %v695_v60 = vmul.f32 %v645_v6, %v5774_v20  ;;  %v837_v54 = vadd.f32 %v836_v63, %v835_v43 }
 0x140   : > { %v808_v48 = vrot.slane %v807_v56, 2  ;;  %v849_v17 = vadd.f32 %v848_v35, %v847_v49  ;;  %v890_v29 = vrot.slane %v889_v53, 4  ;;  %v5786_v24 = vadd.f32 %v880_v23, %v879_v0 }
 0x141   : > { %v844_v22 = vadd.f32 %v843_v12, %v842_v42  ;;  %v854_v19 = vsel %vm699_vm4, %v689_v38, 0.0  ;;  %v896_v44 = vsel %vm699_vm4, %v695_v60, 0.0  ;;  %v5788_v6 = vadd.f32 %v873_v1, %v872_v50  ;;  %v5793_v12 = vld [vmem:[%s5619_s29 + $0xb8] sm:$0xff]  ;;  %v5796_v38 = vld [vmem:[%s5619_s29 + $0xe8] sm:$0xff] }
 0x142   : > { %v610_v10 = vpop.permute.xlu1 %609  ;;  %v652_v36 = vpop.permute.xlu0 %651  ;;  %v850_v63 = vrot.slane %v849_v17, 2  ;;  %v5790_v43 = vadd.f32 %v803_v58, %v802_v27  ;;  %v891_v49 = vadd.f32 %v890_v29, %v889_v53  ;;  %v855_v35 = vrot.slane %v854_v19, 4  ;;  %7299 = vst [vmem:[#allocation30_spill] sm:$0xff] %v5793_v12  ;;  %7300 = vst [vmem:[#allocation31_spill] sm:$0xff] %v5796_v38 }
 0x143   : > { %v897_v42 = vrot.slane %v896_v44, 4  ;;  %v886_v60 = vadd.f32 %v885_v26, %v884_v41  ;;  %v838_v20 = vrot.slane %v837_v54, 1  ;;  %v755_v39 = vadd.f32 %v754_v62, %v753_v52  ;;  %v5806_v52 = vld [vmem:[%s5619_s29 + $0xf8] sm:$0xff] }
 0x144   : > { %v851_v14 = vadd.f32 %v850_v63, %v849_v17  ;;  %v845_v0 = vrot.slane %v844_v22, 1  ;;  %v809_v33 = vadd.f32 %v808_v48, %v807_v56  ;;  %v856_v50 = vadd.f32 %v855_v35, %v854_v19  ;;  %v5809_v19 = vld [vmem:[%s5619_s29 + $0xf0] sm:$0xff] }
 0x145   : > { %v898_v23 = vadd.f32 %v897_v42, %v896_v44  ;;  %v892_v1 = vrot.slane %v891_v49, 2  ;;  %v1449_v27 = vsel %vm1448_vm9, %v5722_v34, %v5743_v2  ;;  %v690_v29 = vmul.f32 %v610_v10, %v5793_v12 }
 0x146   : > { %v696_v58 = vmul.f32 %v652_v36, %v5796_v38  ;;  %v852_v53 = vrot.slane %v851_v14, 1  ;;  %v857_v41 = vrot.slane %v856_v50, 2  ;;  %v1451_v17 = vsel %vm1450_vm10, %v5751_v45, %v1449_v27  ;;  %v666_v56 = vpop.permute.xlu1 %665  ;;  %v659_v48 = vpop.permute.xlu0 %658 }
 0x147   : > { %v899_v26 = vrot.slane %v898_v23, 2  ;;  %v887_v62 = vrot.slane %v886_v60, 1  ;;  %v5812_v44 = vsel %vm1452_vm11, %v755_v39, %v1451_v17  ;;  %v861_v34 = vsel %vm699_vm4, %v690_v29, 0.0 }
 0x148   : > { %v903_v36 = vsel %vm699_vm4, %v696_v58, 0.0  ;;  %v839_v2 = vadd.f32 %v838_v20, %v837_v54  ;;  %v810_v10 = vrot.slane %v809_v33, 1  ;;  %v858_v63 = vadd.f32 %v857_v41, %v856_v50  ;;  %4975 = vmatprep.mubr.msk.f32.mxu0 %vm699_vm4, %v5812_v44 }
 0x149   : > { %v862_v45 = vrot.slane %v861_v34, 4  ;;  %v893_v35 = vadd.f32 %v892_v1, %v891_v49  ;;  %v904_v42 = vrot.slane %v903_v36, 4  ;;  %v698_v27 = vmul.f32 %v666_v56, %v5806_v52 }
 0x14a   : > { %v697_v38 = vmul.f32 %v659_v48, %v5809_v19  ;;  %v846_v12 = vadd.f32 %v845_v0, %v844_v22  ;;  %v853_v39 = vadd.f32 %v852_v53, %v851_v14  ;;  %v900_v17 = vadd.f32 %v899_v26, %v898_v23 }
 0x14b   : > { %v863_v61 = vadd.f32 %v862_v45, %v861_v34  ;;  %v859_v29 = vrot.slane %v858_v63, 1  ;;  %v905_v37 = vadd.f32 %v904_v42, %v903_v36  ;;  %v917_v54 = vsel %vm699_vm4, %v698_v27, 0.0 }
 0x14c   : > { %v910_v20 = vsel %vm699_vm4, %v697_v38, 0.0  ;;  %v918_v58 = vrot.slane %v917_v54, 4  ;;  %v811_v41 = vadd.f32 %v810_v10, %v809_v33  ;;  %v1456_v49 = vsel %vm1444_vm7, %v5730_v55, %v5711_v59 }
 0x14d   : > { %v864_v50 = vrot.slane %v863_v61, 2  ;;  %v894_v1 = vrot.slane %v893_v35, 1  ;;  %v906_v56 = vrot.slane %v905_v37, 2  ;;  %v911_v48 = vrot.slane %v910_v20, 4 }
 0x14e   : > { %v1457_v14 = vsel %vm1446_vm8, %v5748_v11, %v1456_v49  ;;  %v901_v22 = vrot.slane %v900_v17, 1  ;;  %v919_v23 = vadd.f32 %v918_v58, %v917_v54  ;;  %v860_v38 = vadd.f32 %v859_v29, %v858_v63 }
 0x14f   : > { %v865_v0 = vadd.f32 %v864_v50, %v863_v61  ;;  %v1458_v53 = vsel %vm1448_vm9, %v5784_v57, %v1457_v14  ;;  %v907_v26 = vadd.f32 %v906_v56, %v905_v37  ;;  %v912_v34 = vadd.f32 %v911_v48, %v910_v20 }
 0x150   : > { %v1459_v33 = vsel %vm1450_vm10, %v5790_v43, %v1458_v53  ;;  %v920_v59 = vrot.slane %v919_v23, 2  ;;  %v1463_v11 = vsel %vm1444_vm7, %v839_v2, %v5762_v28  ;;  %v888_v10 = vadd.f32 %v887_v62, %v886_v60 }
 0x151   : > { %v866_v36 = vrot.slane %v865_v0, 1  ;;  %v5832_v55 = vsel %vm1452_vm11, %v811_v41, %v1459_v33  ;;  %v908_v61 = vrot.slane %v907_v26, 1  ;;  %v913_v45 = vrot.slane %v912_v34, 2 }
 0x152   : > { %4976 = vmatmul.mubr.msk.f32.vlgmr.msra.gmra.mrb[0].mxu0 %vm699_vm4, %v5832_v55  ;;  %v1464_v37 = vsel %vm1446_vm8, %v846_v12, %v1463_v11  ;;  %v895_v57 = vadd.f32 %v894_v1, %v893_v35  ;;  %v921_v63 = vadd.f32 %v920_v59, %v919_v23  ;;  %v902_v27 = vadd.f32 %v901_v22, %v900_v17 }
 0x153   : > { %v867_v42 = vadd.f32 %v866_v36, %v865_v0  ;;  %v1465_v43 = vsel %vm1448_vm9, %v853_v39, %v1464_v37  ;;  %v914_v29 = vadd.f32 %v913_v45, %v912_v34  ;;  %v1468_v28 = vsel %vm1440_vm5, %v5786_v24, %v5788_v6 }
 0x154   : > { %v1466_v54 = vsel %vm1450_vm10, %v860_v38, %v1465_v43  ;;  %v909_v60 = vadd.f32 %v908_v61, %v907_v26  ;;  %v922_v62 = vrot.slane %v921_v63, 1  ;;  %v1469_v12 = vsel %vm1442_vm6, %v888_v10, %v1468_v28 }
 0x155   : > { %v5845_v2 = vsel %vm1452_vm11, %v867_v42, %v1466_v54  ;;  %v915_v35 = vrot.slane %v914_v29, 1  ;;  %v1470_v24 = vsel %vm1444_vm7, %v895_v57, %v1469_v12  ;;  %v7301_v50 = vmov 0.0  }
 0x156   : > { %4978 = vmatprep.mubr.msk.f32.mxu0 %vm699_vm4, %v5845_v2  ;;  %v923_v20 = vadd.f32 %v922_v62, %v921_v63  ;;  %v1471_v41 = vsel %vm1446_vm8, %v902_v27, %v1470_v24 }
 0x157   : > { %v421_v39 = vpop.permute.xlu1 %420  ;;  %v424_v17 = vpop.permute.xlu0 %423  ;;  %v916_v6 = vadd.f32 %v915_v35, %v914_v29  ;;  %v1472_v49 = vsel %vm1448_vm9, %v909_v60, %v1471_v41 }
 0x158   : > { %vm431_vm12 = vcmp.eq.s32.totalorder %v5524_v7, %v421_v39  ;;  %vm432_vm13 = vcmp.eq.s32.totalorder %v5524_v7, %v424_v17 }
 0x159   : > { %v4798_v58 = vsel %vm431_vm12, 1.0, %v7301_v50  ;;  %v5859_v48 = vsel %vm432_vm13, 1.0, %v7301_v50  ;;  %v1473_v14 = vsel %vm1450_vm10, %v916_v6, %v1472_v49 }
 0x15a   : > { %v934_v1 = vrot.slane %v4798_v58, %v5530_v9  ;;  %v927_v56 = vrot.slane %v4798_v58, %v5527_v8  ;;  %v5863_v22 = vsel %vm1452_vm11, %v923_v20, %v1473_v14  ;;  %v941_v0 = vrot.slane %v4798_v58, %v5535_v13 }
 0x15b   : > { %4979 = vmatmul.mubr.msk.f32.gmra.mrb[2].mxu0 %vm699_vm4, %v5863_v22  ;;  %v990_v23 = vrot.slane %v5859_v48, %v5530_v9  ;;  %v997_v53 = vrot.slane %v5859_v48, %v5535_v13  ;;  %v983_v38 = vrot.slane %v5859_v48, %v5527_v8  ;;  %v427_v26 = vpop.permute.xlu1 %426  ;;  %v1004_v34 = vrot.slane %v5859_v48, %v5542_v18 }
 0x15c   : > { %936 = vbcast.lane.b32.xlu0 %v934_v1, 256  ;;  %929 = vbcast.lane.b32.xlu1 %v927_v56, 256  ;;  %v948_v33 = vrot.slane %v4798_v58, %v5542_v18  ;;  %vm433_vm14 = vcmp.eq.s32.totalorder %v5524_v7, %v427_v26  ;;  %v1011_v36 = vrot.slane %v5859_v48, %v5547_v21 }
 0x15d   : > { %v955_v59 = vrot.slane %v4798_v58, %v5547_v21  ;;  %v4800_v11 = vsel %vm433_vm14, 1.0, %v7301_v50  ;;  %v962_v45 = vrot.slane %v4798_v58, %v5552_v25  ;;  %v1018_v37 = vrot.slane %v5859_v48, %v5552_v25 }
 0x15e   : > { %v1046_v61 = vrot.slane %v4800_v11, %v5530_v9  ;;  %v1039_v57 = vrot.slane %v4800_v11, %v5527_v8  ;;  %v969_v43 = vrot.slane %v4798_v58, %v5562_v32  ;;  %v976_v27 = vrot.slane %v4798_v58, %v5572_v40 }
 0x15f   : > { %v430_v10 = vpop.permute.xlu1 %429  ;;  %v1053_v29 = vrot.slane %v4800_v11, %v5535_v13  ;;  %v1025_v24 = vrot.slane %v5859_v48, %v5562_v32  ;;  %v1074_v58 = vrot.slane %v4800_v11, %v5552_v25  ;;  %v1060_v41 = vrot.slane %v4800_v11, %v5542_v18 }
 0x160   : > { %943 = vbcast.lane.b32.xlu1 %v941_v0, 256  ;;  %992 = vbcast.lane.b32.xlu0 %v990_v23, 256  ;;  %vm434_vm15 = vcmp.eq.s32.totalorder %v5524_v7, %v430_v10  ;;  %v1081_v49 = vrot.slane %v4800_v11, %v5562_v32  ;;  %v1032_v1 = vrot.slane %v5859_v48, %v5572_v40 }
 0x161   : > { %v5889_v63 = vsel %vm434_vm15, 1.0, %v7301_v50  ;;  %v1067_v50 = vrot.slane %v4800_v11, %v5547_v21  ;;  %v1088_v56 = vrot.slane %v4800_v11, %v5572_v40 }
 0x162   : > { %v1095_v42 = vrot.slane %v5889_v63, %v5527_v8  ;;  %v1102_v20 = vrot.slane %v5889_v63, %v5530_v9  ;;  %v1109_v6 = vrot.slane %v5889_v63, %v5535_v13  ;;  %v1116_v14 = vrot.slane %v5889_v63, %v5542_v18  ;;  %v7310_v9 = vld [vmem:[#allocation21_spill] sm:$0xff] }
 0x163   : > { %v1123_v0 = vrot.slane %v5889_v63, %v5547_v21  ;;  %v1130_v23 = vrot.slane %v5889_v63, %v5552_v25 }
 0x164   : > { %999 = vbcast.lane.b32.xlu0 %v997_v53, 256  ;;  %985 = vbcast.lane.b32.xlu1 %v983_v38, 256 }
 0x168   : > { %1006 = vbcast.lane.b32.xlu0 %v1004_v34, 256  ;;  %950 = vbcast.lane.b32.xlu1 %v948_v33, 256 }
 0x16c   : > { %1013 = vbcast.lane.b32.xlu0 %v1011_v36, 256  ;;  %957 = vbcast.lane.b32.xlu1 %v955_v59, 256 }
 0x170   : > { %1048 = vbcast.lane.b32.xlu0 %v1046_v61, 256  ;;  %964 = vbcast.lane.b32.xlu1 %v962_v45, 256 }
 0x174   : > { %1020 = vbcast.lane.b32.xlu0 %v1018_v37, 256  ;;  %1041 = vbcast.lane.b32.xlu1 %v1039_v57, 256 }
 0x178   : > { %1097 = vbcast.lane.b32.xlu0 %v1095_v42, 256  ;;  %971 = vbcast.lane.b32.xlu1 %v969_v43, 256 }
 0x17c   : > { %978 = vbcast.lane.b32.xlu0 %v976_v27, 256  ;;  %1055 = vbcast.lane.b32.xlu1 %v1053_v29, 256 }
 0x1ce   : > { %v930_v53 = vpop.permute.xlu1 %929  ;;  %v937_v38 = vpop.permute.xlu0 %936 }
 0x1d2   : > { %v944_v26 = vpop.permute.xlu1 %943  ;;  %v993_v48 = vpop.permute.xlu0 %992 }
 0x1d6   : > { %v986_v34 = vpop.permute.xlu1 %985  ;;  %v1000_v33 = vpop.permute.xlu0 %999 }
 0x1da   : > { %v5922_v36 = vpop.permute.xlu1 %950  ;;  %v5924_v59 = vpop.permute.xlu0 %1006 }
 0x1de   : > { %v5926_v11 = vpop.permute.xlu1 %957  ;;  %v5928_v10 = vpop.permute.xlu0 %1013 }
 0x1e2   : > { %v5930_v61 = vpop.permute.xlu1 %964  ;;  %v5932_v45 = vpop.permute.xlu0 %1048 }
 0x1e6   : > { %v5934_v37 = vpop.permute.xlu1 %1041  ;;  %v5936_v57 = vpop.permute.xlu0 %1020 }
 0x1ea   : > { %v5938_v42 = vpop.permute.xlu1 %971  ;;  %v5940_v43 = vpop.permute.xlu0 %1097 }
 0x1ee   : > { %v5942_v27 = vpop.permute.xlu1 %1055  ;;  %v5944_v29 = vpop.permute.xlu0 %978 }
 0x225   : > { %v4977_v54 = vpop.f32.mrb[0].mxu0 }
 0x226   : > { %v1549_v28 = vpop.f32.mrb[1].mxu0  ;;  %v1572_v60 = vsel %vm1568_vm0, %v4977_v54, -inf }
 0x227   : > { %1573 = vmax.xlane.f32.xlu1 %v1572_v60  ;;  %v1569_v62 = vsel %vm1568_vm0, %v1549_v28, -inf }
 0x228   : > { %1570 = vmax.xlane.f32.xlu0 %v1569_v62 }
 0x22e   : > { %v4980_v12 = vpop.f32.mrb[2].mxu0 }
 0x22f   : > { %v5898_v35 = vpop.f32.mrb[3].mxu0  ;;  %v1578_v39 = vsel %vm1568_vm0, %v4980_v12, -inf }
 0x230   : > { %1579 = vmax.xlane.f32.xlu0 %v1578_v39  ;;  %v1575_v17 = vsel %vm1568_vm0, %v5898_v35, -inf }
 0x234   : > { %1576 = vmax.xlane.f32.xlu0 %v1575_v17 }
 0x238   : > { %1104 = vbcast.lane.b32.xlu1 %v1102_v20, 256 }
 0x23c   : > { %1027 = vbcast.lane.b32.xlu1 %v1025_v24, 256 }
 0x240   : > { %1111 = vbcast.lane.b32.xlu1 %v1109_v6, 256 }
 0x244   : > { %1069 = vbcast.lane.b32.xlu1 %v1067_v50, 256 }
 0x248   : > { %1076 = vbcast.lane.b32.xlu1 %v1074_v58, 256 }
 0x24a   : > { %1062 = vbcast.lane.b32.xlu0 %v1060_v41, 256 }
 0x24c   : > { %1083 = vbcast.lane.b32.xlu1 %v1081_v49, 256 }
 0x24e   : > { %1034 = vbcast.lane.b32.xlu0 %v1032_v1, 256 }
 0x250   : > { %1090 = vbcast.lane.b32.xlu1 %v1088_v56, 256 }
 0x252   : > { %1118 = vbcast.lane.b32.xlu0 %v1116_v14, 256 }
 0x256   : > { %1125 = vbcast.lane.b32.xlu0 %v1123_v0, 256 }
 0x25a   : > { %1132 = vbcast.lane.b32.xlu0 %v1130_v23, 256 }
 0x2b4   : > { %v1574_v60 = vpop.xlane.xlu1 %1573 }
 0x2b5   : > { %v1582_v62 = vsub.f32 %v4977_v54, %v1574_v60  ;;  %v1571_v39 = vpop.xlane.xlu0 %1570 }
 0x2b6   : > { %v1581_v17 = vsub.f32 %v1549_v28, %v1571_v39  ;;  %v1137_v39 = vrot.slane %v5889_v63, %v5562_v32 }
 0x2b7   : > { %v1587_v20 = vmul.f32 1.442695, %v1582_v62  ;;  %v1613_v62 = vld [vmem:[%s7225_s5] sm:$0x7] }
 0x2b8   : > { %v1585_v24 = vmul.f32 1.442695, %v1581_v17  ;;  %4981 = vmatprep.subr.msk.mxu1 %vm1626_vm1, %v1613_v62  ;;  %5003 = vmatprep.subr.msk.mxu0 %vm1626_vm1, %v1613_v62  ;;  %v1148_v17 = vmul.f32 %v930_v53, %v5625_v4 }
 0x2b9   : > { %5218 = vpow2.f32 %v1587_v20  ;;  %4982 = vmatpush3.msk.msra.mxu1 %vm1626_vm1, %v1613_v62  ;;  %5004 = vmatpush3.msk.msra.mxu0 %vm1626_vm1, %v1613_v62  ;;  %v1149_v20 = vmul.f32 %v937_v38, %v5622_v3 }
 0x2ba   : > { %5220 = vpow2.f32 %v1585_v24  ;;  %5136 = vmatprep.subr.bf16.mxu1 %v5588_v51  ;;  %v1180_v24 = vsel %vm699_vm4, %v1148_v17, 0.0 }
 0x2bd   : > { %v1580_v6 = vpop.xlane.xlu0 %1579 }
 0x2be   : > { %v1584_v50 = vsub.f32 %v4980_v12, %v1580_v6  ;;  %v1181_v6 = vrot.slane %v1180_v24, 4 }
 0x2c0   : > { %v1591_v58 = vmul.f32 1.442695, %v1584_v50  ;;  %v1187_v50 = vsel %vm699_vm4, %v1149_v20, 0.0  ;;  %v7304_v20 = vld [vmem:[#allocation14_spill] sm:$0xff] }
 0x2c1   : > { %v1577_v41 = vpop.xlane.xlu0 %1576 }
 0x2c2   : > { %5222 = vpow2.f32 %v1591_v58  ;;  %v1583_v1 = vsub.f32 %v5898_v35, %v1577_v41  ;;  %v1144_v35 = vrot.slane %v5889_v63, %v5572_v40  ;;  %v1156_v58 = vmul.f32 %v986_v34, %v5630_v15 }
 0x2c3   : > { %v5946_v49 = vpop.eup %5218  ;;  %v1150_v41 = vmul.f32 %v944_v26, %v5633_v16  ;;  %v1158_v63 = vmul.f32 %v1000_v33, %v5653_v47  ;;  %v1151_v16 = vmul.f32 %v5922_v36, %v5640_v30  ;;  %v1152_v34 = vmul.f32 %v5926_v11, %v5650_v46  ;;  %v7305_v11 = vld [vmem:[#allocation17_spill] sm:$0xff] }
 0x2c4   : > { %v5949_v56 = vpop.eup %5220  ;;  %v1596_v54 = vsel %vm1568_vm0, %v5946_v49, 0.0  ;;  %v1589_v14 = vmul.f32 1.442695, %v1583_v1  ;;  %v5977_v1 = vpop.permute.xlu1 %1104  ;;  %v1236_v4 = vsel %vm699_vm4, %v1156_v58, 0.0  ;;  %v1164_v30 = vmul.f32 %v5934_v37, %v7304_v20 }
 0x2c5   : > { %1597 = vadd.xlane.f32.xlu1 %v1596_v54  ;;  %v1593_v28 = vsel %vm1568_vm0, %v5949_v56, 0.0  ;;  %v1157_v54 = vmul.f32 %v993_v48, %v5643_v31  ;;  %v1194_v3 = vsel %vm699_vm4, %v1150_v41, 0.0  ;;  %v1250_v38 = vsel %vm699_vm4, %v1158_v63, 0.0 }
 0x2c6   : > { %1594 = vadd.xlane.f32.xlu0 %v1593_v28  ;;  %5224 = vpow2.f32 %v1589_v14  ;;  %v1188_v28 = vrot.slane %v1187_v50, 4  ;;  %v1182_v14 = vadd.f32 %v1181_v6, %v1180_v24  ;;  %v1237_v15 = vrot.slane %v1236_v4, 4 }
 0x2c7   : > { %v1243_v53 = vsel %vm699_vm4, %v1157_v54, 0.0  ;;  %v1159_v31 = vmul.f32 %v5924_v59, %v5665_v5  ;;  %v1195_v48 = vrot.slane %v1194_v3, 4  ;;  %v1201_v59 = vsel %vm699_vm4, %v1151_v16, 0.0 }
 0x2c8   : > { %v5989_v26 = vpop.permute.xlu1 %1027  ;;  %v1183_v47 = vrot.slane %v1182_v14, 2  ;;  %v1244_v33 = vrot.slane %v1243_v53, 4  ;;  %v1238_v5 = vadd.f32 %v1237_v15, %v1236_v4  ;;  %v1208_v46 = vsel %vm699_vm4, %v1152_v34, 0.0  ;;  %v7306_v15 = vld [vmem:[#allocation19_spill] sm:$0xff] }
 0x2c9   : > { %v1257_v24 = vsel %vm699_vm4, %v1159_v31, 0.0  ;;  %v1165_v58 = vmul.f32 %v5932_v45, %v7305_v11  ;;  %v1202_v63 = vrot.slane %v1201_v59, 4  ;;  %v1292_v4 = vsel %vm699_vm4, %v1164_v30, 0.0  ;;  %v7308_v11 = vld [vmem:[#allocation20_spill] sm:$0xff] }
 0x2ca   : > { %v1184_v6 = vadd.f32 %v1183_v47, %v1182_v14  ;;  %v1161_v14 = vmul.f32 %v5936_v57, %v7306_v15  ;;  %v1239_v31 = vrot.slane %v1238_v5, 2  ;;  %v1209_v45 = vrot.slane %v1208_v46, 4 }
 0x2cb   : > { %v1172_v15 = vmul.f32 %v5940_v43, %v7308_v11 }
 0x2cc   : > { %v5955_v12 = vpop.eup %5222  ;;  %v6006_v37 = vpop.permute.xlu1 %1111  ;;  %v1185_v34 = vrot.slane %v1184_v6, 1  ;;  %v1271_v57 = vsel %vm699_vm4, %v1161_v14, 0.0  ;;  %v1240_v30 = vadd.f32 %v1239_v31, %v1238_v5 }
 0x2cd   : > { %v1602_v0 = vsel %vm1568_vm0, %v5955_v12, 0.0 }
 0x2ce   : > { %1603 = vadd.xlane.f32.xlu0 %v1602_v0  ;;  %v1189_v0 = vadd.f32 %v1188_v28, %v1187_v50  ;;  %v1196_v50 = vadd.f32 %v1195_v48, %v1194_v3  ;;  %v1258_v28 = vrot.slane %v1257_v24, 4  ;;  %v6011_v3 = vpop.permute.xlu0 %1062  ;;  %v1299_v48 = vsel %vm699_vm4, %v1165_v58, 0.0 }
 0x2cf   : > { %v1241_v14 = vrot.slane %v1240_v30, 1 }
 0x2d0   : > { %v5959_v23 = vpop.eup %5224  ;;  %v1190_v36 = vrot.slane %v1189_v0, 2  ;;  %v1259_v20 = vadd.f32 %v1258_v28, %v1257_v24  ;;  %v6019_v40 = vpop.permute.xlu1 %1069 }
 0x2d1   : > { %v1599_v60 = vsel %vm1568_vm0, %v5959_v23, 0.0 }
 0x2d2   : > { %1600 = vadd.xlane.f32.xlu0 %v1599_v60  ;;  %v7302_v60 = vld [vmem:[#allocation15_spill] sm:$0xff]  ;;  %v1191_v16 = vadd.f32 %v1190_v36, %v1189_v0  ;;  %v1210_v0 = vadd.f32 %v1209_v45, %v1208_v46  ;;  %v1300_v36 = vrot.slane %v1299_v48, 4  ;;  %v6021_v21 = vpop.permute.xlu0 %1034  ;;  %v1260_v28 = vrot.slane %v1259_v20, 2 }
 0x2d3   : > { %v1160_v62 = vmul.f32 %v5928_v10, %v7302_v60  ;;  %v1245_v10 = vadd.f32 %v1244_v33, %v1243_v53  ;;  %v1197_v53 = vrot.slane %v1196_v50, 2  ;;  %v7307_v60 = vld [vmem:[#allocation16_spill] sm:$0xff]  ;;  %v1348_v45 = vsel %vm699_vm4, %v1172_v15, 0.0 }
 0x2d4   : > { %v1192_v58 = vrot.slane %v1191_v16, 1  ;;  %v1211_v31 = vrot.slane %v1210_v0, 2  ;;  %v1301_v43 = vadd.f32 %v1300_v36, %v1299_v48  ;;  %v1242_v48 = vadd.f32 %v1241_v14, %v1240_v30 }
 0x2d5   : > { %v1246_v33 = vrot.slane %v1245_v10, 2  ;;  %v1198_v32 = vadd.f32 %v1197_v53, %v1196_v50 }
 0x2d6   : > { %1146 = vbcast.lane.b32.xlu1 %v1144_v35, 256  ;;  %v1251_v35 = vrot.slane %v1250_v38, 4  ;;  %v1193_v11 = vadd.f32 %v1192_v58, %v1191_v16  ;;  %v1212_v16 = vadd.f32 %v1211_v31, %v1210_v0  ;;  %v1302_v36 = vrot.slane %v1301_v43, 2 }
 0x2d7   : > { %v1199_v53 = vrot.slane %v1198_v32, 1 }
 0x2d8   : > { %v1252_v41 = vadd.f32 %v1251_v35, %v1250_v38  ;;  %v1293_v35 = vrot.slane %v1292_v4, 4  ;;  %v1213_v0 = vrot.slane %v1212_v16, 1  ;;  %v1303_v31 = vadd.f32 %v1302_v36, %v1301_v43 }
 0x2e8   : > { %1139 = vbcast.lane.b32.xlu0 %v1137_v39, 256  ;;  %v7303_v39 = vld [vmem:[#allocation13_spill] sm:$0xff] }
 0x2e9   : > { %v1153_v17 = vmul.f32 %v5930_v61, %v7303_v39  ;;  %v1264_v61 = vsel %vm699_vm4, %v1160_v62, 0.0  ;;  %v1154_v62 = vmul.f32 %v5938_v42, %v7307_v60  ;;  %v1253_v39 = vrot.slane %v1252_v41, 2 }
 0x2ea   : > { %v1265_v38 = vrot.slane %v1264_v61, 4  ;;  %v1247_v42 = vadd.f32 %v1246_v33, %v1245_v10  ;;  %v1294_v60 = vadd.f32 %v1293_v35, %v1292_v4 }
 0x2eb   : > { %v1215_v54 = vsel %vm699_vm4, %v1153_v17, 0.0  ;;  %v1203_v17 = vadd.f32 %v1202_v63, %v1201_v59  ;;  %v1272_v59 = vrot.slane %v1271_v57, 4  ;;  %v1222_v24 = vsel %vm699_vm4, %v1154_v62, 0.0  ;;  %v6029_v62 = vpop.permute.xlu0 %1118 }
 0x2ec   : > { %v1216_v47 = vrot.slane %v1215_v54, 4  ;;  %v1266_v18 = vadd.f32 %v1265_v38, %v1264_v61  ;;  %v1186_v63 = vadd.f32 %v1185_v34, %v1184_v6  ;;  %v1254_v5 = vadd.f32 %v1253_v39, %v1252_v41  ;;  %v7309_v34 = vld [vmem:[#allocation18_spill] sm:$0xff] }
 0x2ed   : > { %v1204_v46 = vrot.slane %v1203_v17, 2  ;;  %v1248_v38 = vrot.slane %v1247_v42, 1  ;;  %v1295_v10 = vrot.slane %v1294_v60, 2  ;;  %v1273_v4 = vadd.f32 %v1272_v59, %v1271_v57 }
 0x2ee   : > { %v1217_v25 = vadd.f32 %v1216_v47, %v1215_v54  ;;  %v1267_v50 = vrot.slane %v1266_v18, 2  ;;  %v1223_v54 = vrot.slane %v1222_v24, 4  ;;  %v6025_v47 = vpop.permute.xlu1 %1076  ;;  %v1261_v6 = vadd.f32 %v1260_v28, %v1259_v20 }
 0x2ef   : > { %v1205_v33 = vadd.f32 %v1204_v46, %v1203_v17  ;;  %v1349_v41 = vrot.slane %v1348_v45, 4  ;;  %v1166_v35 = vmul.f32 %v5942_v27, %v7309_v34  ;;  %v1255_v39 = vrot.slane %v1254_v5, 1 }
 0x2f0   : > { %v1218_v61 = vrot.slane %v1217_v25, 2  ;;  %v1268_v15 = vadd.f32 %v1267_v50, %v1266_v18  ;;  %v1224_v13 = vadd.f32 %v1223_v54, %v1222_v24  ;;  %v1155_v57 = vmul.f32 %v5944_v29, %v7310_v9 }
 0x2f1   : > { %v1200_v59 = vadd.f32 %v1199_v53, %v1198_v32  ;;  %v1249_v7 = vadd.f32 %v1248_v38, %v1247_v42  ;;  %v1296_v17 = vadd.f32 %v1295_v10, %v1294_v60  ;;  %v1274_v20 = vrot.slane %v1273_v4, 2  ;;  %v1126_v32 = vpop.permute.xlu0 %1125 }
 0x2f2   : > { %v1219_v58 = vadd.f32 %v1218_v61, %v1217_v25  ;;  %v1206_v46 = vrot.slane %v1205_v33, 1  ;;  %v1262_v28 = vrot.slane %v1261_v6, 1  ;;  %v1350_v8 = vadd.f32 %v1349_v41, %v1348_v45  ;;  %v1084_v18 = vpop.permute.xlu1 %1083  ;;  %v7311_v61 = vld [vmem:[#allocation23_spill] sm:$0xff] }
 0x2f3   : > { %v1306_v27 = vsel %vm699_vm4, %v1166_v35, 0.0  ;;  %v1754_v30 = vsel %vm1440_vm5, %v1249_v7, %v1242_v48  ;;  %v1256_v14 = vadd.f32 %v1255_v39, %v1254_v5  ;;  %v1269_v25 = vrot.slane %v1268_v15, 1 }
 0x2f4   : > { %v1220_v24 = vrot.slane %v1219_v58, 1  ;;  %v1225_v50 = vrot.slane %v1224_v13, 2  ;;  %v1229_v9 = vsel %vm699_vm4, %v1155_v57, 0.0  ;;  %v1297_v29 = vrot.slane %v1296_v17, 1 }
 0x2f5   : > { %v1275_v42 = vadd.f32 %v1274_v20, %v1273_v4  ;;  %v1307_v60 = vrot.slane %v1306_v27, 4  ;;  %v1167_v45 = vmul.f32 %v6011_v3, %v7311_v61  ;;  %v1747_v54 = vsel %vm1440_vm5, %v1193_v11, %v1186_v63 }
 0x2f6   : > { %v1207_v53 = vadd.f32 %v1206_v46, %v1205_v33  ;;  %v1263_v7 = vadd.f32 %v1262_v28, %v1261_v6  ;;  %v1351_v5 = vrot.slane %v1350_v8, 2  ;;  %v1748_v43 = vsel %vm1442_vm6, %v1200_v59, %v1747_v54  ;;  %v1091_v63 = vpop.permute.xlu1 %1090  ;;  %v6044_v6 = vld [vmem:[%s5619_s29 + $0xc8] sm:$0xff]  ;;  %v1133_v59 = vpop.permute.xlu0 %1132 }
 0x2f7   : > { %v1214_v38 = vadd.f32 %v1213_v0, %v1212_v16  ;;  %v1304_v10 = vrot.slane %v1303_v31, 1  ;;  %v1230_v41 = vrot.slane %v1229_v9, 4  ;;  %v1755_v34 = vsel %vm1442_vm6, %v1256_v14, %v1754_v30 }
 0x2f8   : > { %v1270_v35 = vadd.f32 %v1269_v25, %v1268_v15  ;;  %v1221_v48 = vadd.f32 %v1220_v24, %v1219_v58  ;;  %v1226_v4 = vadd.f32 %v1225_v50, %v1224_v13  ;;  %v1298_v39 = vadd.f32 %v1297_v29, %v1296_v17  ;;  %v7312_v13 = vld [vmem:[#allocation24_spill] sm:$0xff] }
 0x2f9   : > { %v1276_v36 = vrot.slane %v1275_v42, 1  ;;  %v1308_v57 = vadd.f32 %v1307_v60, %v1306_v27  ;;  %v1313_v3 = vsel %vm699_vm4, %v1167_v45, 0.0  ;;  %v1756_v11 = vsel %vm1444_vm7, %v1263_v7, %v1755_v34  ;;  %v6067_v45 = vld [vmem:[%s5619_s29 + $0x70] sm:$0xff]  ;;  %v7315_v7 = vld [vmem:[#allocation25_spill] sm:$0xff] }
 0x2fa   : > { %v1352_v33 = vadd.f32 %v1351_v5, %v1350_v8  ;;  %v1173_v16 = vmul.f32 %v6044_v6, %v5977_v1  ;;  %v1749_v20 = vsel %vm1444_vm7, %v1207_v53, %v1748_v43  ;;  %v1305_v15 = vadd.f32 %v1304_v10, %v1303_v31  ;;  %v7313_v31 = vld [vmem:[#allocation26_spill] sm:$0xff]  ;;  %v7316_v43 = vld [vmem:[#allocation27_spill] sm:$0xff] }
 0x2fb   : > { %v1231_v58 = vadd.f32 %v1230_v41, %v1229_v9  ;;  %v1168_v17 = vmul.f32 %v6019_v40, %v7312_v13  ;;  %v1750_v46 = vsel %vm1446_vm8, %v1214_v38, %v1749_v20  ;;  %v6053_v28 = vsel %vm1446_vm8, %v1270_v35, %v1756_v11  ;;  %v7314_v9 = vld [vmem:[#allocation22_spill] sm:$0xff]  ;;  %v7317_v41 = vld [vmem:[#allocation28_spill] sm:$0xff]  ;;  %v7318_v35 = vld [vmem:[#allocation29_spill] sm:$0xff] }
 0x2fc   : > { %v1227_v8 = vrot.slane %v1226_v4, 1  ;;  %v1314_v27 = vrot.slane %v1313_v3, 4  ;;  %v1751_v30 = vsel %vm1448_vm9, %v1221_v48, %v1750_v46  ;;  %v6057_v1 = vsel %vm1440_vm5, %v1305_v15, %v1298_v39 }
 0x2fd   : > { %v6059_v14 = vadd.f32 %v1276_v36, %v1275_v42  ;;  %v1309_v0 = vrot.slane %v1308_v57, 2  ;;  %v1169_v25 = vmul.f32 %v6025_v47, %v7313_v31  ;;  %v1353_v24 = vrot.slane %v1352_v33, 1  ;;  %v7319_v36 = vld [vmem:[#allocation30_spill] sm:$0xff] }
 0x2fe   : > { %v1355_v50 = vsel %vm699_vm4, %v1173_v16, 0.0  ;;  %v1174_v29 = vmul.f32 %v6006_v37, %v7314_v9  ;;  %v1232_v61 = vrot.slane %v1231_v58, 2  ;;  %v1162_v42 = vmul.f32 %v6067_v45, %v5989_v26 }
 0x2ff   : > { %v1320_v54 = vsel %vm699_vm4, %v1168_v17, 0.0  ;;  %v1228_v53 = vadd.f32 %v1227_v8, %v1226_v4  ;;  %v1315_v47 = vadd.f32 %v1314_v27, %v1313_v3  ;;  %v1163_v5 = vmul.f32 %v6021_v21, %v7315_v7  ;;  %v7320_v4 = vld [vmem:[#allocation31_spill] sm:$0xff] }
 0x300   : > { %v1175_v38 = vmul.f32 %v6029_v62, %v7316_v43  ;;  %v1356_v37 = vrot.slane %v1355_v50, 4  ;;  %v1327_v10 = vsel %vm699_vm4, %v1169_v25, 0.0  ;;  %v1170_v34 = vmul.f32 %v1084_v18, %v7317_v41 }
 0x301   : > { %v1176_v48 = vmul.f32 %v1126_v32, %v7318_v35  ;;  %v1362_v26 = vsel %vm699_vm4, %v1174_v29, 0.0  ;;  %v1321_v39 = vrot.slane %v1320_v54, 4  ;;  %v1171_v11 = vmul.f32 %v1091_v63, %v7319_v36 }
 0x302   : > { %v1177_v3 = vmul.f32 %v1133_v59, %v7320_v4  ;;  %v6082_v16 = vadd.f32 %v1353_v24, %v1352_v33  ;;  %v1310_v21 = vadd.f32 %v1309_v0, %v1308_v57  ;;  %v6084_v20 = vadd.f32 %v1232_v61, %v1231_v58 }
 0x303   : > { %v1278_v62 = vsel %vm699_vm4, %v1162_v42, 0.0  ;;  %v1328_v13 = vrot.slane %v1327_v10, 4  ;;  %v1316_v17 = vrot.slane %v1315_v47, 2  ;;  %v1285_v18 = vsel %vm699_vm4, %v1163_v5, 0.0 }
 0x304   : > { %v1369_v32 = vsel %vm699_vm4, %v1175_v38, 0.0  ;;  %v1357_v46 = vadd.f32 %v1356_v37, %v1355_v50  ;;  %v1363_v8 = vrot.slane %v1362_v26, 4  ;;  %v1334_v63 = vsel %vm699_vm4, %v1170_v34, 0.0 }
 0x305   : > { %v1376_v59 = vsel %vm699_vm4, %v1176_v48, 0.0  ;;  %v1322_v33 = vadd.f32 %v1321_v39, %v1320_v54  ;;  %v1341_v57 = vsel %vm699_vm4, %v1171_v11, 0.0  ;;  %v1383_v58 = vsel %vm699_vm4, %v1177_v3, 0.0 }
 0x306   : > { %v1311_v0 = vrot.slane %v1310_v21, 1  ;;  %v1279_v31 = vrot.slane %v1278_v62, 4  ;;  %v1286_v25 = vrot.slane %v1285_v18, 4  ;;  %v1329_v9 = vadd.f32 %v1328_v13, %v1327_v10 }
 0x307   : > { %v1335_v29 = vrot.slane %v1334_v63, 4  ;;  %v1317_v50 = vadd.f32 %v1316_v17, %v1315_v47  ;;  %v1358_v7 = vrot.slane %v1357_v46, 2  ;;  %v1342_v5 = vrot.slane %v1341_v57, 4 }
 0x308   : > { %v1384_v54 = vrot.slane %v1383_v58, 4  ;;  %v6095_v43 = vsel %vm1450_vm10, %v1228_v53, %v1751_v30  ;;  %v1364_v38 = vadd.f32 %v1363_v8, %v1362_v26  ;;  %v1323_v37 = vrot.slane %v1322_v33, 2 }
 0x309   : > { %v1280_v34 = vadd.f32 %v1279_v31, %v1278_v62  ;;  %v1287_v35 = vadd.f32 %v1286_v25, %v1285_v18  ;;  %v1330_v48 = vrot.slane %v1329_v9, 2  ;;  %v1336_v39 = vadd.f32 %v1335_v29, %v1334_v63  ;;  %v7321_v18 = vld [vmem:[#allocation12_spill] sm:$0xff] }
 0x30a   : > { %v1318_v36 = vrot.slane %v1317_v50, 1  ;;  %v1312_v4 = vadd.f32 %v1311_v0, %v1310_v21  ;;  %v1343_v30 = vadd.f32 %v1342_v5, %v1341_v57  ;;  %v1385_v53 = vadd.f32 %v1384_v54, %v1383_v58 }
 0x30b   : > { %v1359_v3 = vadd.f32 %v1358_v7, %v1357_v46  ;;  %v1288_v13 = vrot.slane %v1287_v35, 2  ;;  %v1337_v21 = vrot.slane %v1336_v39, 2 }
 0x30c   : > { %v1319_v8 = vadd.f32 %v1318_v36, %v1317_v50  ;;  %v1344_v57 = vrot.slane %v1343_v30, 2  ;;  %v1386_v46 = vrot.slane %v1385_v53, 2 }
 0x30d   : > { %v1338_v50 = vadd.f32 %v1337_v21, %v1336_v39 }
 0x30e   : > { %v1387_v7 = vadd.f32 %v1386_v46, %v1385_v53 }
 0x310   : > { %v1388_v53 = vrot.slane %v1387_v7, 1 }
 0x352   : > { %v1598_v40 = vpop.xlane.xlu1 %1597 }
 0x353   : > { %5226 = vrcp.f32 %v1598_v40  ;;  %v1595_v60 = vpop.xlane.xlu0 %1594  ;;  %v1370_v40 = vrot.slane %v1369_v32, 4 }
 0x354   : > { %5228 = vrcp.f32 %v1595_v60  ;;  %v1377_v60 = vrot.slane %v1376_v59, 4 }
 0x355   : > { %v1371_v10 = vadd.f32 %v1370_v40, %v1369_v32  ;;  %v1331_v32 = vadd.f32 %v1330_v48, %v1329_v9  ;;  %v1289_v40 = vadd.f32 %v1288_v13, %v1287_v35 }
 0x356   : > { %v1147_v15 = vpop.permute.xlu1 %1146  ;;  %v1378_v11 = vadd.f32 %v1377_v60, %v1376_v59  ;;  %v1234_v59 = vrot.slane %v6084_v20, 1 }
 0x357   : > { %v1179_v27 = vmul.f32 %v1147_v15, %v5806_v52  ;;  %v1365_v15 = vrot.slane %v1364_v38, 2  ;;  %v1372_v17 = vrot.slane %v1371_v10, 2  ;;  %v1332_v29 = vrot.slane %v1331_v32, 1 }
 0x358   : > { %v1379_v63 = vrot.slane %v1378_v11, 2  ;;  %v1290_v35 = vrot.slane %v1289_v40, 1 }
 0x359   : > { %v1397_v52 = vsel %vm699_vm4, %v1179_v27, 0.0  ;;  %v1360_v27 = vrot.slane %v1359_v3, 1 }
 0x35a   : > { %v1398_v26 = vrot.slane %v1397_v52, 4  ;;  %v1380_v60 = vadd.f32 %v1379_v63, %v1378_v11  ;;  %v1291_v21 = vadd.f32 %v1290_v35, %v1289_v40 }
 0x35b   : > { %v1604_v61 = vpop.xlane.xlu0 %1603 }
 0x35c   : > { %5230 = vrcp.f32 %v1604_v61  ;;  %v1399_v58 = vadd.f32 %v1398_v26, %v1397_v52  ;;  %v1235_v52 = vadd.f32 %v1234_v59, %v6084_v20  ;;  %v1381_v48 = vrot.slane %v1380_v60, 1 }
 0x35d   : > { %v5227_v24 = vpop.eup %5226 }
 0x35e   : > { %v5229_v42 = vpop.eup %5228  ;;  %v1610_v47 = vmul.f32 %v5227_v24, %v5946_v49  ;;  %v1281_v49 = vrot.slane %v1280_v34, 2  ;;  %v1373_v24 = vadd.f32 %v1372_v17, %v1371_v10  ;;  %v1400_v5 = vrot.slane %v1399_v58, 2 }
 0x35f   : > { %v1609_v41 = vmul.f32 %v5229_v42, %v5949_v56  ;;  %v1324_v56 = vadd.f32 %v1323_v37, %v1322_v33  ;;  %v1601_v62 = vpop.xlane.xlu0 %1600  ;;  %v1762_v33 = vsel %vm1442_vm6, %v1312_v4, %v6057_v1  ;;  %v1345_v42 = vadd.f32 %v1344_v57, %v1343_v30 }
 0x360   : > { %5232 = vrcp.f32 %v1601_v62  ;;  %v1282_v25 = vadd.f32 %v1281_v49, %v1280_v34  ;;  %v1763_v61 = vsel %vm1444_vm7, %v1319_v8, %v1762_v33  ;;  %v1374_v10 = vrot.slane %v1373_v24, 1 }
 0x361   : > { %4983 = vmatprep.mubr.msk.f32.mxu1 %vm1568_vm0, %v1609_v41  ;;  %v1325_v0 = vrot.slane %v1324_v56, 1  ;;  %v1361_v41 = vadd.f32 %v1360_v27, %v1359_v3  ;;  %v1333_v4 = vadd.f32 %v1332_v29, %v1331_v32  ;;  %v1346_v30 = vrot.slane %v1345_v42, 1 }
 0x362   : > { %4984 = vmatmul.mubr.msk.f32.vlgmr.msra.gmra.mrb[0].mxu1 %vm1568_vm0, %v1610_v47  ;;  %v1283_v34 = vrot.slane %v1282_v25, 1  ;;  %v1339_v47 = vrot.slane %v1338_v50, 1  ;;  %v1401_v26 = vadd.f32 %v1400_v5, %v1399_v58  ;;  %v6116_v20 = vsel %vm1452_vm11, %v1235_v52, %v6095_v43 }
 0x363   : > { %5138 = vmatpush3.bf16.msra.mxu1 %v5588_v51  ;;  %v1366_v51 = vadd.f32 %v1365_v15, %v1364_v38  ;;  %v1140_v31 = vpop.permute.xlu0 %1139  ;;  %v1326_v38 = vadd.f32 %v1325_v0, %v1324_v56  ;;  %v1375_v49 = vadd.f32 %v1374_v10, %v1373_v24  ;;  %v1382_v32 = vadd.f32 %v1381_v48, %v1380_v60 }
 0x364   : > { %5140 = vmatprep.subr.bf16.mxu1 %v7321_v18  ;;  %v1178_v9 = vmul.f32 %v1140_v31, %v5809_v19  ;;  %v1284_v3 = vadd.f32 %v1283_v34, %v1282_v25  ;;  %v1768_v63 = vsel %vm1440_vm5, %v1361_v41, %v6082_v16  ;;  %v1402_v59 = vrot.slane %v1401_v26, 1 }
 0x365   : > { %v1367_v54 = vrot.slane %v1366_v51, 1  ;;  %v1764_v36 = vsel %vm1446_vm8, %v1326_v38, %v1763_v61  ;;  %v1347_v43 = vadd.f32 %v1346_v30, %v1345_v42 }
 0x366   : > { %v1390_v1 = vsel %vm699_vm4, %v1178_v9, 0.0  ;;  %v5231_v19 = vpop.eup %5230  ;;  %v1765_v17 = vsel %vm1448_vm9, %v1333_v4, %v1764_v36  ;;  %v1403_v25 = vadd.f32 %v1402_v59, %v1401_v26  ;;  %v5388_v59 = vld [vmem:[%s5619_s29 + $0x30] sm:$0xff] }
 0x367   : > { %5142 = vmatpush3.bf16.msra.mxu1 %v7321_v18  ;;  %v1391_v37 = vrot.slane %v1390_v1, 4  ;;  %v1368_v15 = vadd.f32 %v1367_v54, %v1366_v51  ;;  %v1612_v13 = vmul.f32 %v5231_v19, %v5955_v12  ;;  %v1340_v18 = vadd.f32 %v1339_v47, %v1338_v50 }
 0x368   : > { %v1758_v12 = vsel %vm1448_vm9, %v6059_v14, %v6053_v28 }
 0x369   : > { %v1392_v39 = vadd.f32 %v1391_v37, %v1390_v1  ;;  %v1769_v57 = vsel %vm1442_vm6, %v1368_v15, %v1768_v63  ;;  %v1766_v58 = vsel %vm1450_vm10, %v1340_v18, %v1765_v17  ;;  %v1759_v33 = vsel %vm1450_vm10, %v1284_v3, %v1758_v12  ;;  %v2011_v18 = vld [vmem:[%s7223_s3 + $0x10] sm:$0xff]  ;;  %v2014_v63 = vld [vmem:[%s7223_s3 + $0x28] sm:$0xff] }
 0x36a   : > { %v5233_v11 = vpop.eup %5232  ;;  %v1770_v16 = vsel %vm1444_vm7, %v1375_v49, %v1769_v57  ;;  %v6134_v51 = vsel %vm1452_vm11, %v1291_v21, %v1759_v33  ;;  %v6140_v31 = vsel %vm1452_vm11, %v1347_v43, %v1766_v58  ;;  %v2009_v49 = vld [vmem:[%s7223_s3] sm:$0xff]  ;;  %v2012_v21 = vld [vmem:[%s7223_s3 + $0x18] sm:$0xff]  ;;  %v5392_v12 = vld [vmem:[%s5619_s29 + $0x50] sm:$0xff] }
 0x36b   : > { %v1393_v56 = vrot.slane %v1392_v39, 2  ;;  %v1611_v62 = vmul.f32 %v5233_v11, %v5959_v23  ;;  %v1389_v23 = vadd.f32 %v1388_v53, %v1387_v7  ;;  %v1771_v0 = vsel %vm1446_vm8, %v1382_v32, %v1770_v16  ;;  %v5389_v43 = vld [vmem:[%s5619_s29 + $0x38] sm:$0xff]  ;;  %v5390_v57 = vld [vmem:[%s5619_s29 + $0x40] sm:$0xff]  ;;  %v5395_v16 = vld [vmem:[%s5619_s29 + $0x68] sm:$0xff] }
 0x36c   : > { %v6196_v32 = vpack.c.bf16 %v2012_v21, %v2011_v18  ;;  %v5393_v58 = vld [vmem:[%s5619_s29 + $0x58] sm:$0xff]  ;;  %v5394_v33 = vld [vmem:[%s5619_s29 + $0x60] sm:$0xff]  ;;  %v5414_v18 = vld [vmem:[%s5619_s29 + $0x10] sm:$0xff] }
 0x36d   : > { %v1394_v8 = vadd.f32 %v1393_v56, %v1392_v39  ;;  %4986 = vmatprep.mubr.msk.f32.mxu1 %vm1568_vm0, %v1611_v62  ;;  %v1772_v28 = vsel %vm1448_vm9, %v1389_v23, %v1771_v0  ;;  %v5397_v0 = vld [vmem:[%s5619_s29 + $0x80] sm:$0xff] }
 0x36e   : > { %4987 = vmatmul.mubr.msk.f32.gmra.mrb[2].mxu1 %vm1568_vm0, %v1612_v13  ;;  %v2010_v13 = vld [vmem:[%s7223_s3 + $0x8] sm:$0xff] }
 0x36f   : > { %v1395_v46 = vrot.slane %v1394_v8, 1  ;;  %4997 = vmatprep.mubr.msk.f32.mxu1 %vm699_vm4, %v6116_v20  ;;  %v6185_v17 = vpack.c.bf16 %v2010_v13, %v2009_v49  ;;  %v2337_v49 = vld [vmem:[%s7224_s4] sm:$0xff]  ;;  %v2338_v13 = vld [vmem:[%s7224_s4 + $0x8] sm:$0xff] }
 0x370   : > { %v5163_v21 = vpack.c.bf16 %v2338_v13, %v2337_v49 }
 0x371   : > { %v1396_v27 = vadd.f32 %v1395_v46, %v1394_v8  ;;  %5144 = vmatprep.subr.bf16.mxu0 %v6185_v17  ;;  %5187 = vmatprep.subr.bf16.mxu1 %v6185_v17  ;;  %v2013_v8 = vld [vmem:[%s7223_s3 + $0x20] sm:$0xff]  ;;  %v5391_v46 = vld [vmem:[%s5619_s29 + $0x48] sm:$0xff] }
 0x372   : > { %4998 = vmatmul.mubr.msk.f32.vlgmr.msra.gmra.mrb[4].mxu1 %vm699_vm4, %v6134_v51  ;;  %v6206_v23 = vpack.c.bf16 %v2014_v63, %v2013_v8  ;;  %v5416_v8 = vld [vmem:[%s5619_s29 + $0x20] sm:$0xff]  ;;  %v2339_v63 = vld [vmem:[%s7224_s4 + $0x10] sm:$0xff] }
 0x373   : > { %5000 = vmatprep.mubr.msk.f32.mxu1 %vm699_vm4, %v6140_v31  ;;  %v1773_v14 = vsel %vm1450_vm10, %v1396_v27, %v1772_v28  ;;  %5190 = vmatpush3.bf16.msra.mxu1 %v6185_v17  ;;  %v5396_v27 = vld [vmem:[%s5619_s29 + $0x78] sm:$0xff]  ;;  %v5399_v28 = vld [vmem:[%s5619_s29 + $0x90] sm:$0xff] }
 0x374   : > { %v6147_v40 = vsel %vm1452_vm11, %v1403_v25, %v1773_v14  ;;  %5188 = vmatprep.subr.bf16.mxu1 %v6196_v32  ;;  %v5398_v25 = vld [vmem:[%s5619_s29 + $0x88] sm:$0xff]  ;;  %v5400_v14 = vld [vmem:[%s5619_s29 + $0x98] sm:$0xff] }
 0x376   : > { %5001 = vmatmul.mubr.msk.f32.gmra.mrb[6].mxu1 %vm699_vm4, %v6147_v40 }
 0x377   : > { %5191 = vmatpush3.bf16.msra.mxu1 %v6196_v32  ;;  %5032 = vmatprep.mubr.msk.f32.mxu1 %vm2015_vm2, %v5388_v59  ;;  %v5417_v59 = vld [vmem:[%s5619_s29 + $0x28] sm:$0xff] }
 0x378   : > { %5189 = vmatprep.subr.bf16.mxu1 %v6206_v23 }
 0x37b   : > { %5192 = vmatpush3.bf16.msra.mxu1 %v6206_v23 }
 0x37e   : > { %5033 = vmatmul.mubr.msk.f32.vlgmr.msra.gmra.mrb[8].mxu1 %vm2015_vm2, %v5389_v43 }
 0x37f   : > { %5035 = vmatprep.mubr.msk.f32.mxu1 %vm2015_vm2, %v5390_v57  ;;  %v2527_v57 = vld [vmem:[%s7224_s4 + $0x40] sm:$0xff] }
 0x382   : > { %5036 = vmatmul.mubr.msk.f32.gmra.mrb[10].mxu1 %vm2015_vm2, %v5391_v46  ;;  %v2528_v46 = vld [vmem:[%s7224_s4 + $0x48] sm:$0xff] }
 0x383   : > { %5038 = vmatprep.mubr.msk.f32.mxu1 %vm2015_vm2, %v5392_v12  ;;  %v5171_v12 = vpack.c.bf16 %v2528_v46, %v2527_v57 }
 0x386   : > { %5039 = vmatmul.mubr.msk.f32.gmra.mrb[12].mxu1 %vm2015_vm2, %v5393_v58  ;;  %v2530_v58 = vld [vmem:[%s7224_s4 + $0x58] sm:$0xff] }
 0x387   : > { %5041 = vmatprep.mubr.msk.f32.mxu1 %vm2015_vm2, %v5394_v33  ;;  %v2621_v33 = vld [vmem:[%s7224_s4 + $0x68] sm:$0xff] }
 0x38a   : > { %5042 = vmatmul.mubr.msk.f32.gmra.mrb[14].mxu1 %vm2015_vm2, %v5395_v16  ;;  %v2623_v16 = vld [vmem:[%s7224_s4 + $0x78] sm:$0xff] }
 0x38b   : > { %5044 = vmatprep.mubr.msk.f32.mxu1 %vm2015_vm2, %v6067_v45  ;;  %v5401_v45 = vld [vmem:[%s5619_s29 + $0xa0] sm:$0xff] }
 0x38e   : > { %5045 = vmatmul.mubr.msk.f32.gmra.mrb[16].mxu1 %vm2015_vm2, %v5396_v27 }
 0x38f   : > { %5047 = vmatprep.mubr.msk.f32.mxu1 %vm2015_vm2, %v5397_v0 }
 0x392   : > { %5048 = vmatmul.mubr.msk.f32.gmra.mrb[18].mxu1 %vm2015_vm2, %v5398_v25 }
 0x393   : > { %5050 = vmatprep.mubr.msk.f32.mxu1 %vm2015_vm2, %v5399_v28 }
 0x396   : > { %5051 = vmatmul.mubr.msk.f32.gmra.mrb[20].mxu1 %vm2015_vm2, %v5400_v14 }
 0x397   : > { %5053 = vmatprep.mubr.msk.f32.mxu1 %vm2015_vm2, %v5401_v45 }
 0x435   : > { %v6151_v24 = vpop.f32.mrb[0].mxu1 }
 0x436   : > { %v6153_v9 = vpop.f32.mrb[1].mxu1 }
 0x441   : > { %v6155_v29 = vpop.f32.mrb[2].mxu1 }
 0x442   : > { %v6157_v50 = vpop.f32.mrb[3].mxu1 }
 0x445   : > { %v4999_v60 = vpop.f32.mrb[4].mxu1 }
 0x446   : > { %v1849_v61 = vpop.f32.mrb[5].mxu1  ;;  %v1871_v42 = vsel %vm1568_vm0, %v4999_v60, -inf }
 0x447   : > { %1872 = vmax.xlane.f32.xlu1 %v1871_v42  ;;  %v1868_v7 = vsel %vm1568_vm0, %v1849_v61, -inf  ;;  %v5404_v42 = vld [vmem:[%s5619_s29 + $0xb8] sm:$0xff] }
 0x448   : > { %1869 = vmax.xlane.f32.xlu0 %v1868_v7  ;;  %v5405_v7 = vld [vmem:[%s5619_s29 + $0xc0] sm:$0xff] }
 0x449   : > { %v5002_v5 = vpop.f32.mrb[6].mxu1 }
 0x44a   : > { %v1859_v1 = vpop.f32.mrb[7].mxu1  ;;  %v1877_v38 = vsel %vm1568_vm0, %v5002_v5, -inf }
 0x44b   : > { %v1874_v54 = vsel %vm1568_vm0, %v1859_v1, -inf }
 0x44c   : > { %1875 = vmax.xlane.f32.xlu0 %v1874_v54  ;;  %v5408_v54 = vld [vmem:[%s5619_s29 + $0xe0] sm:$0xff] }
 0x450   : > { %1878 = vmax.xlane.f32.xlu0 %v1877_v38  ;;  %v5409_v38 = vld [vmem:[%s5619_s29 + $0xe8] sm:$0xff] }
 0x4d4   : > { %v1873_v37 = vpop.xlane.xlu1 %1872 }
 0x4d5   : > { %v1881_v52 = vsub.f32 %v4999_v60, %v1873_v37  ;;  %v1870_v41 = vpop.xlane.xlu0 %1869  ;;  %v5402_v60 = vld [vmem:[%s5619_s29 + $0xa8] sm:$0xff]  ;;  %v5410_v37 = vld [vmem:[%s5619_s29 + $0xf0] sm:$0xff] }
 0x4d6   : > { %v1880_v34 = vsub.f32 %v1849_v61, %v1870_v41  ;;  %5054 = vmatmul.mubr.msk.f32.gmra.mrb[22].mxu1 %vm2015_vm2, %v5402_v60  ;;  %v5403_v61 = vld [vmem:[%s5619_s29 + $0xb0] sm:$0xff] }
 0x4d7   : > { %v1886_v35 = vmul.f32 1.442695, %v1881_v52  ;;  %5056 = vmatprep.mubr.msk.f32.mxu1 %vm2015_vm2, %v5403_v61  ;;  %v5411_v52 = vld [vmem:[%s5619_s29 + $0xf8] sm:$0xff] }
 0x4d8   : > { %v1884_v10 = vmul.f32 1.442695, %v1880_v34 }
 0x4d9   : > { %5234 = vpow2.f32 %v1886_v35  ;;  %v1876_v19 = vpop.xlane.xlu0 %1875 }
 0x4da   : > { %5236 = vpow2.f32 %v1884_v10  ;;  %v1882_v47 = vsub.f32 %v1859_v1, %v1876_v19  ;;  %5057 = vmatmul.mubr.msk.f32.gmra.mrb[24].mxu1 %vm2015_vm2, %v5404_v42  ;;  %v5407_v1 = vld [vmem:[%s5619_s29 + $0xd8] sm:$0xff] }
 0x4db   : > { %5059 = vmatprep.mubr.msk.f32.mxu1 %vm2015_vm2, %v5405_v7 }
 0x4dc   : > { %v1888_v48 = vmul.f32 1.442695, %v1882_v47 }
 0x4dd   : > { %v1879_v39 = vpop.xlane.xlu0 %1878 }
 0x4de   : > { %5238 = vpow2.f32 %v1888_v48  ;;  %v1883_v36 = vsub.f32 %v5002_v5, %v1879_v39  ;;  %5060 = vmatmul.mubr.msk.f32.gmra.mrb[26].mxu1 %vm2015_vm2, %v6044_v6  ;;  %v5406_v5 = vld [vmem:[%s5619_s29 + $0xd0] sm:$0xff] }
 0x4df   : > { %5062 = vmatprep.mubr.msk.f32.mxu1 %vm2015_vm2, %v5406_v5 }
 0x4e0   : > { %v1890_v11 = vmul.f32 1.442695, %v1883_v36 }
 0x4e2   : > { %5240 = vpow2.f32 %v1890_v11  ;;  %5063 = vmatmul.mubr.msk.f32.gmra.mrb[28].mxu1 %vm2015_vm2, %v5407_v1  ;;  %v2341_v11 = vld [vmem:[%s7224_s4 + $0x20] sm:$0xff] }
 0x4e3   : > { %v6163_v4 = vpop.eup %5234  ;;  %5065 = vmatprep.mubr.msk.f32.mxu1 %vm2015_vm2, %v5408_v54 }
 0x4e4   : > { %v6165_v30 = vpop.eup %5236  ;;  %v1895_v53 = vsel %vm1568_vm0, %v6163_v4, 0.0 }
 0x4e5   : > { %1896 = vadd.xlane.f32.xlu0 %v1895_v53  ;;  %v1892_v26 = vsel %vm1568_vm0, %v6165_v30, 0.0 }
 0x4e6   : > { %1893 = vadd.xlane.f32.xlu1 %v1892_v26  ;;  %5066 = vmatmul.mubr.msk.f32.gmra.mrb[30].mxu1 %vm2015_vm2, %v5409_v38 }
 0x4e7   : > { %5068 = vmatprep.mubr.msk.f32.mxu1 %vm2015_vm2, %v5410_v37 }
 0x4e8   : > { %v6171_v15 = vpop.eup %5238 }
 0x4e9   : > { %v1898_v56 = vsel %vm1568_vm0, %v6171_v15, 0.0 }
 0x4ea   : > { %1899 = vadd.xlane.f32.xlu1 %v1898_v56  ;;  %5069 = vmatmul.mubr.msk.f32.gmra.mrb[32].mxu1 %vm2015_vm2, %v5411_v52  ;;  %v2344_v56 = vld [vmem:[%s7224_s4 + $0x38] sm:$0xff] }
 0x4ec   : > { %v6175_v62 = vpop.eup %5240 }
 0x4ed   : > { %v1901_v3 = vsel %vm1568_vm0, %v6175_v62, 0.0 }
 0x4ee   : > { %1902 = vadd.xlane.f32.xlu0 %v1901_v3  ;;  %v5412_v3 = vld [vmem:[%s5619_s29] sm:$0xff] }
 0x572   : > { %v1897_v41 = vpop.xlane.xlu0 %1896 }
 0x573   : > { %5242 = vrcp.f32 %v1897_v41  ;;  %v1894_v6 = vpop.xlane.xlu1 %1893 }
 0x574   : > { %5244 = vrcp.f32 %v1894_v6 }
 0x577   : > { %v1900_v34 = vpop.xlane.xlu1 %1899 }
 0x578   : > { %5246 = vrcp.f32 %v1900_v34 }
 0x57b   : > { %v1903_v35 = vpop.xlane.xlu0 %1902 }
 0x57c   : > { %5248 = vrcp.f32 %v1903_v35 }
 0x57d   : > { %v5243_v10 = vpop.eup %5242 }
 0x57e   : > { %v5245_v19 = vpop.eup %5244  ;;  %v1909_v48 = vmul.f32 %v5243_v10, %v6163_v4  ;;  %v2342_v4 = vld [vmem:[%s7224_s4 + $0x28] sm:$0xff] }
 0x57f   : > { %v1908_v47 = vmul.f32 %v5245_v19, %v6165_v30  ;;  %v5155_v26 = vpack.c.bf16 %v2342_v4, %v2341_v11 }
 0x581   : > { %5005 = vmatprep.mubr.msk.f32.mxu0 %vm1568_vm0, %v1908_v47 }
 0x582   : > { %v5247_v39 = vpop.eup %5246  ;;  %5006 = vmatmul.mubr.msk.f32.vlgmr.msra.gmra.mrb[4].mxu0 %vm1568_vm0, %v1909_v48 }
 0x583   : > { %5146 = vmatpush3.bf16.msra.mxu0 %v6185_v17  ;;  %v1910_v36 = vmul.f32 %v5247_v39, %v6171_v15  ;;  %v2343_v15 = vld [vmem:[%s7224_s4 + $0x30] sm:$0xff]  ;;  %v5413_v17 = vld [vmem:[%s5619_s29 + $0x8] sm:$0xff] }
 0x584   : > { %5148 = vmatprep.subr.bf16.mxu0 %v6196_v32 }
 0x585   : > { %5008 = vmatprep.mubr.msk.f32.mxu0 %vm1568_vm0, %v1910_v36 }
 0x586   : > { %v5249_v30 = vpop.eup %5248 }
 0x587   : > { %5150 = vmatpush3.bf16.msra.mxu0 %v6196_v32  ;;  %v1911_v53 = vmul.f32 %v5249_v30, %v6175_v62  ;;  %v5159_v62 = vpack.c.bf16 %v2344_v56, %v2343_v15  ;;  %v5415_v32 = vld [vmem:[%s5619_s29 + $0x18] sm:$0xff] }
 0x588   : > { %5152 = vmatprep.subr.bf16.mxu0 %v6206_v23 }
 0x589   : > { %5009 = vmatmul.mubr.msk.f32.gmra.mrb[6].mxu0 %vm1568_vm0, %v1911_v53 }
 0x58a   : > { %5023 = vmatprep.mubr.msk.f32.mxu0 %vm2015_vm2, %v5412_v3  ;;  %v7322_v3 = vld [vmem:[#allocation2_spill] sm:$0xff] }
 0x58b   : > { %5154 = vmatpush3.bf16.msra.mxu0 %v6206_v23  ;;  %v2340_v23 = vld [vmem:[%s7224_s4 + $0x18] sm:$0xff] }
 0x58c   : > { %5156 = vmatprep.subr.bf16.mxu0 %v5155_v26  ;;  %v5167_v43 = vpack.c.bf16 %v2340_v23, %v2339_v63 }
 0x58e   : > { %5024 = vmatmul.mubr.msk.f32.vlgmr.msra.gmra.mrb[8].mxu0 %vm2015_vm2, %v5413_v17 }
 0x58f   : > { %5026 = vmatprep.mubr.msk.f32.mxu0 %vm2015_vm2, %v5414_v18  ;;  %5158 = vmatpush3.bf16.msra.mxu0 %v5155_v26  ;;  %v5460_v26 = vmov 1966171168  }
 0x590   : > { %5160 = vmatprep.subr.bf16.mxu0 %v5159_v62  ;;  %v2731_v15 = vunpack.c.l.s4 %v5460_v26 }
 0x592   : > { %5027 = vmatmul.mubr.msk.f32.gmra.mrb[10].mxu0 %vm2015_vm2, %v5415_v32  ;;  %v2732_v56 = vunpack.c.0.s8 %v2731_v15 }
 0x593   : > { %5029 = vmatprep.mubr.msk.f32.mxu0 %vm2015_vm2, %v5416_v8  ;;  %5162 = vmatpush3.bf16.msra.mxu0 %v5159_v62 }
 0x594   : > { %5164 = vmatprep.subr.bf16.mxu0 %v5163_v21  ;;  %v6426_v62 = vsub.s32 %v2732_v56, %v7322_v3 }
 0x596   : > { %5030 = vmatmul.mubr.msk.f32.gmra.mrb[12].mxu0 %vm2015_vm2, %v5417_v59 }
 0x597   : > { %5079 = vmatprep.mubr.msk.f32.mxu0 %vm699_vm4, %v6153_v9  ;;  %v2529_v9 = vld [vmem:[%s7224_s4 + $0x50] sm:$0xff] }
 0x59a   : > { %5080 = vmatmul.mubr.msk.f32.vlgmr.msra.gmra.mrb[14].mxu0 %vm699_vm4, %v6151_v24  ;;  %v5175_v24 = vpack.c.bf16 %v2530_v58, %v2529_v9 }
 0x59b   : > { %5082 = vmatprep.mubr.msk.f32.mxu0 %vm699_vm4, %v6157_v50  ;;  %5166 = vmatpush3.bf16.msra.mxu0 %v5163_v21  ;;  %v2620_v50 = vld [vmem:[%s7224_s4 + $0x60] sm:$0xff] }
 0x59c   : > { %5168 = vmatprep.subr.bf16.mxu0 %v5167_v43 }
 0x59e   : > { %5083 = vmatmul.mubr.msk.f32.gmra.mrb[16].mxu0 %vm699_vm4, %v6155_v29  ;;  %v5179_v29 = vpack.c.bf16 %v2621_v33, %v2620_v50 }
 0x59f   : > { %5170 = vmatpush3.bf16.msra.mxu0 %v5167_v43  ;;  %5093 = vmatprep.mubr.msk.f32.mxu0 %vm699_vm4, %v5812_v44  ;;  %v2622_v44 = vld [vmem:[%s7224_s4 + $0x70] sm:$0xff] }
 0x5a0   : > { %5172 = vmatprep.subr.bf16.mxu0 %v5171_v12 }
 0x5a2   : > { %5094 = vmatmul.mubr.msk.f32.vlgmr.msra.gmra.mrb[14].mxu0 %vm699_vm4, %v5832_v55  ;;  %v5183_v55 = vpack.c.bf16 %v2623_v16, %v2622_v44 }
 0x5a3   : > { %5096 = vmatprep.mubr.msk.f32.mxu0 %vm699_vm4, %v5845_v2  ;;  %5174 = vmatpush3.bf16.msra.mxu0 %v5171_v12  ;;  %v6359_v2 = vpop.f32.mrb[8].mxu1 }
 0x5a4   : > { %5176 = vmatprep.subr.bf16.mxu0 %v5175_v24 }
 0x5a6   : > { %5097 = vmatmul.mubr.msk.f32.gmra.mrb[16].mxu0 %vm699_vm4, %v5863_v22  ;;  %v6361_v22 = vpop.f32.mrb[9].mxu1 }
 0x5a7   : > { %5178 = vmatpush3.bf16.msra.mxu0 %v5175_v24  ;;  %5107 = vmatprep.mubr.msk.f32.mxu0 %vm699_vm4, %v6116_v20  ;;  %v6363_v27 = vpop.f32.mrb[10].mxu1  ;;  %v7323_v24 = vld [vmem:[#allocation4_spill] sm:$0xff] }
 0x5a8   : > { %5180 = vmatprep.subr.bf16.mxu0 %v5179_v29  ;;  %v6365_v20 = vpop.f32.mrb[11].mxu1 }
 0x5a9   : > { %v6367_v0 = vpop.f32.mrb[12].mxu1 }
 0x5aa   : > { %5108 = vmatmul.mubr.msk.f32.vlgmr.msra.gmra.mrb[14].mxu0 %vm699_vm4, %v6134_v51  ;;  %v6369_v51 = vpop.f32.mrb[13].mxu1 }
 0x5ab   : > { %5110 = vmatprep.mubr.msk.f32.mxu0 %vm699_vm4, %v6140_v31  ;;  %5182 = vmatpush3.bf16.msra.mxu0 %v5179_v29  ;;  %v6371_v25 = vpop.f32.mrb[14].mxu1 }
 0x5ac   : > { %5184 = vmatprep.subr.bf16.mxu0 %v5183_v55  ;;  %v6373_v31 = vpop.f32.mrb[15].mxu1 }
 0x5ad   : > { %v6375_v28 = vpop.f32.mrb[16].mxu1 }
 0x5ae   : > { %5111 = vmatmul.mubr.msk.f32.gmra.mrb[16].mxu0 %vm699_vm4, %v6147_v40  ;;  %v2248_v38 = vpop.f32.mrb[17].mxu1 }
 0x5af   : > { %5186 = vmatpush3.bf16.msra.mxu0 %v5183_v55  ;;  %v6393_v37 = vpop.f32.mrb[18].mxu1 }
 0x5b0   : > { %v6395_v52 = vpop.f32.mrb[19].mxu1 }
 0x5b1   : > { %v6397_v41 = vpop.f32.mrb[20].mxu1 }
 0x5b2   : > { %v6399_v6 = vpop.f32.mrb[21].mxu1 }
 0x5b3   : > { %v6401_v34 = vpop.f32.mrb[22].mxu1 }
 0x5b4   : > { %v6403_v35 = vpop.f32.mrb[23].mxu1 }
 0x5b5   : > { %v6405_v10 = vpop.f32.mrb[24].mxu1 }
 0x5b6   : > { %v6407_v19 = vpop.f32.mrb[25].mxu1 }
 0x5b7   : > { %v6409_v47 = vpop.f32.mrb[26].mxu1 }
 0x5b8   : > { %v6411_v48 = vpop.f32.mrb[27].mxu1 }
 0x5b9   : > { %v6413_v39 = vpop.f32.mrb[28].mxu1 }
 0x5ba   : > { %v6415_v36 = vpop.f32.mrb[29].mxu1 }
 0x5bb   : > { %v6417_v11 = vpop.f32.mrb[30].mxu1 }
 0x5bc   : > { %v6419_v4 = vpop.f32.mrb[31].mxu1 }
 0x5bd   : > { %v6421_v30 = vpop.f32.mrb[32].mxu1 }
 0x5be   : > { %v6423_v53 = vpop.f32.mrb[33].mxu1 }
 0x655   : > { %v5007_v40 = vpop.f32.mrb[4].mxu0 }
 0x656   : > { %v1990_v14 = vpop.f32.mrb[5].mxu0 }
 0x657   : > { %5121 = vmatprep.mubr.msk.f32.mxu0 %vm699_vm4, %v1990_v14 }
 0x658   : > { %5122 = vmatmul.mubr.msk.f32.vlgmr.msra.gmra.mrb[14].mxu0 %vm699_vm4, %v5007_v40 }
 0x65c   : > { %v5010_v45 = vpop.f32.mrb[6].mxu0 }
 0x65d   : > { %v2000_v60 = vpop.f32.mrb[7].mxu0 }
 0x65e   : > { %5124 = vmatprep.mubr.msk.f32.mxu0 %vm699_vm4, %v2000_v60 }
 0x65f   : > { %5125 = vmatmul.mubr.msk.f32.gmra.mrb[16].mxu0 %vm699_vm4, %v5010_v45 }
 0x661   : > { %v6381_v61 = vpop.f32.mrb[8].mxu0 }
 0x662   : > { %v6383_v42 = vpop.f32.mrb[9].mxu0 }
 0x665   : > { %v6385_v7 = vpop.f32.mrb[10].mxu0 }
 0x666   : > { %v6387_v5 = vpop.f32.mrb[11].mxu0 }
 0x669   : > { %v6389_v1 = vpop.f32.mrb[12].mxu0 }
 0x66a   : > { %v6391_v54 = vpop.f32.mrb[13].mxu0 }
 0x72b   : > { %v5123_v49 = vpop.f32.mrb[14].mxu0 }
 0x72c   : > { %v2778_v13 = vcombine.high %v5123_v49, %v5123_v49  ;;  %v2785_v17 = vrot.slane %v5123_v49, %v6426_v62  ;;  %v2702_v18 = vpop.f32.mrb[15].mxu0 }
 0x72d   : > { %v2729_v21 = vcombine.high %v2702_v18, %v2702_v18  ;;  %v2736_v32 = vrot.slane %v2702_v18, %v6426_v62 }
 0x72e   : > { %v2792_v8 = vrot.slane %v2778_v13, %v6426_v62  ;;  %v2793_v63 = vcombine.high %v2785_v17, %v2785_v17  ;;  %v2801_v23 = vrot.slane %v2785_v17, %v6426_v62 }
 0x72f   : > { %v2743_v59 = vrot.slane %v2729_v21, %v6426_v62  ;;  %v2744_v43 = vcombine.high %v2736_v32, %v2736_v32  ;;  %v2752_v57 = vrot.slane %v2736_v32, %v6426_v62 }
 0x730   : > { %v2794_v46 = vcombine.high %v2792_v8, %v2792_v8  ;;  %v2808_v12 = vrot.slane %v2792_v8, %v6426_v62  ;;  %v2815_v9 = vrot.slane %v2793_v63, %v6426_v62  ;;  %v2823_v58 = vcombine.high %v2801_v23, %v2801_v23 }
 0x731   : > { %v2960_v50 = vrot.slane %v2801_v23, %v7323_v24  ;;  %v2745_v33 = vcombine.high %v2743_v59, %v2743_v59  ;;  %v2759_v29 = vrot.slane %v2743_v59, %v6426_v62  ;;  %v2766_v44 = vrot.slane %v2744_v43, %v6426_v62 }
 0x732   : > { %v2822_v16 = vrot.slane %v2794_v46, %v6426_v62  ;;  %v2825_v55 = vcombine.high %v2815_v9, %v2815_v9  ;;  %v2964_v40 = vrot.slane %v2815_v9, %v7323_v24  ;;  %v2968_v14 = vrot.slane %v2823_v58, %v7323_v24  ;;  %v5126_v45 = vpop.f32.mrb[16].mxu0 }
 0x733   : > { %v2976_v60 = vrot.slane %v2808_v12, %v7323_v24  ;;  %v3093_v26 = vadd.f32 %v2960_v50, %v6365_v20  ;;  %v2824_v15 = vcombine.high %v2808_v12, %v2808_v12  ;;  %v2773_v56 = vrot.slane %v2745_v33, %v6426_v62  ;;  %v2712_v49 = vpop.f32.mrb[17].mxu0 }
 0x734   : > { %v2826_v13 = vcombine.high %v2822_v16, %v2822_v16  ;;  %v2972_v17 = vrot.slane %v2825_v55, %v7323_v24  ;;  %v2980_v18 = vrot.slane %v2822_v16, %v7323_v24  ;;  %v3094_v21 = vadd.f32 %v6363_v27, %v2964_v40 }
 0x735   : > { %v3095_v32 = vadd.f32 %v2968_v14, %v6369_v51  ;;  %v3097_v8 = vadd.f32 %v2976_v60, %v6373_v31  ;;  %v2984_v63 = vrot.slane %v2824_v15, %v7323_v24  ;;  %v2774_v46 = vcombine.high %v2752_v57, %v2752_v57 }
 0x736   : > { %v2988_v23 = vrot.slane %v2826_v13, %v7323_v24  ;;  %v6453_v20 = vadd.f32 %v6367_v0, %v2972_v17  ;;  %v6456_v59 = vadd.f32 %v6371_v25, %v2980_v18  ;;  %v2775_v12 = vcombine.high %v2759_v29, %v2759_v29 }
 0x737   : > { %v6458_v43 = vadd.f32 %v2984_v63, %v2248_v38  ;;  %v2776_v51 = vcombine.high %v2766_v44, %v2766_v44  ;;  %v2777_v9 = vcombine.high %v2773_v56, %v2773_v56  ;;  %v2928_v31 = vrot.slane %v2752_v57, %v7323_v24 }
 0x738   : > { %v6461_v27 = vadd.f32 %v6375_v28, %v2988_v23  ;;  %v2932_v58 = vrot.slane %v2766_v44, %v7323_v24  ;;  %v2936_v50 = vrot.slane %v2774_v46, %v7323_v24  ;;  %v2944_v25 = vrot.slane %v2759_v29, %v7323_v24 }
 0x739   : > { %v2940_v0 = vrot.slane %v2776_v51, %v7323_v24  ;;  %v2948_v38 = vrot.slane %v2773_v56, %v7323_v24  ;;  %v2952_v33 = vrot.slane %v2775_v12, %v7323_v24  ;;  %v2956_v16 = vrot.slane %v2777_v9, %v7323_v24 }
 0x73a   : > { %v3085_v28 = vadd.f32 %v2928_v31, %v6383_v42  ;;  %v3086_v55 = vadd.f32 %v6381_v61, %v2932_v58  ;;  %v3087_v57 = vadd.f32 %v2936_v50, %v6387_v5  ;;  %v3089_v40 = vadd.f32 %v2944_v25, %v6391_v54 }
 0x73b   : > { %v6475_v44 = vadd.f32 %v6385_v7, %v2940_v0  ;;  %v6479_v14 = vadd.f32 %v6389_v1, %v2948_v38  ;;  %v6482_v29 = vadd.f32 %v2952_v33, %v6361_v22  ;;  %v6485_v60 = vadd.f32 %v6359_v2, %v2956_v16 }
 0x73c   : > { %v2876_v15 = vcombine.high %v5126_v45, %v5126_v45  ;;  %v2883_v42 = vrot.slane %v5126_v45, %v6426_v62  ;;  %v2827_v61 = vcombine.high %v2712_v49, %v2712_v49  ;;  %5250 = vtanh.f32 %v3093_v26 }
 0x73d   : > { %v2834_v5 = vrot.slane %v2712_v49, %v6426_v62  ;;  %5252 = vtanh.f32 %v3085_v28 }
 0x73e   : > { %v2890_v7 = vrot.slane %v2876_v15, %v6426_v62  ;;  %v2891_v54 = vcombine.high %v2883_v42, %v2883_v42  ;;  %v2899_v1 = vrot.slane %v2883_v42, %v6426_v62  ;;  %5254 = vtanh.f32 %v3094_v21 }
 0x73f   : > { %v2841_v22 = vrot.slane %v2827_v61, %v6426_v62  ;;  %v2842_v56 = vcombine.high %v2834_v5, %v2834_v5  ;;  %v2850_v2 = vrot.slane %v2834_v5, %v6426_v62  ;;  %5256 = vtanh.f32 %v3095_v32 }
 0x740   : > { %v2913_v13 = vrot.slane %v2891_v54, %v6426_v62  ;;  %5258 = vtanh.f32 %v3097_v8  ;;  %v3024_v21 = vrot.slane %v2899_v1, %v7323_v24  ;;  %v2892_v25 = vcombine.high %v2890_v7, %v2890_v7 }
 0x741   : > { %v2843_v45 = vcombine.high %v2841_v22, %v2841_v22  ;;  %v2857_v26 = vrot.slane %v2841_v22, %v6426_v62  ;;  %v2864_v49 = vrot.slane %v2842_v56, %v6426_v62  ;;  %5260 = vtanh.f32 %v3086_v55 }
 0x742   : > { %v2872_v17 = vcombine.high %v2850_v2, %v2850_v2  ;;  %v2992_v18 = vrot.slane %v2850_v2, %v7323_v24  ;;  %v3028_v32 = vrot.slane %v2913_v13, %v7323_v24  ;;  %v3109_v61 = vadd.f32 %v3024_v21, %v6411_v48 }
 0x743   : > { %v2871_v63 = vrot.slane %v2843_v45, %v6426_v62  ;;  %v2874_v23 = vcombine.high %v2864_v49, %v2864_v49  ;;  %v2996_v46 = vrot.slane %v2864_v49, %v7323_v24  ;;  %v3008_v12 = vrot.slane %v2857_v26, %v7323_v24 }
 0x744   : > { %v3000_v8 = vrot.slane %v2872_v17, %v7323_v24  ;;  %v6504_v51 = vadd.f32 %v2992_v18, %v6395_v52  ;;  %v2873_v9 = vcombine.high %v2857_v26, %v2857_v26  ;;  %v3110_v42 = vadd.f32 %v6409_v47, %v3028_v32 }
 0x745   : > { %v2875_v31 = vcombine.high %v2871_v63, %v2871_v63  ;;  %v3004_v58 = vrot.slane %v2874_v23, %v7323_v24  ;;  %v3012_v50 = vrot.slane %v2871_v63, %v7323_v24  ;;  %v6509_v0 = vadd.f32 %v6393_v37, %v2996_v46  ;;  %v6528_v37 = vld [vmem:[%s7227_s7] ss:$0 sm:$0xff] }
 0x746   : > { %v6512_v38 = vadd.f32 %v3000_v8, %v6399_v6  ;;  %v6515_v33 = vadd.f32 %v3008_v12, %v6403_v35  ;;  %v3016_v16 = vrot.slane %v2873_v9, %v7323_v24  ;;  %v5251_v52 = vpop.eup %5250  ;;  %5262 = vtanh.f32 %v3087_v57 }
 0x747   : > { %v3020_v28 = vrot.slane %v2875_v31, %v7323_v24  ;;  %v6520_v55 = vadd.f32 %v6397_v41, %v3004_v58  ;;  %v6523_v15 = vadd.f32 %v6401_v34, %v3012_v50  ;;  %v5253_v6 = vpop.eup %5252  ;;  %v2923_v34 = vcombine.high %v2913_v13, %v2913_v13 }
 0x748   : > { %v6531_v35 = vadd.f32 %v3016_v16, %v6407_v19  ;;  %v5255_v5 = vpop.eup %5254  ;;  %v2921_v54 = vcombine.high %v2899_v1, %v2899_v1  ;;  %5264 = vtanh.f32 %v3089_v40  ;;  %v2920_v56 = vrot.slane %v2892_v25, %v6426_v62 }
 0x749   : > { %v6536_v41 = vadd.f32 %v6405_v10, %v3020_v28  ;;  %v5257_v22 = vpop.eup %5256  ;;  %v2906_v2 = vrot.slane %v2890_v7, %v6426_v62  ;;  %v3164_v19 = vmul.f32 %v5251_v52, %v6528_v37  ;;  %v3036_v47 = vrot.slane %v2923_v34, %v7323_v24 }
 0x74a   : > { %v5259_v45 = vpop.eup %5258  ;;  %v3032_v48 = vrot.slane %v2921_v54, %v7323_v24  ;;  %v3156_v57 = vmul.f32 %v5253_v6, %v6528_v37  ;;  %v3044_v10 = vrot.slane %v2920_v56, %v7323_v24  ;;  %v2924_v13 = vcombine.high %v2920_v56, %v2920_v56 }
 0x74b   : > { %v5261_v26 = vpop.eup %5260  ;;  %v3040_v1 = vrot.slane %v2906_v2, %v7323_v24  ;;  %3204 = vadd.xlane.f32.xlu0 %v3164_v19  ;;  %5266 = vtanh.f32 %v6453_v20  ;;  %v6548_v62 = vadd.f32 %v6413_v39, %v3036_v47  ;;  %v2922_v7 = vcombine.high %v2906_v2, %v2906_v2 }
 0x74c   : > { %v3111_v40 = vadd.f32 %v3032_v48, %v6415_v36  ;;  %3188 = vadd.xlane.f32.xlu1 %v3156_v57  ;;  %5268 = vtanh.f32 %v6456_v59  ;;  %v6553_v49 = vadd.f32 %v6417_v11, %v3044_v10  ;;  %v3052_v18 = vrot.slane %v2924_v13, %v7323_v24 }
 0x74d   : > { %v3113_v17 = vadd.f32 %v3040_v1, %v6419_v4  ;;  %v3048_v21 = vrot.slane %v2922_v7, %v7323_v24  ;;  %v3168_v20 = vmul.f32 %v5259_v45, %v6528_v37  ;;  %v3165_v39 = vmul.f32 %v5255_v5, %v6528_v37 }
 0x74e   : > { %v6561_v63 = vadd.f32 %v6421_v30, %v3052_v18  ;;  %5270 = vtanh.f32 %v6458_v43  ;;  %v3157_v4 = vmul.f32 %v5261_v26, %v6528_v37  ;;  %v3166_v59 = vmul.f32 %v5257_v22, %v6528_v37 }
 0x74f   : > { %v6565_v36 = vadd.f32 %v3048_v21, %v6423_v53  ;;  %3212 = vadd.xlane.f32.xlu0 %v3168_v20  ;;  %5272 = vtanh.f32 %v3109_v61 }
 0x750   : > { %3206 = vadd.xlane.f32.xlu1 %v3165_v39  ;;  %v5263_v11 = vpop.eup %5262  ;;  %5274 = vtanh.f32 %v6475_v44 }
 0x751   : > { %5276 = vtanh.f32 %v6479_v14  ;;  %v3158_v53 = vmul.f32 %v5263_v11, %v6528_v37 }
 0x752   : > { %v5265_v23 = vpop.eup %5264  ;;  %5278 = vtanh.f32 %v6482_v29 }
 0x753   : > { %3190 = vadd.xlane.f32.xlu0 %v3157_v4  ;;  %v3160_v43 = vmul.f32 %v5265_v23, %v6528_v37  ;;  %5280 = vtanh.f32 %v6504_v51 }
 0x754   : > { %3208 = vadd.xlane.f32.xlu1 %v3166_v59  ;;  %5282 = vtanh.f32 %v6461_v27  ;;  %v7324_v59 = vld [vmem:[#allocation3_spill] sm:$0xff] }
 0x755   : > { %v5267_v30 = vpop.eup %5266  ;;  %5284 = vtanh.f32 %v3110_v42  ;;  %v6634_v23 = vsub.s32 %v7324_v59, %v7322_v3 }
 0x756   : > { %v5269_v46 = vpop.eup %5268  ;;  %v3167_v44 = vmul.f32 %v5267_v30, %v6528_v37  ;;  %5286 = vtanh.f32 %v6509_v0 }
 0x757   : > { %3196 = vadd.xlane.f32.xlu0 %v3160_v43  ;;  %v3169_v8 = vmul.f32 %v5269_v46, %v6528_v37  ;;  %5288 = vtanh.f32 %v3111_v40 }
 0x758   : > { %3192 = vadd.xlane.f32.xlu1 %v3158_v53  ;;  %v5271_v32 = vpop.eup %5270  ;;  %5290 = vtanh.f32 %v6515_v33 }
 0x759   : > { %v5273_v12 = vpop.eup %5272  ;;  %v3170_v9 = vmul.f32 %v5271_v32, %v6528_v37  ;;  %5292 = vtanh.f32 %v3113_v17 }
 0x75a   : > { %v5275_v14 = vpop.eup %5274  ;;  %v3180_v29 = vmul.f32 %v5273_v12, %v6528_v37  ;;  %5294 = vtanh.f32 %v6485_v60 }
 0x75b   : > { %3214 = vadd.xlane.f32.xlu0 %v3169_v8  ;;  %v5277_v31 = vpop.eup %5276  ;;  %v3159_v58 = vmul.f32 %v5275_v14, %v6528_v37  ;;  %5296 = vtanh.f32 %v6512_v38 }
 0x75c   : > { %3210 = vadd.xlane.f32.xlu1 %v3167_v44  ;;  %v5279_v51 = vpop.eup %5278  ;;  %v3161_v50 = vmul.f32 %v5277_v31, %v6528_v37  ;;  %5298 = vtanh.f32 %v6548_v62 }
 0x75d   : > { %v5281_v27 = vpop.eup %5280  ;;  %v3162_v52 = vmul.f32 %v5279_v51, %v6528_v37  ;;  %5300 = vtanh.f32 %v6553_v49 }
 0x75e   : > { %v5283_v25 = vpop.eup %5282  ;;  %v3172_v16 = vmul.f32 %v5281_v27, %v6528_v37  ;;  %5302 = vtanh.f32 %v6520_v55 }
 0x75f   : > { %3216 = vadd.xlane.f32.xlu0 %v3170_v9  ;;  %v5285_v0 = vpop.eup %5284  ;;  %v3171_v33 = vmul.f32 %v5283_v25, %v6528_v37  ;;  %5304 = vtanh.f32 %v6531_v35 }
 0x760   : > { %3236 = vadd.xlane.f32.xlu1 %v3180_v29  ;;  %v5287_v28 = vpop.eup %5286  ;;  %v3181_v6 = vmul.f32 %v5285_v0, %v6528_v37  ;;  %5306 = vtanh.f32 %v6523_v15 }
 0x761   : > { %v5289_v42 = vpop.eup %5288  ;;  %v3173_v60 = vmul.f32 %v5287_v28, %v6528_v37  ;;  %5308 = vtanh.f32 %v6536_v41 }
 0x762   : > { %v5291_v61 = vpop.eup %5290  ;;  %v3182_v5 = vmul.f32 %v5289_v42, %v6528_v37  ;;  %5310 = vtanh.f32 %v6561_v63 }
 0x763   : > { %3194 = vadd.xlane.f32.xlu0 %v3159_v58  ;;  %v5293_v34 = vpop.eup %5292  ;;  %v3176_v22 = vmul.f32 %v5291_v61, %v6528_v37  ;;  %5312 = vtanh.f32 %v6565_v36 }
 0x764   : > { %3198 = vadd.xlane.f32.xlu1 %v3161_v50  ;;  %v5295_v38 = vpop.eup %5294  ;;  %v3184_v54 = vmul.f32 %v5293_v34, %v6528_v37 }
 0x765   : > { %v5297_v56 = vpop.eup %5296  ;;  %v3163_v55 = vmul.f32 %v5295_v38, %v6528_v37 }
 0x766   : > { %v5299_v2 = vpop.eup %5298  ;;  %v3174_v19 = vmul.f32 %v5297_v56, %v6528_v37 }
 0x767   : > { %3220 = vadd.xlane.f32.xlu0 %v3172_v16  ;;  %v5301_v45 = vpop.eup %5300  ;;  %v3183_v47 = vmul.f32 %v5299_v2, %v6528_v37 }
 0x768   : > { %3200 = vadd.xlane.f32.xlu1 %v3162_v52  ;;  %v5303_v35 = vpop.eup %5302  ;;  %v3185_v15 = vmul.f32 %v5301_v45, %v6528_v37 }
 0x769   : > { %v5305_v48 = vpop.eup %5304  ;;  %v3175_v26 = vmul.f32 %v5303_v35, %v6528_v37 }
 0x76a   : > { %v5307_v41 = vpop.eup %5306  ;;  %v3178_v57 = vmul.f32 %v5305_v48, %v6528_v37 }
 0x76b   : > { %3238 = vadd.xlane.f32.xlu0 %v3181_v6  ;;  %v5309_v10 = vpop.eup %5308  ;;  %v3177_v62 = vmul.f32 %v5307_v41, %v6528_v37 }
 0x76c   : > { %3218 = vadd.xlane.f32.xlu1 %v3171_v33  ;;  %v5311_v1 = vpop.eup %5310  ;;  %v3179_v13 = vmul.f32 %v5309_v10, %v6528_v37 }
 0x76d   : > { %v5313_v40 = vpop.eup %5312  ;;  %v3187_v7 = vmul.f32 %v5311_v1, %v6528_v37 }
 0x76e   : > { %v3186_v49 = vmul.f32 %v5313_v40, %v6528_v37 }
 0x76f   : > { %3240 = vadd.xlane.f32.xlu0 %v3182_v5 }
 0x770   : > { %3222 = vadd.xlane.f32.xlu1 %v3173_v60 }
 0x773   : > { %3244 = vadd.xlane.f32.xlu0 %v3184_v54 }
 0x774   : > { %3228 = vadd.xlane.f32.xlu1 %v3176_v22 }
 0x777   : > { %3224 = vadd.xlane.f32.xlu0 %v3174_v19 }
 0x778   : > { %3202 = vadd.xlane.f32.xlu1 %v3163_v55 }
 0x77b   : > { %3242 = vadd.xlane.f32.xlu0 %v3183_v47 }
 0x77c   : > { %3246 = vadd.xlane.f32.xlu1 %v3185_v15 }
 0x77f   : > { %3232 = vadd.xlane.f32.xlu0 %v3178_v57 }
 0x780   : > { %3226 = vadd.xlane.f32.xlu1 %v3175_v26 }
 0x783   : > { %3234 = vadd.xlane.f32.xlu0 %v3179_v13 }
 0x784   : > { %3230 = vadd.xlane.f32.xlu1 %v3177_v62 }
 0x787   : > { %3250 = vadd.xlane.f32.xlu0 %v3187_v7 }
 0x788   : > { %3248 = vadd.xlane.f32.xlu1 %v3186_v49 }
 0x7d8   : > { %v6612_v17 = vpop.xlane.xlu0 %3204 }
 0x7d9   : > { %v6614_v18 = vpop.xlane.xlu1 %3188  ;;  %v3319_v32 = vrot.slane %v6612_v17, %v6634_v23 }
 0x7da   : > { %v3287_v42 = vrot.slane %v6614_v18, %v6634_v23 }
 0x7dc   : > { %v6616_v21 = vpop.xlane.xlu0 %3212 }
 0x7dd   : > { %v6618_v20 = vpop.xlane.xlu1 %3206  ;;  %v3335_v29 = vrot.slane %v6616_v21, %v6634_v23 }
 0x7de   : > { %v3323_v30 = vrot.slane %v6618_v20, %v6634_v23 }
 0x7e0   : > { %v6620_v39 = vpop.xlane.xlu0 %3190  ;;  %v3419_v44 = vsel %vm1440_vm5, %v3323_v30, %v3319_v32 }
 0x7e1   : > { %v6622_v63 = vpop.xlane.xlu1 %3208  ;;  %v3291_v0 = vrot.slane %v6620_v39, %v6634_v23 }
 0x7e2   : > { %v3327_v43 = vrot.slane %v6622_v63, %v6634_v23 }
 0x7e3   : > { %v3412_v54 = vsel %vm1440_vm5, %v3291_v0, %v3287_v42 }
 0x7e4   : > { %v6624_v36 = vpop.xlane.xlu0 %3196  ;;  %v3420_v3 = vsel %vm1442_vm6, %v3327_v43, %v3419_v44 }
 0x7e5   : > { %v6626_v11 = vpop.xlane.xlu1 %3192  ;;  %v3303_v2 = vrot.slane %v6624_v36, %v6634_v23 }
 0x7e6   : > { %v3295_v6 = vrot.slane %v6626_v11, %v6634_v23 }
 0x7e8   : > { %v6628_v4 = vpop.xlane.xlu0 %3214  ;;  %v3413_v22 = vsel %vm1442_vm6, %v3295_v6, %v3412_v54 }
 0x7e9   : > { %v6630_v37 = vpop.xlane.xlu1 %3210  ;;  %v3339_v50 = vrot.slane %v6628_v4, %v6634_v23 }
 0x7ea   : > { %v3331_v8 = vrot.slane %v6630_v37, %v6634_v23 }
 0x7ec   : > { %v6640_v53 = vpop.xlane.xlu0 %3216  ;;  %v3421_v9 = vsel %vm1444_vm7, %v3331_v8, %v3420_v3 }
 0x7ed   : > { %v6642_v46 = vpop.xlane.xlu1 %3236  ;;  %v3422_v31 = vsel %vm1446_vm8, %v3335_v29, %v3421_v9  ;;  %v3343_v27 = vrot.slane %v6640_v53, %v6634_v23 }
 0x7ee   : > { %v3423_v25 = vsel %vm1448_vm9, %v3339_v50, %v3422_v31  ;;  %v3383_v43 = vrot.slane %v6642_v46, %v6634_v23 }
 0x7ef   : > { %v3424_v33 = vsel %vm1450_vm10, %v3343_v27, %v3423_v25 }
 0x7f0   : > { %v6650_v12 = vpop.xlane.xlu0 %3194 }
 0x7f1   : > { %v6652_v14 = vpop.xlane.xlu1 %3198  ;;  %v3299_v61 = vrot.slane %v6650_v12, %v6634_v23 }
 0x7f2   : > { %v3307_v45 = vrot.slane %v6652_v14, %v6634_v23 }
 0x7f3   : > { %v3414_v56 = vsel %vm1444_vm7, %v3299_v61, %v3413_v22 }
 0x7f4   : > { %v6658_v51 = vpop.xlane.xlu0 %3220  ;;  %v3415_v35 = vsel %vm1446_vm8, %v3303_v2, %v3414_v56 }
 0x7f5   : > { %v6660_v58 = vpop.xlane.xlu1 %3200  ;;  %v3416_v41 = vsel %vm1448_vm9, %v3307_v45, %v3415_v35  ;;  %v3351_v59 = vrot.slane %v6658_v51, %v6634_v23 }
 0x7f6   : > { %v3311_v47 = vrot.slane %v6660_v58, %v6634_v23 }
 0x7f8   : > { %v6667_v16 = vpop.xlane.xlu0 %3238  ;;  %v3417_v26 = vsel %vm1450_vm10, %v3311_v47, %v3416_v41 }
 0x7f9   : > { %v6669_v52 = vpop.xlane.xlu1 %3218  ;;  %v3387_v7 = vrot.slane %v6667_v16, %v6634_v23 }
 0x7fa   : > { %v3347_v28 = vrot.slane %v6669_v52, %v6634_v23 }
 0x7fb   : > { %v3433_v29 = vsel %vm1440_vm5, %v3387_v7, %v3383_v43 }
 0x7fc   : > { %v3425_v5 = vsel %vm1452_vm11, %v3347_v28, %v3424_v33  ;;  %v6683_v60 = vpop.xlane.xlu0 %3240 }
 0x7fd   : > { %v6685_v34 = vpop.xlane.xlu1 %3222  ;;  %v3448_v38 = vsel %vm3444_vm3, %v3425_v5, -inf  ;;  %v3391_v30 = vrot.slane %v6683_v60, %v6634_v23 }
 0x7fe   : > { %3449 = vmax.xlane.f32.xlu0 %v3448_v38  ;;  %v3355_v40 = vrot.slane %v6685_v34, %v6634_v23 }
 0x7ff   : > { %v3434_v50 = vsel %vm1442_vm6, %v3391_v30, %v3433_v29  ;;  %v7325_v30 = vld [vmem:[#allocation5_spill] sm:$0xff] }
 0x800   : > { %v6693_v19 = vpop.xlane.xlu0 %3244  ;;  %v3426_v3 = vsel %vm1440_vm5, %v3355_v40, %v3351_v59 }
 0x801   : > { %v6695_v55 = vpop.xlane.xlu1 %3228  ;;  %v3399_v33 = vrot.slane %v6693_v19, %v6634_v23 }
 0x802   : > { %v3367_v25 = vrot.slane %v6695_v55, %v6634_v23 }
 0x804   : > { %v6702_v15 = vpop.xlane.xlu0 %3224 }
 0x805   : > { %v6704_v48 = vpop.xlane.xlu1 %3202  ;;  %v3359_v49 = vrot.slane %v6702_v15, %v6634_v23 }
 0x806   : > { %v3315_v57 = vrot.slane %v6704_v48, %v6634_v23 }
 0x807   : > { %v3427_v31 = vsel %vm1442_vm6, %v3359_v49, %v3426_v3 }
 0x808   : > { %v3418_v10 = vsel %vm1452_vm11, %v3315_v57, %v3417_v26  ;;  %v6711_v1 = vpop.xlane.xlu0 %3242 }
 0x809   : > { %v6713_v13 = vpop.xlane.xlu1 %3246  ;;  %v3445_v62 = vsel %vm3444_vm3, %v3418_v10, -inf  ;;  %v3395_v32 = vrot.slane %v6711_v1, %v6634_v23 }
 0x80a   : > { %3446 = vmax.xlane.f32.xlu1 %v3445_v62  ;;  %v3403_v61 = vrot.slane %v6713_v13, %v6634_v23 }
 0x80b   : > { %v3435_v0 = vsel %vm1444_vm7, %v3395_v32, %v3434_v50  ;;  %v7326_v32 = vld [vmem:[#allocation6_spill] sm:$0xff] }
 0x80c   : > { %v6730_v8 = vpop.xlane.xlu0 %3232  ;;  %v3436_v54 = vsel %vm1446_vm8, %v3399_v33, %v3435_v0  ;;  %v7329_v0 = vld [vmem:[#allocation7_spill] sm:$0xff] }
 0x80d   : > { %v6732_v44 = vpop.xlane.xlu1 %3226  ;;  %v3375_v5 = vrot.slane %v6730_v8, %v6634_v23  ;;  %v3437_v57 = vsel %vm1448_vm9, %v3403_v61, %v3436_v54  ;;  %v7330_v54 = vld [vmem:[#allocation10_spill] sm:$0xff] }
 0x80e   : > { %v3363_v9 = vrot.slane %v6732_v44, %v6634_v23 }
 0x810   : > { %v3428_v27 = vsel %vm1444_vm7, %v3363_v9, %v3427_v31  ;;  %v6744_v28 = vpop.xlane.xlu0 %3234  ;;  %v7327_v9 = vld [vmem:[#allocation8_spill] sm:$0xff]  ;;  %v7328_v31 = vld [vmem:[#allocation9_spill] sm:$0xff] }
 0x811   : > { %v6746_v6 = vpop.xlane.xlu1 %3230  ;;  %v3429_v38 = vsel %vm1446_vm8, %v3367_v25, %v3428_v27  ;;  %v3379_v22 = vrot.slane %v6744_v28, %v6634_v23 }
 0x812   : > { %v3371_v42 = vrot.slane %v6746_v6, %v6634_v23 }
 0x814   : > { %v3430_v56 = vsel %vm1448_vm9, %v3371_v42, %v3429_v38  ;;  %v6761_v2 = vpop.xlane.xlu0 %3250 }
 0x815   : > { %v6763_v45 = vpop.xlane.xlu1 %3248  ;;  %v3431_v35 = vsel %vm1450_vm10, %v3375_v5, %v3430_v56  ;;  %v3411_v26 = vrot.slane %v6761_v2, %v6634_v23 }
 0x816   : > { %v3407_v47 = vrot.slane %v6763_v45, %v6634_v23  ;;  %v3432_v41 = vsel %vm1452_vm11, %v3379_v22, %v3431_v35 }
 0x817   : > { %v3451_v10 = vsel %vm3444_vm3, %v3432_v41, -inf }
 0x818   : > { %3452 = vmax.xlane.f32.xlu1 %v3451_v10  ;;  %v3438_v62 = vsel %vm1450_vm10, %v3407_v47, %v3437_v57  ;;  %v7331_v47 = vld [vmem:[#allocation11_spill] sm:$0xff] }
 0x819   : > { %v3439_v40 = vsel %vm1452_vm11, %v3411_v26, %v3438_v62 }
 0x81a   : > { %v3454_v7 = vsel %vm3444_vm3, %v3439_v40, -inf }
 0x81b   : > { %3455 = vmax.xlane.f32.xlu0 %v3454_v7 }
 0x88b   : > { %v3450_v49 = vpop.xlane.xlu0 %3449 }
 0x88c   : > { %v3496_v59 = vrot.slane %v3450_v49, %v7323_v24  ;;  %v3500_v43 = vrot.slane %v3450_v49, %v7325_v30  ;;  %v3504_v3 = vrot.slane %v3450_v49, %v7326_v32  ;;  %v3512_v29 = vrot.slane %v3450_v49, %v7327_v9 }
 0x88d   : > { %v3516_v50 = vrot.slane %v3450_v49, %v7328_v31  ;;  %v3508_v33 = vrot.slane %v3450_v49, %v7329_v0  ;;  %v3520_v22 = vrot.slane %v3450_v49, %v7330_v54  ;;  %v3524_v41 = vrot.slane %v3450_v49, %v7331_v47 }
 0x88e   : > { %v3629_v27 = vsub.f32 %v6612_v17, %v3496_v59  ;;  %v3630_v25 = vsub.f32 %v6618_v20, %v3500_v43  ;;  %v3631_v42 = vsub.f32 %v6622_v63, %v3504_v3  ;;  %v3633_v61 = vsub.f32 %v6616_v21, %v3512_v29 }
 0x88f   : > { %v3634_v56 = vsub.f32 %v6628_v4, %v3516_v50  ;;  %v3632_v17 = vsub.f32 %v6630_v37, %v3508_v33  ;;  %v3635_v57 = vsub.f32 %v6640_v53, %v3520_v22  ;;  %v3636_v21 = vsub.f32 %v6669_v52, %v3524_v41 }
 0x890   : > { %v3669_v5 = vmul.f32 1.442695, %v3629_v27  ;;  %v3671_v38 = vmul.f32 1.442695, %v3630_v25  ;;  %v3677_v35 = vmul.f32 1.442695, %v3633_v61 }
 0x891   : > { %v3673_v20 = vmul.f32 1.442695, %v3631_v42  ;;  %v3679_v63 = vmul.f32 1.442695, %v3634_v56  ;;  %v3675_v26 = vmul.f32 1.442695, %v3632_v17 }
 0x892   : > { %5314 = vpow2.f32 %v3669_v5  ;;  %v3681_v40 = vmul.f32 1.442695, %v3635_v57  ;;  %v3683_v49 = vmul.f32 1.442695, %v3636_v21 }
 0x893   : > { %5316 = vpow2.f32 %v3671_v38 }
 0x894   : > { %5318 = vpow2.f32 %v3677_v35 }
 0x895   : > { %5320 = vpow2.f32 %v3673_v20 }
 0x896   : > { %5322 = vpow2.f32 %v3679_v63 }
 0x897   : > { %v3447_v10 = vpop.xlane.xlu1 %3446  ;;  %5324 = vpow2.f32 %v3675_v26 }
 0x898   : > { %v3464_v62 = vrot.slane %v3447_v10, %v7323_v24  ;;  %v3468_v4 = vrot.slane %v3447_v10, %v7325_v30  ;;  %v3472_v7 = vrot.slane %v3447_v10, %v7326_v32  ;;  %v3484_v53 = vrot.slane %v3447_v10, %v7328_v31 }
 0x899   : > { %5326 = vpow2.f32 %v3681_v40  ;;  %v3476_v3 = vrot.slane %v3447_v10, %v7329_v0  ;;  %v3480_v42 = vrot.slane %v3447_v10, %v7327_v9  ;;  %v3492_v5 = vrot.slane %v3447_v10, %v7331_v47 }
 0x89a   : > { %v3621_v37 = vsub.f32 %v6614_v18, %v3464_v62  ;;  %v3622_v59 = vsub.f32 %v6620_v39, %v3468_v4  ;;  %v3623_v29 = vsub.f32 %v6626_v11, %v3472_v7  ;;  %5328 = vpow2.f32 %v3683_v49 }
 0x89b   : > { %v3488_v18 = vrot.slane %v3447_v10, %v7330_v54  ;;  %v3626_v27 = vsub.f32 %v6652_v14, %v3484_v53  ;;  %v3624_v61 = vsub.f32 %v6650_v12, %v3476_v3  ;;  %v3625_v35 = vsub.f32 %v6624_v36, %v3480_v42 }
 0x89c   : > { %v6798_v52 = vpop.eup %5314  ;;  %v3653_v50 = vmul.f32 1.442695, %v3621_v37  ;;  %v3655_v39 = vmul.f32 1.442695, %v3622_v59  ;;  %v3657_v11 = vmul.f32 1.442695, %v3623_v29  ;;  %v3628_v41 = vsub.f32 %v6704_v48, %v3492_v5 }
 0x89d   : > { %v6800_v43 = vpop.eup %5316  ;;  %3774 = vperm.xlu1 %5217, %v6798_v52   ;;  %v3627_v38 = vsub.f32 %v6660_v58, %v3488_v18  ;;  %v3663_v14 = vmul.f32 1.442695, %v3626_v27  ;;  %v3659_v12 = vmul.f32 1.442695, %v3624_v61  ;;  %v3661_v63 = vmul.f32 1.442695, %v3625_v35 }
 0x89e   : > { %3777 = vperm.xlu0 %5216, %v6800_v43   ;;  %v6808_v25 = vpop.eup %5318  ;;  %5330 = vpow2.f32 %v3653_v50  ;;  %v3667_v21 = vmul.f32 1.442695, %v3628_v41 }
 0x89f   : > { %v6810_v33 = vpop.eup %5320  ;;  %5332 = vpow2.f32 %v3655_v39  ;;  %v3665_v17 = vmul.f32 1.442695, %v3627_v38 }
 0x8a0   : > { %v6818_v22 = vpop.eup %5322  ;;  %5334 = vpow2.f32 %v3657_v11 }
 0x8a1   : > { %3786 = vperm.xlu1 %5217, %v6808_v25   ;;  %v6820_v56 = vpop.eup %5324  ;;  %5336 = vpow2.f32 %v3663_v14 }
 0x8a2   : > { %3780 = vperm.xlu0 %5216, %v6810_v33   ;;  %5338 = vpow2.f32 %v3659_v12 }
 0x8a3   : > { %v6826_v20 = vpop.eup %5326  ;;  %5340 = vpow2.f32 %v3665_v17 }
 0x8a4   : > { %v6830_v57 = vpop.eup %5328  ;;  %5342 = vpow2.f32 %v3661_v63 }
 0x8a5   : > { %3789 = vperm.xlu1 %5217, %v6818_v22   ;;  %v6844_v4 = vpop.xlane.xlu1 %3452  ;;  %5344 = vpow2.f32 %v3667_v21 }
 0x8a6   : > { %3783 = vperm.xlu0 %5216, %v6820_v56   ;;  %v3532_v53 = vrot.slane %v6844_v4, %v7325_v30  ;;  %v3540_v27 = vrot.slane %v6844_v4, %v7329_v0  ;;  %v3536_v17 = vrot.slane %v6844_v4, %v7326_v32 }
 0x8a8   : > { %v6828_v58 = vpop.xlane.xlu0 %3455  ;;  %v6838_v26 = vpop.eup %5330  ;;  %v3640_v38 = vsub.f32 %v6732_v44, %v3540_v27 }
 0x8a9   : > { %3792 = vperm.xlu1 %5217, %v6826_v20   ;;  %v3560_v36 = vrot.slane %v6828_v58, %v7323_v24  ;;  %v3564_v48 = vrot.slane %v6828_v58, %v7325_v30  ;;  %v3568_v10 = vrot.slane %v6828_v58, %v7326_v32  ;;  %v6842_v62 = vpop.eup %5332  ;;  %v3580_v40 = vrot.slane %v6828_v58, %v7328_v31 }
 0x8aa   : > { %3795 = vperm.xlu0 %5216, %v6830_v57   ;;  %v6852_v49 = vpop.eup %5334  ;;  %v3572_v29 = vrot.slane %v6828_v58, %v7329_v0  ;;  %v3691_v63 = vmul.f32 1.442695, %v3640_v38 }
 0x8ab   : > { %v3645_v7 = vsub.f32 %v6642_v46, %v3560_v36  ;;  %v3646_v37 = vsub.f32 %v6667_v16, %v3564_v48  ;;  %v3647_v59 = vsub.f32 %v6683_v60, %v3568_v10  ;;  %v6857_v3 = vpop.eup %5336  ;;  %v3650_v50 = vsub.f32 %v6713_v13, %v3580_v40 }
 0x8ac   : > { %v6864_v16 = vpop.eup %5338  ;;  %v3638_v60 = vsub.f32 %v6685_v34, %v3532_v53  ;;  %v3576_v13 = vrot.slane %v6828_v58, %v7327_v9  ;;  %v3648_v61 = vsub.f32 %v6711_v1, %v3572_v29  ;;  %v3528_v34 = vrot.slane %v6844_v4, %v7323_v24 }
 0x8ad   : > { %3750 = vperm.xlu1 %5217, %v6838_v26   ;;  %v3701_v46 = vmul.f32 1.442695, %v3645_v7  ;;  %v3703_v18 = vmul.f32 1.442695, %v3646_v37  ;;  %v3705_v39 = vmul.f32 1.442695, %v3647_v59  ;;  %v6869_v42 = vpop.eup %5340  ;;  %v3544_v1 = vrot.slane %v6844_v4, %v7327_v9 }
 0x8ae   : > { %3753 = vperm.xlu0 %5216, %v6842_v62   ;;  %v3711_v11 = vmul.f32 1.442695, %v3650_v50  ;;  %v6876_v5 = vpop.eup %5342  ;;  %v3687_v14 = vmul.f32 1.442695, %v3638_v60  ;;  %v3649_v12 = vsub.f32 %v6693_v19, %v3576_v13  ;;  %v3707_v41 = vmul.f32 1.442695, %v3648_v61 }
 0x8af   : > { %5346 = vpow2.f32 %v3701_v46  ;;  %v6881_v35 = vpop.eup %5344  ;;  %v3637_v44 = vsub.f32 %v6658_v51, %v3528_v34  ;;  %v3548_v36 = vrot.slane %v6844_v4, %v7328_v31  ;;  %v3641_v21 = vsub.f32 %v6695_v55, %v3544_v1 }
 0x8b0   : > { %5348 = vpow2.f32 %v3703_v18  ;;  %v3709_v19 = vmul.f32 1.442695, %v3649_v12  ;;  %v3552_v40 = vrot.slane %v6844_v4, %v7330_v54  ;;  %v3639_v51 = vsub.f32 %v6702_v15, %v3536_v17 }
 0x8b1   : > { %3756 = vperm.xlu1 %5217, %v6852_v49   ;;  %5350 = vpow2.f32 %v3705_v39  ;;  %v3685_v7 = vmul.f32 1.442695, %v3637_v44  ;;  %v3642_v37 = vsub.f32 %v6746_v6, %v3548_v36  ;;  %v3693_v55 = vmul.f32 1.442695, %v3641_v21 }
 0x8b2   : > { %3765 = vperm.xlu0 %5216, %v6857_v3   ;;  %5352 = vpow2.f32 %v3711_v11  ;;  %v3584_v53 = vrot.slane %v6828_v58, %v7330_v54  ;;  %v3643_v50 = vsub.f32 %v6730_v8, %v3552_v40  ;;  %v3689_v46 = vmul.f32 1.442695, %v3639_v51 }
 0x8b3   : > { %5354 = vpow2.f32 %v3687_v14  ;;  %v3556_v15 = vrot.slane %v6844_v4, %v7331_v47  ;;  %v3695_v6 = vmul.f32 1.442695, %v3642_v37  ;;  %v3588_v4 = vrot.slane %v6828_v58, %v7331_v47 }
 0x8b4   : > { %5356 = vpow2.f32 %v3707_v41  ;;  %v3651_v18 = vsub.f32 %v6763_v45, %v3584_v53  ;;  %v3697_v39 = vmul.f32 1.442695, %v3643_v50 }
 0x8b5   : > { %3759 = vperm.xlu1 %5217, %v6864_v16   ;;  %5358 = vpow2.f32 %v3691_v63  ;;  %v3644_v8 = vsub.f32 %v6744_v28, %v3556_v15  ;;  %v3652_v34 = vsub.f32 %v6761_v2, %v3588_v4 }
 0x8b6   : > { %3768 = vperm.xlu0 %5216, %v6869_v42   ;;  %5360 = vpow2.f32 %v3709_v19  ;;  %v3713_v13 = vmul.f32 1.442695, %v3651_v18 }
 0x8b7   : > { %5362 = vpow2.f32 %v3685_v7  ;;  %v3699_v11 = vmul.f32 1.442695, %v3644_v8  ;;  %v3715_v58 = vmul.f32 1.442695, %v3652_v34 }
 0x8b8   : > { %5364 = vpow2.f32 %v3693_v55 }
 0x8b9   : > { %3762 = vperm.xlu1 %5217, %v6876_v5   ;;  %v6894_v48 = vpop.eup %5346  ;;  %5366 = vpow2.f32 %v3689_v46 }
 0x8ba   : > { %3771 = vperm.xlu0 %5216, %v6881_v35   ;;  %v6896_v10 = vpop.eup %5348  ;;  %5368 = vpow2.f32 %v3695_v6 }
 0x8bb   : > { %v6906_v59 = vpop.eup %5350  ;;  %5370 = vpow2.f32 %v3697_v39 }
 0x8bc   : > { %v6908_v29 = vpop.eup %5352  ;;  %5372 = vpow2.f32 %v3713_v13 }
 0x8bd   : > { %3825 = vperm.xlu1 %5217, %v6896_v10   ;;  %v6916_v27 = vpop.eup %5354  ;;  %5374 = vpow2.f32 %v3699_v11 }
 0x8be   : > { %3822 = vperm.xlu0 %5216, %v6894_v48   ;;  %v6918_v60 = vpop.eup %5356  ;;  %5376 = vpow2.f32 %v3715_v58 }
 0x8bf   : > { %v6925_v61 = vpop.eup %5358 }
 0x8c0   : > { %v6927_v45 = vpop.eup %5360 }
 0x8c1   : > { %3828 = vperm.xlu1 %5217, %v6906_v59   ;;  %v6932_v38 = vpop.eup %5362 }
 0x8c2   : > { %3837 = vperm.xlu0 %5216, %v6908_v29   ;;  %v6934_v28 = vpop.eup %5364 }
 0x8c3   : > { %v6938_v14 = vpop.eup %5366 }
 0x8c4   : > { %v6940_v1 = vpop.eup %5368 }
 0x8c5   : > { %3831 = vperm.xlu1 %5217, %v6918_v60   ;;  %v6944_v2 = vpop.eup %5370 }
 0x8c6   : > { %3801 = vperm.xlu0 %5216, %v6916_v27   ;;  %v6946_v12 = vpop.eup %5372 }
 0x8c7   : > { %v6950_v41 = vpop.eup %5374 }
 0x8c8   : > { %v6953_v17 = vpop.eup %5376 }
 0x8c9   : > { %3834 = vperm.xlu1 %5217, %v6927_v45  }
 0x8ca   : > { %3807 = vperm.xlu0 %5216, %v6925_v61  }
 0x8cd   : > { %3798 = vperm.xlu1 %5217, %v6932_v38  }
 0x8ce   : > { %3810 = vperm.xlu0 %5216, %v6934_v28  }
 0x8d1   : > { %3804 = vperm.xlu1 %5217, %v6938_v14  }
 0x8d2   : > { %3813 = vperm.xlu0 %5216, %v6940_v1  }
 0x8d5   : > { %3816 = vperm.xlu1 %5217, %v6944_v2  }
 0x8d6   : > { %3840 = vperm.xlu0 %5216, %v6946_v12  }
 0x8d9   : > { %3819 = vperm.xlu1 %5217, %v6950_v41  }
 0x8dd   : > { %3843 = vperm.xlu1 %5217, %v6953_v17  }
 0x91c   : > { %v3775_v44 = vpop.permute.xlu1 %3774 }
 0x91d   : > { %v3778_v63 = vpop.permute.xlu0 %3777  ;;  %v3880_v19 = vrot.slane %v3775_v44, %v6634_v23 }
 0x91e   : > { %v3884_v40 = vrot.slane %v3778_v63, %v6634_v23 }
 0x920   : > { %v3787_v36 = vpop.permute.xlu1 %3786  ;;  %v3980_v55 = vsel %vm1440_vm5, %v3884_v40, %v3880_v19 }
 0x921   : > { %v3781_v21 = vpop.permute.xlu0 %3780  ;;  %v3896_v50 = vrot.slane %v3787_v36, %v6634_v23 }
 0x922   : > { %v3888_v51 = vrot.slane %v3781_v21, %v6634_v23 }
 0x924   : > { %v3790_v7 = vpop.permute.xlu1 %3789  ;;  %v3981_v46 = vsel %vm1442_vm6, %v3888_v51, %v3980_v55 }
 0x925   : > { %v3784_v37 = vpop.permute.xlu0 %3783  ;;  %v3900_v15 = vrot.slane %v3790_v7, %v6634_v23 }
 0x926   : > { %v3892_v53 = vrot.slane %v3784_v37, %v6634_v23 }
 0x928   : > { %v3982_v6 = vsel %vm1444_vm7, %v3892_v53, %v3981_v46  ;;  %v3793_v18 = vpop.permute.xlu1 %3792 }
 0x929   : > { %v3983_v39 = vsel %vm1446_vm8, %v3896_v50, %v3982_v6  ;;  %v3904_v8 = vrot.slane %v3793_v18, %v6634_v23  ;;  %v3796_v4 = vpop.permute.xlu0 %3795 }
 0x92a   : > { %v3908_v13 = vrot.slane %v3796_v4, %v6634_v23  ;;  %v3984_v11 = vsel %vm1448_vm9, %v3900_v15, %v3983_v39 }
 0x92b   : > { %v3985_v34 = vsel %vm1450_vm10, %v3904_v8, %v3984_v11 }
 0x92c   : > { %v3751_v58 = vpop.permute.xlu1 %3750  ;;  %v3986_v44 = vsel %vm1452_vm11, %v3908_v13, %v3985_v34 }
 0x92d   : > { %v3754_v63 = vpop.permute.xlu0 %3753  ;;  %v4008_v36 = vsel %vm3444_vm3, %v3986_v44, 0.0  ;;  %v3848_v40 = vrot.slane %v3751_v58, %v6634_v23 }
 0x92e   : > { %4009 = vadd.xlane.f32.xlu1 %v4008_v36  ;;  %v3852_v51 = vrot.slane %v3754_v63, %v6634_v23 }
 0x930   : > { %v3757_v21 = vpop.permute.xlu1 %3756  ;;  %v3973_v50 = vsel %vm1440_vm5, %v3852_v51, %v3848_v40 }
 0x931   : > { %v3766_v19 = vpop.permute.xlu0 %3765  ;;  %v3856_v37 = vrot.slane %v3757_v21, %v6634_v23 }
 0x932   : > { %v3868_v39 = vrot.slane %v3766_v19, %v6634_v23 }
 0x933   : > { %v3974_v15 = vsel %vm1442_vm6, %v3856_v37, %v3973_v50 }
 0x934   : > { %v3760_v7 = vpop.permute.xlu1 %3759 }
 0x935   : > { %v3769_v55 = vpop.permute.xlu0 %3768  ;;  %v3860_v53 = vrot.slane %v3760_v7, %v6634_v23 }
 0x936   : > { %v3872_v4 = vrot.slane %v3769_v55, %v6634_v23 }
 0x937   : > { %v3975_v8 = vsel %vm1444_vm7, %v3860_v53, %v3974_v15 }
 0x938   : > { %v3763_v46 = vpop.permute.xlu1 %3762 }
 0x939   : > { %v3864_v6 = vrot.slane %v3763_v46, %v6634_v23  ;;  %v3772_v18 = vpop.permute.xlu0 %3771 }
 0x93a   : > { %v3876_v11 = vrot.slane %v3772_v18, %v6634_v23 }
 0x93b   : > { %v3976_v13 = vsel %vm1446_vm8, %v3864_v6, %v3975_v8 }
 0x93c   : > { %v3977_v34 = vsel %vm1448_vm9, %v3868_v39, %v3976_v13  ;;  %v3826_v36 = vpop.permute.xlu1 %3825 }
 0x93d   : > { %v3978_v58 = vsel %vm1450_vm10, %v3872_v4, %v3977_v34  ;;  %v3823_v44 = vpop.permute.xlu0 %3822  ;;  %v3948_v13 = vrot.slane %v3826_v36, %v6634_v23 }
 0x93e   : > { %v3979_v63 = vsel %vm1452_vm11, %v3876_v11, %v3978_v58  ;;  %v3944_v11 = vrot.slane %v3823_v44, %v6634_v23 }
 0x93f   : > { %v4005_v21 = vsel %vm3444_vm3, %v3979_v63, 0.0 }
 0x940   : > { %4006 = vadd.xlane.f32.xlu0 %v4005_v21  ;;  %v3829_v19 = vpop.permute.xlu1 %3828  ;;  %v3994_v44 = vsel %vm1440_vm5, %v3948_v13, %v3944_v11 }
 0x941   : > { %v3838_v40 = vpop.permute.xlu0 %3837  ;;  %v3952_v63 = vrot.slane %v3829_v19, %v6634_v23 }
 0x943   : > { %v3995_v19 = vsel %vm1442_vm6, %v3952_v63, %v3994_v44 }
 0x944   : > { %v3832_v51 = vpop.permute.xlu1 %3831 }
 0x945   : > { %v3802_v7 = vpop.permute.xlu0 %3801 }
 0x946   : > { %v3916_v15 = vrot.slane %v3802_v7, %v6634_v23 }
 0x948   : > { %v3835_v37 = vpop.permute.xlu1 %3834 }
 0x949   : > { %v3808_v55 = vpop.permute.xlu0 %3807 }
 0x94a   : > { %v3924_v8 = vrot.slane %v3808_v55, %v6634_v23 }
 0x94c   : > { %v3799_v53 = vpop.permute.xlu1 %3798 }
 0x94d   : > { %v3811_v50 = vpop.permute.xlu0 %3810  ;;  %v3912_v46 = vrot.slane %v3799_v53, %v6634_v23  ;;  %v3956_v53 = vrot.slane %v3832_v51, %v6634_v23 }
 0x94e   : > { %v3928_v34 = vrot.slane %v3811_v50, %v6634_v23 }
 0x94f   : > { %v3987_v4 = vsel %vm1440_vm5, %v3916_v15, %v3912_v46  ;;  %v3960_v46 = vrot.slane %v3835_v37, %v6634_v23 }
 0x950   : > { %v3805_v6 = vpop.permute.xlu1 %3804 }
 0x951   : > { %v3920_v18 = vrot.slane %v3805_v6, %v6634_v23  ;;  %v3814_v39 = vpop.permute.xlu0 %3813 }
 0x952   : > { %v3932_v55 = vrot.slane %v3814_v39, %v6634_v23 }
 0x953   : > { %v3988_v58 = vsel %vm1442_vm6, %v3920_v18, %v3987_v4 }
 0x954   : > { %v3989_v21 = vsel %vm1444_vm7, %v3924_v8, %v3988_v58  ;;  %v3817_v7 = vpop.permute.xlu1 %3816  ;;  %v3996_v8 = vsel %vm1444_vm7, %v3956_v53, %v3995_v19 }
 0x955   : > { %v3990_v6 = vsel %vm1446_vm8, %v3928_v34, %v3989_v21  ;;  %v3936_v36 = vrot.slane %v3817_v7, %v6634_v23  ;;  %v3841_v15 = vpop.permute.xlu0 %3840  ;;  %v3997_v4 = vsel %vm1446_vm8, %v3960_v46, %v3996_v8  ;;  %v3964_v34 = vrot.slane %v3838_v40, %v6634_v23 }
 0x956   : > { %v3991_v50 = vsel %vm1448_vm9, %v3932_v55, %v3990_v6  ;;  %v3968_v39 = vrot.slane %v3841_v15, %v6634_v23 }
 0x957   : > { %v3992_v37 = vsel %vm1450_vm10, %v3936_v36, %v3991_v50  ;;  %v3998_v21 = vsel %vm1448_vm9, %v3964_v34, %v3997_v4 }
 0x958   : > { %v3820_v18 = vpop.permute.xlu1 %3819  ;;  %v3999_v7 = vsel %vm1450_vm10, %v3968_v39, %v3998_v21 }
 0x959   : > { %v3940_v51 = vrot.slane %v3820_v18, %v6634_v23 }
 0x95b   : > { %v3993_v13 = vsel %vm1452_vm11, %v3940_v51, %v3992_v37 }
 0x95c   : > { %v3844_v11 = vpop.permute.xlu1 %3843  ;;  %v4011_v58 = vsel %vm3444_vm3, %v3993_v13, 0.0 }
 0x95d   : > { %v3972_v63 = vrot.slane %v3844_v11, %v6634_v23  ;;  %4012 = vadd.xlane.f32.xlu0 %v4011_v58 }
 0x95f   : > { %v4000_v53 = vsel %vm1452_vm11, %v3972_v63, %v3999_v7 }
 0x960   : > { %v4014_v6 = vsel %vm3444_vm3, %v4000_v53, 0.0 }
 0x961   : > { %4015 = vadd.xlane.f32.xlu0 %v4014_v6 }
 0x9bb   : > { %v4010_v55 = vpop.xlane.xlu1 %4009 }
 0x9bc   : > { %5378 = vrcp.f32 %v4010_v55 }
 0x9c6   : > { %v5379_v40 = vpop.eup %5378 }
 0x9c7   : > { %v4060_v46 = vrot.slane %v5379_v40, %v7323_v24  ;;  %v4064_v36 = vrot.slane %v5379_v40, %v7325_v30  ;;  %v4076_v50 = vrot.slane %v5379_v40, %v7327_v9  ;;  %v4068_v15 = vrot.slane %v5379_v40, %v7326_v32 }
 0x9c8   : > { %v4080_v51 = vrot.slane %v5379_v40, %v7328_v31  ;;  %v4072_v4 = vrot.slane %v5379_v40, %v7329_v0  ;;  %v4084_v39 = vrot.slane %v5379_v40, %v7330_v54  ;;  %v4088_v37 = vrot.slane %v5379_v40, %v7331_v47 }
 0x9c9   : > { %v4193_v44 = vmul.f32 %v6798_v52, %v4060_v46  ;;  %v4194_v23 = vmul.f32 %v6800_v43, %v4064_v36  ;;  %v4197_v18 = vmul.f32 %v6808_v25, %v4076_v50  ;;  %v4195_v8 = vmul.f32 %v6810_v33, %v4068_v15 }
 0x9ca   : > { %v4198_v52 = vmul.f32 %v6818_v22, %v4080_v51  ;;  %v4196_v43 = vmul.f32 %v6820_v56, %v4072_v4  ;;  %v4199_v25 = vmul.f32 %v6826_v20, %v4084_v39  ;;  %v4200_v33 = vmul.f32 %v6830_v57, %v4088_v37  ;;  %v5418_v39 = vld [vmem:[%s5619_s29 + $0x40] sm:$0xff]  ;;  %v5419_v37 = vld [vmem:[%s5619_s29 + $0x48] sm:$0xff] }
 0x9cb   : > { %4259 = vperm.xlu1 %5217, %v4193_v44   ;;  %4264 = vperm.xlu0 %5216, %v4194_v23  }
 0x9cd   : > { %v4007_v19 = vpop.xlane.xlu0 %4006 }
 0x9ce   : > { %5380 = vrcp.f32 %v4007_v19 }
 0x9cf   : > { %4279 = vperm.xlu1 %5217, %v4197_v18   ;;  %4269 = vperm.xlu0 %5216, %v4195_v8  }
 0x9d3   : > { %4284 = vperm.xlu1 %5217, %v4198_v52   ;;  %4274 = vperm.xlu0 %5216, %v4196_v43  }
 0x9d7   : > { %4289 = vperm.xlu1 %5217, %v4199_v25   ;;  %4294 = vperm.xlu0 %5216, %v4200_v33  }
 0x9d8   : > { %v5381_v34 = vpop.eup %5380 }
 0x9d9   : > { %v4032_v13 = vrot.slane %v5381_v34, %v7325_v30  ;;  %v4028_v11 = vrot.slane %v5381_v34, %v7323_v24  ;;  %v4048_v58 = vrot.slane %v5381_v34, %v7328_v31  ;;  %v4036_v63 = vrot.slane %v5381_v34, %v7326_v32 }
 0x9da   : > { %v4052_v21 = vrot.slane %v5381_v34, %v7330_v54  ;;  %v4040_v7 = vrot.slane %v5381_v34, %v7329_v0  ;;  %v4056_v53 = vrot.slane %v5381_v34, %v7331_v47  ;;  %v4044_v6 = vrot.slane %v5381_v34, %v7327_v9 }
 0x9db   : > { %v4186_v22 = vmul.f32 %v6842_v62, %v4032_v13  ;;  %v4185_v56 = vmul.f32 %v6838_v26, %v4028_v11  ;;  %v4190_v20 = vmul.f32 %v6857_v3, %v4048_v58  ;;  %v4187_v57 = vmul.f32 %v6852_v49, %v4036_v63  ;;  %v5420_v11 = vld [vmem:[%s5619_s29 + $0x60] sm:$0xff] }
 0x9dc   : > { %v4191_v62 = vmul.f32 %v6869_v42, %v4052_v21  ;;  %v4188_v26 = vmul.f32 %v6864_v16, %v4040_v7  ;;  %v4192_v3 = vmul.f32 %v6881_v35, %v4056_v53  ;;  %v4189_v49 = vmul.f32 %v6876_v5, %v4044_v6 }
 0x9dd   : > { %4224 = vperm.xlu0 %5216, %v4186_v22   ;;  %4219 = vperm.xlu1 %5217, %v4185_v56   ;;  %v5421_v22 = vld [vmem:[%s5619_s29 + $0x50] sm:$0xff] }
 0x9e1   : > { %4244 = vperm.xlu0 %5216, %v4190_v20   ;;  %4229 = vperm.xlu1 %5217, %v4187_v57  }
 0x9e5   : > { %4249 = vperm.xlu0 %5216, %v4191_v62   ;;  %4234 = vperm.xlu1 %5217, %v4188_v26   ;;  %v5422_v26 = vld [vmem:[%s5619_s29 + $0x58] sm:$0xff] }
 0x9e9   : > { %4254 = vperm.xlu0 %5216, %v4192_v3   ;;  %4239 = vperm.xlu1 %5217, %v4189_v49  }
 0x9ea   : > { %v4013_v55 = vpop.xlane.xlu0 %4012 }
 0x9ee   : > { %v4016_v40 = vpop.xlane.xlu0 %4015 }
 0x9ef   : > { %5382 = vrcp.f32 %v4016_v40 }
 0x9f0   : > { %5384 = vrcp.f32 %v4013_v55  ;;  %v5423_v55 = vld [vmem:[%s5619_s29 + $0x68] sm:$0xff] }
 0x9f9   : > { %v5383_v46 = vpop.eup %5382 }
 0x9fa   : > { %v4128_v42 = vrot.slane %v5383_v46, %v7325_v30  ;;  %v4124_v16 = vrot.slane %v5383_v46, %v7323_v24  ;;  %v4132_v23 = vrot.slane %v5383_v46, %v7326_v32  ;;  %v4144_v35 = vrot.slane %v5383_v46, %v7328_v31  ;;  %v5385_v5 = vpop.eup %5384 }
 0x9fb   : > { %v4136_v19 = vrot.slane %v5383_v46, %v7329_v0  ;;  %v4096_v18 = vrot.slane %v5385_v5, %v7325_v30  ;;  %v4140_v8 = vrot.slane %v5383_v46, %v7327_v9  ;;  %v4104_v51 = vrot.slane %v5385_v5, %v7329_v0 }
 0x9fc   : > { %v4210_v36 = vmul.f32 %v6896_v10, %v4128_v42  ;;  %v4209_v44 = vmul.f32 %v6894_v48, %v4124_v16  ;;  %v4211_v50 = vmul.f32 %v6906_v59, %v4132_v23  ;;  %v4214_v15 = vmul.f32 %v6908_v29, %v4144_v35 }
 0x9fd   : > { %v4212_v10 = vmul.f32 %v6918_v60, %v4136_v19  ;;  %v4202_v48 = vmul.f32 %v6916_v27, %v4096_v18  ;;  %v4213_v59 = vmul.f32 %v6927_v45, %v4140_v8  ;;  %v4204_v29 = vmul.f32 %v6925_v61, %v4104_v51  ;;  %v5424_v19 = vld [vmem:[%s5619_s29 + $0x70] sm:$0xff] }
 0x9fe   : > { %4344 = vperm.xlu1 %5217, %v4210_v36   ;;  %4339 = vperm.xlu0 %5216, %v4209_v44   ;;  %v4092_v4 = vrot.slane %v5385_v5, %v7323_v24  ;;  %v4108_v30 = vrot.slane %v5385_v5, %v7327_v9  ;;  %v4100_v52 = vrot.slane %v5385_v5, %v7326_v32 }
 0x9ff   : > { %v4112_v0 = vrot.slane %v5385_v5, %v7328_v31  ;;  %v4116_v24 = vrot.slane %v5385_v5, %v7330_v54  ;;  %v4148_v9 = vrot.slane %v5383_v46, %v7330_v54  ;;  %v4120_v31 = vrot.slane %v5385_v5, %v7331_v47 }
 0xa00   : > { %v4201_v60 = vmul.f32 %v6932_v38, %v4092_v4  ;;  %v4205_v27 = vmul.f32 %v6934_v28, %v4108_v30  ;;  %v4203_v45 = vmul.f32 %v6938_v14, %v4100_v52  ;;  %v4152_v14 = vrot.slane %v5383_v46, %v7331_v47  ;;  %v5425_v4 = vld [vmem:[%s5619_s29 + $0x78] sm:$0xff] }
 0xa01   : > { %v4206_v61 = vmul.f32 %v6940_v1, %v4112_v0  ;;  %v4207_v38 = vmul.f32 %v6944_v2, %v4116_v24  ;;  %v4215_v32 = vmul.f32 %v6946_v12, %v4148_v9  ;;  %v4208_v28 = vmul.f32 %v6950_v41, %v4120_v31  ;;  %v5427_v0 = vld [vmem:[%s5619_s29 + $0x8] sm:$0xff] }
 0xa02   : > { %4349 = vperm.xlu1 %5217, %v4211_v50   ;;  %4364 = vperm.xlu0 %5216, %v4214_v15   ;;  %v4216_v1 = vmul.f32 %v6953_v17, %v4152_v14 }
 0xa06   : > { %4354 = vperm.xlu1 %5217, %v4212_v10   ;;  %4304 = vperm.xlu0 %5216, %v4202_v48  }
 0xa0a   : > { %4359 = vperm.xlu1 %5217, %v4213_v59   ;;  %4314 = vperm.xlu0 %5216, %v4204_v29  }
 0xa0e   : > { %4299 = vperm.xlu1 %5217, %v4201_v60   ;;  %4319 = vperm.xlu0 %5216, %v4205_v27   ;;  %v5426_v60 = vld [vmem:[%s5619_s29] sm:$0xff] }
 0xa12   : > { %4309 = vperm.xlu1 %5217, %v4203_v45   ;;  %4324 = vperm.xlu0 %5216, %v4206_v61  }
 0xa16   : > { %4329 = vperm.xlu1 %5217, %v4207_v38   ;;  %4369 = vperm.xlu0 %5216, %v4215_v32  }
 0xa1a   : > { %4334 = vperm.xlu1 %5217, %v4208_v28  }
 0xa1e   : > { %4374 = vperm.xlu1 %5217, %v4216_v1  }
 0xa4a   : > { %v4260_v54 = vpop.permute.xlu1 %4259  ;;  %v4265_v43 = vpop.permute.xlu0 %4264 }
 0xa4b   : > { %v4385_v2 = vmul.f32 %v5418_v39, %v4260_v54  ;;  %v4386_v12 = vmul.f32 %v5419_v37, %v4265_v43 }
 0xa4d   : > { %v4465_v25 = vsel %vm699_vm4, %v4385_v2, 0.0  ;;  %v4472_v33 = vsel %vm699_vm4, %v4386_v12, 0.0 }
 0xa4e   : > { %v4466_v41 = vrot.slane %v4465_v25, 4  ;;  %v4473_v34 = vrot.slane %v4472_v33, 4  ;;  %v4280_v47 = vpop.permute.xlu1 %4279  ;;  %v4270_v13 = vpop.permute.xlu0 %4269 }
 0xa4f   : > { %v4389_v17 = vmul.f32 %v5420_v11, %v4280_v47  ;;  %v4387_v56 = vmul.f32 %v5421_v22, %v4270_v13 }
 0xa50   : > { %v4467_v58 = vadd.f32 %v4466_v41, %v4465_v25  ;;  %v4474_v63 = vadd.f32 %v4473_v34, %v4472_v33  ;;  %v5428_v25 = vld [vmem:[%s5619_s29 + $0x10] sm:$0xff]  ;;  %v5429_v41 = vld [vmem:[%s5619_s29 + $0x28] sm:$0xff] }
 0xa51   : > { %v4479_v20 = vsel %vm699_vm4, %v4387_v56, 0.0  ;;  %v4493_v57 = vsel %vm699_vm4, %v4389_v17, 0.0 }
 0xa52   : > { %v4285_v21 = vpop.permute.xlu1 %4284  ;;  %v4275_v7 = vpop.permute.xlu0 %4274  ;;  %v4468_v62 = vrot.slane %v4467_v58, 2  ;;  %v4480_v6 = vrot.slane %v4479_v20, 4  ;;  %v4475_v3 = vrot.slane %v4474_v63, 2  ;;  %v4494_v49 = vrot.slane %v4493_v57, 4 }
 0xa53   : > { %v4388_v53 = vmul.f32 %v5422_v26, %v4275_v7  ;;  %v4390_v40 = vmul.f32 %v5423_v55, %v4285_v21 }
 0xa54   : > { %v4469_v46 = vadd.f32 %v4468_v62, %v4467_v58  ;;  %v4481_v16 = vadd.f32 %v4480_v6, %v4479_v20  ;;  %v4476_v23 = vadd.f32 %v4475_v3, %v4474_v63  ;;  %v4495_v35 = vadd.f32 %v4494_v49, %v4493_v57 }
 0xa55   : > { %v4486_v42 = vsel %vm699_vm4, %v4388_v53, 0.0  ;;  %v4500_v5 = vsel %vm699_vm4, %v4390_v40, 0.0  ;;  %v5430_v53 = vld [vmem:[%s5619_s29 + $0x18] sm:$0xff] }
 0xa56   : > { %v4290_v36 = vpop.permute.xlu1 %4289  ;;  %v4295_v44 = vpop.permute.xlu0 %4294  ;;  %v4487_v50 = vrot.slane %v4486_v42, 4  ;;  %v4470_v15 = vrot.slane %v4469_v46, 1  ;;  %v4482_v10 = vrot.slane %v4481_v16, 2  ;;  %v4501_v48 = vrot.slane %v4500_v5, 4 }
 0xa57   : > { %v4391_v18 = vmul.f32 %v5424_v19, %v4290_v36  ;;  %v4477_v59 = vrot.slane %v4476_v23, 1  ;;  %v4496_v29 = vrot.slane %v4495_v35, 2  ;;  %v4392_v30 = vmul.f32 %v5425_v4, %v4295_v44  ;;  %v5431_v36 = vld [vmem:[%s5619_s29 + $0x30] sm:$0xff] }
 0xa58   : > { %v4488_v52 = vadd.f32 %v4487_v50, %v4486_v42  ;;  %v4471_v61 = vadd.f32 %v4470_v15, %v4469_v46  ;;  %v4483_v38 = vadd.f32 %v4482_v10, %v4481_v16  ;;  %v4502_v32 = vadd.f32 %v4501_v48, %v4500_v5  ;;  %v5432_v48 = vld [vmem:[%s5619_s29 + $0x20] sm:$0xff] }
 0xa59   : > { %v4507_v24 = vsel %vm699_vm4, %v4391_v18, 0.0  ;;  %v4478_v54 = vadd.f32 %v4477_v59, %v4476_v23  ;;  %v7103_v43 = vadd.f32 %v4496_v29, %v4495_v35  ;;  %v4514_v39 = vsel %vm699_vm4, %v4392_v30, 0.0 }
 0xa5a   : > { %v4489_v37 = vrot.slane %v4488_v52, 2  ;;  %v4508_v12 = vrot.slane %v4507_v24, 4  ;;  %v4484_v11 = vrot.slane %v4483_v38, 1  ;;  %v4503_v17 = vrot.slane %v4502_v32, 2 }
 0xa5b   : > { %v4672_v63 = vsel %vm1440_vm5, %v4478_v54, %v4471_v61  ;;  %v4498_v20 = vrot.slane %v7103_v43, 1  ;;  %v4515_v57 = vrot.slane %v4514_v39, 4 }
 0xa5c   : > { %v4220_v8 = vpop.permute.xlu1 %4219  ;;  %v4225_v51 = vpop.permute.xlu0 %4224  ;;  %v4490_v7 = vadd.f32 %v4489_v37, %v4488_v52  ;;  %v4509_v62 = vadd.f32 %v4508_v12, %v4507_v24  ;;  %v4485_v46 = vadd.f32 %v4484_v11, %v4483_v38  ;;  %v4504_v42 = vadd.f32 %v4503_v17, %v4502_v32 }
 0xa5d   : > { %v4377_v27 = vmul.f32 %v5426_v60, %v4220_v8  ;;  %v4378_v45 = vmul.f32 %v5427_v0, %v4225_v51  ;;  %v4516_v5 = vadd.f32 %v4515_v57, %v4514_v39  ;;  %v5433_v51 = vld [vmem:[%s5619_s29 + $0x38] sm:$0xff] }
 0xa5e   : > { %v4491_v18 = vrot.slane %v4490_v7, 1  ;;  %v4510_v29 = vrot.slane %v4509_v62, 2  ;;  %v4673_v61 = vsel %vm1442_vm6, %v4485_v46, %v4672_v63 }
 0xa5f   : > { %v4409_v9 = vsel %vm699_vm4, %v4377_v27, 0.0  ;;  %v4416_v28 = vsel %vm699_vm4, %v4378_v45, 0.0  ;;  %v4517_v24 = vrot.slane %v4516_v5, 2 }
 0xa60   : > { %v4410_v31 = vrot.slane %v4409_v9, 4  ;;  %v4230_v14 = vpop.permute.xlu1 %4229  ;;  %v4245_v1 = vpop.permute.xlu0 %4244  ;;  %v4417_v2 = vrot.slane %v4416_v28, 4  ;;  %v4492_v32 = vadd.f32 %v4491_v18, %v4490_v7 }
 0xa61   : > { %v4379_v33 = vmul.f32 %v5428_v25, %v4230_v14  ;;  %v4382_v34 = vmul.f32 %v5429_v41, %v4245_v1  ;;  %v4511_v1 = vadd.f32 %v4510_v29, %v4509_v62  ;;  %v4505_v41 = vrot.slane %v4504_v42, 1 }
 0xa62   : > { %v4411_v47 = vadd.f32 %v4410_v31, %v4409_v9  ;;  %v4418_v13 = vadd.f32 %v4417_v2, %v4416_v28  ;;  %v4674_v11 = vsel %vm1444_vm7, %v4492_v32, %v4673_v61 }
 0xa63   : > { %v4423_v22 = vsel %vm699_vm4, %v4379_v33, 0.0  ;;  %v4444_v26 = vsel %vm699_vm4, %v4382_v34, 0.0  ;;  %v4518_v34 = vadd.f32 %v4517_v24, %v4516_v5  ;;  %v4512_v63 = vrot.slane %v4511_v1, 1 }
 0xa64   : > { %v4235_v56 = vpop.permute.xlu1 %4234  ;;  %v4250_v58 = vpop.permute.xlu0 %4249  ;;  %v4424_v21 = vrot.slane %v4423_v22, 4  ;;  %v4412_v3 = vrot.slane %v4411_v47, 2  ;;  %v4419_v49 = vrot.slane %v4418_v13, 2  ;;  %v4445_v40 = vrot.slane %v4444_v26, 4 }
 0xa65   : > { %v4380_v6 = vmul.f32 %v5430_v53, %v4235_v56  ;;  %v4383_v44 = vmul.f32 %v5431_v36, %v4250_v58  ;;  %v4499_v58 = vadd.f32 %v4498_v20, %v7103_v43 }
 0xa66   : > { %v4425_v55 = vadd.f32 %v4424_v21, %v4423_v22  ;;  %v4446_v15 = vadd.f32 %v4445_v40, %v4444_v26  ;;  %v4413_v4 = vadd.f32 %v4412_v3, %v4411_v47  ;;  %v4420_v30 = vadd.f32 %v4419_v49, %v4418_v13 }
 0xa67   : > { %v4430_v16 = vsel %vm699_vm4, %v4380_v6, 0.0  ;;  %v4451_v10 = vsel %vm699_vm4, %v4383_v44, 0.0  ;;  %v4675_v53 = vsel %vm1446_vm8, %v4499_v58, %v4674_v11  ;;  %v4506_v49 = vadd.f32 %v4505_v41, %v4504_v42 }
 0xa68   : > { %v4240_v23 = vpop.permute.xlu1 %4239  ;;  %v4255_v35 = vpop.permute.xlu0 %4254  ;;  %v4426_v50 = vrot.slane %v4425_v55, 2  ;;  %v4431_v19 = vrot.slane %v4430_v16, 4  ;;  %v4452_v52 = vrot.slane %v4451_v10, 4  ;;  %v4447_v9 = vrot.slane %v4446_v15, 2 }
 0xa69   : > { %v4381_v8 = vmul.f32 %v5432_v48, %v4240_v23  ;;  %v4384_v59 = vmul.f32 %v5433_v51, %v4255_v35  ;;  %v4414_v54 = vrot.slane %v4413_v4, 1  ;;  %v4421_v39 = vrot.slane %v4420_v30, 1 }
 0xa6a   : > { %v4432_v60 = vadd.f32 %v4431_v19, %v4430_v16  ;;  %v4427_v27 = vadd.f32 %v4426_v50, %v4425_v55  ;;  %v4453_v31 = vadd.f32 %v4452_v52, %v4451_v10  ;;  %v4448_v47 = vadd.f32 %v4447_v9, %v4446_v15 }
 0xa6b   : > { %v4437_v0 = vsel %vm699_vm4, %v4381_v8, 0.0  ;;  %v4458_v45 = vsel %vm699_vm4, %v4384_v59, 0.0  ;;  %v4415_v57 = vadd.f32 %v4414_v54, %v4413_v4  ;;  %v4422_v21 = vadd.f32 %v4421_v39, %v4420_v30  ;;  %v5434_v4 = vld [vmem:[%s5619_s29 + $0xc8] sm:$0xff] }
 0xa6c   : > { %v4433_v38 = vrot.slane %v4432_v60, 2  ;;  %v4438_v28 = vrot.slane %v4437_v0, 4  ;;  %v4459_v14 = vrot.slane %v4458_v45, 4  ;;  %v4428_v37 = vrot.slane %v4427_v27, 1 }
 0xa6d   : > { %v4454_v12 = vrot.slane %v4453_v31, 2  ;;  %v4449_v6 = vrot.slane %v4448_v47, 1  ;;  %v4519_v55 = vrot.slane %v4518_v34, 1  ;;  %v4513_v16 = vadd.f32 %v4512_v63, %v4511_v1  ;;  %v5437_v1 = vld [vmem:[%s5619_s29 + $0xe8] sm:$0xff] }
 0xa6e   : > { %v4434_v2 = vadd.f32 %v4433_v38, %v4432_v60  ;;  %v4439_v25 = vadd.f32 %v4438_v28, %v4437_v0  ;;  %v4460_v33 = vadd.f32 %v4459_v14, %v4458_v45  ;;  %v4429_v7 = vadd.f32 %v4428_v37, %v4427_v27  ;;  %v5435_v60 = vld [vmem:[%s5619_s29 + $0xc0] sm:$0xff]  ;;  %v5436_v38 = vld [vmem:[%s5619_s29 + $0xd0] sm:$0xff]  ;;  %v5438_v37 = vld [vmem:[%s5619_s29 + $0xd8] sm:$0xff] }
 0xa6f   : > { %v4455_v17 = vadd.f32 %v4454_v12, %v4453_v31  ;;  %v4665_v36 = vsel %vm1440_vm5, %v4422_v21, %v4415_v57  ;;  %v4676_v43 = vsel %vm1448_vm9, %v4506_v49, %v4675_v53  ;;  %v4450_v35 = vadd.f32 %v4449_v6, %v4448_v47  ;;  %v5440_v57 = vld [vmem:[%s5619_s29 + $0xe0] sm:$0xff] }
 0xa70   : > { %v4435_v13 = vrot.slane %v4434_v2, 1  ;;  %v4440_v22 = vrot.slane %v4439_v25, 2  ;;  %v4461_v56 = vrot.slane %v4460_v33, 2  ;;  %v4666_v20 = vsel %vm1442_vm6, %v4429_v7, %v4665_v36  ;;  %v5441_v7 = vld [vmem:[%s5619_s29 + $0x98] sm:$0xff] }
 0xa71   : > { %v4456_v40 = vrot.slane %v4455_v17, 1  ;;  %v4520_v50 = vadd.f32 %v4519_v55, %v4518_v34  ;;  %v4677_v19 = vsel %vm1450_vm10, %v4513_v16, %v4676_v43  ;;  %v5442_v43 = vld [vmem:[%s5619_s29 + $0x80] sm:$0xff] }
 0xa72   : > { %v4441_v62 = vadd.f32 %v4440_v22, %v4439_v25  ;;  %v4462_v26 = vadd.f32 %v4461_v56, %v4460_v33  ;;  %v4436_v3 = vadd.f32 %v4435_v13, %v4434_v2  ;;  %v5439_v25 = vld [vmem:[%s5619_s29 + $0x88] sm:$0xff] }
 0xa73   : > { %v4457_v15 = vadd.f32 %v4456_v40, %v4455_v17  ;;  %v4678_v51 = vsel %vm1452_vm11, %v4520_v50, %v4677_v19 }
 0xa74   : > { %v4442_v46 = vrot.slane %v4441_v62, 1  ;;  %v4463_v44 = vrot.slane %v4462_v26, 1  ;;  %v4667_v5 = vsel %vm1444_vm7, %v4436_v3, %v4666_v20  ;;  %4698 = vst.msk [vmem:[%s7133_s20 + $0x8] sm:$0xff] %vm699_vm4, %v4678_v51 }
 0xa76   : > { %v4443_v23 = vadd.f32 %v4442_v46, %v4441_v62  ;;  %v4464_v10 = vadd.f32 %v4463_v44, %v4462_v26 }
 0xa78   : > { %v4668_v42 = vsel %vm1446_vm8, %v4443_v23, %v4667_v5 }
 0xa79   : > { %v4669_v18 = vsel %vm1448_vm9, %v4450_v35, %v4668_v42  ;;  %v5443_v35 = vld [vmem:[%s5619_s29 + $0xa0] sm:$0xff] }
 0xa7a   : > { %v4670_v48 = vsel %vm1450_vm10, %v4457_v15, %v4669_v18 }
 0xa7b   : > { %v4671_v8 = vsel %vm1452_vm11, %v4464_v10, %v4670_v48 }
 0xa7c   : > { %4697 = vst.msk [vmem:[%s7133_s20] sm:$0xff] %vm699_vm4, %v4671_v8 }
 0xa7d   : > { %v4345_v59 = vpop.permute.xlu1 %4344  ;;  %v4340_v29 = vpop.permute.xlu0 %4339 }
 0xa7e   : > { %v4402_v30 = vmul.f32 %v5434_v4, %v4345_v59  ;;  %v4401_v27 = vmul.f32 %v5435_v60, %v4340_v29 }
 0xa80   : > { %v4584_v52 = vsel %vm699_vm4, %v4402_v30, 0.0  ;;  %v4577_v0 = vsel %vm699_vm4, %v4401_v27, 0.0 }
 0xa81   : > { %v4585_v45 = vrot.slane %v4584_v52, 4  ;;  %v4578_v61 = vrot.slane %v4577_v0, 4  ;;  %v4350_v24 = vpop.permute.xlu1 %4349  ;;  %v4365_v9 = vpop.permute.xlu0 %4364 }
 0xa82   : > { %v4403_v32 = vmul.f32 %v5436_v38, %v4350_v24  ;;  %v4406_v54 = vmul.f32 %v5437_v1, %v4365_v9 }
 0xa83   : > { %v4586_v31 = vadd.f32 %v4585_v45, %v4584_v52  ;;  %v4579_v28 = vadd.f32 %v4578_v61, %v4577_v0  ;;  %v5444_v52 = vld [vmem:[%s5619_s29 + $0x90] sm:$0xff]  ;;  %v5445_v45 = vld [vmem:[%s5619_s29 + $0xa8] sm:$0xff] }
 0xa84   : > { %v4591_v14 = vsel %vm699_vm4, %v4403_v32, 0.0  ;;  %v4612_v17 = vsel %vm699_vm4, %v4406_v54, 0.0 }
 0xa85   : > { %v4355_v39 = vpop.permute.xlu1 %4354  ;;  %v4305_v2 = vpop.permute.xlu0 %4304  ;;  %v4592_v41 = vrot.slane %v4591_v14, 4  ;;  %v4587_v13 = vrot.slane %v4586_v31, 2  ;;  %v4580_v11 = vrot.slane %v4579_v28, 2  ;;  %v4613_v53 = vrot.slane %v4612_v17, 4 }
 0xa86   : > { %v4404_v12 = vmul.f32 %v5438_v37, %v4355_v39  ;;  %v4394_v33 = vmul.f32 %v5439_v25, %v4305_v2 }
 0xa87   : > { %v4593_v26 = vadd.f32 %v4592_v41, %v4591_v14  ;;  %v4588_v49 = vadd.f32 %v4587_v13, %v4586_v31  ;;  %v7160_v55 = vadd.f32 %v4580_v11, %v4579_v28  ;;  %v7164_v15 = vadd.f32 %v4613_v53, %v4612_v17 }
 0xa88   : > { %v4598_v34 = vsel %vm699_vm4, %v4404_v12, 0.0  ;;  %v4528_v47 = vsel %vm699_vm4, %v4394_v33, 0.0 }
 0xa89   : > { %v4360_v22 = vpop.permute.xlu1 %4359  ;;  %v4315_v56 = vpop.permute.xlu0 %4314  ;;  %v4599_v58 = vrot.slane %v4598_v34, 4  ;;  %v4529_v63 = vrot.slane %v4528_v47, 4  ;;  %v4594_v50 = vrot.slane %v4593_v26, 2  ;;  %v4589_v18 = vrot.slane %v4588_v49, 1 }
 0xa8a   : > { %v4405_v21 = vmul.f32 %v5440_v57, %v4360_v22  ;;  %v4396_v62 = vmul.f32 %v5441_v7, %v4315_v56  ;;  %v4582_v59 = vrot.slane %v7160_v55, 1  ;;  %v4615_v9 = vrot.slane %v7164_v15, 2  ;;  %v5447_v56 = vld [vmem:[%s5619_s29 + $0xf0] sm:$0xff] }
 0xa8b   : > { %v4600_v16 = vadd.f32 %v4599_v58, %v4598_v34  ;;  %v4530_v36 = vadd.f32 %v4529_v63, %v4528_v47  ;;  %v7171_v24 = vadd.f32 %v4594_v50, %v4593_v26  ;;  %v7174_v31 = vadd.f32 %v4589_v18, %v4588_v49  ;;  %v5446_v47 = vld [vmem:[%s5619_s29 + $0xb0] sm:$0xff] }
 0xa8c   : > { %v4605_v6 = vsel %vm699_vm4, %v4405_v21, 0.0  ;;  %v4542_v3 = vsel %vm699_vm4, %v4396_v62, 0.0 }
 0xa8d   : > { %v4300_v40 = vpop.permute.xlu1 %4299  ;;  %v4320_v46 = vpop.permute.xlu0 %4319  ;;  %v4543_v44 = vrot.slane %v4542_v3, 4  ;;  %v4606_v23 = vrot.slane %v4605_v6, 4  ;;  %v4601_v29 = vrot.slane %v4600_v16, 2  ;;  %v4531_v4 = vrot.slane %v4530_v36, 2 }
 0xa8e   : > { %v4393_v20 = vmul.f32 %v5442_v43, %v4300_v40  ;;  %v4397_v5 = vmul.f32 %v5443_v35, %v4320_v46  ;;  %v4596_v11 = vrot.slane %v7171_v24, 1 }
 0xa8f   : > { %v4544_v42 = vadd.f32 %v4543_v44, %v4542_v3  ;;  %v4607_v60 = vadd.f32 %v4606_v23, %v4605_v6  ;;  %v7178_v2 = vadd.f32 %v4601_v29, %v4600_v16  ;;  %v4532_v37 = vadd.f32 %v4531_v4, %v4530_v36  ;;  %v5448_v16 = vld [vmem:[%s5619_s29 + $0xb8] sm:$0xff] }
 0xa90   : > { %v4521_v19 = vsel %vm699_vm4, %v4393_v20, 0.0  ;;  %v4549_v48 = vsel %vm699_vm4, %v4397_v5, 0.0 }
 0xa91   : > { %v4522_v10 = vrot.slane %v4521_v19, 4  ;;  %v4310_v8 = vpop.permute.xlu1 %4309  ;;  %v4325_v51 = vpop.permute.xlu0 %4324  ;;  %v4550_v30 = vrot.slane %v4549_v48, 4  ;;  %v4545_v38 = vrot.slane %v4544_v42, 2  ;;  %v4608_v33 = vrot.slane %v4607_v60, 2 }
 0xa92   : > { %v4395_v0 = vmul.f32 %v5444_v52, %v4310_v8  ;;  %v4398_v61 = vmul.f32 %v5445_v45, %v4325_v51  ;;  %v4603_v26 = vrot.slane %v7178_v2, 1  ;;  %v4533_v53 = vrot.slane %v4532_v37, 1 }
 0xa93   : > { %v4523_v27 = vadd.f32 %v4522_v10, %v4521_v19  ;;  %v4551_v32 = vadd.f32 %v4550_v30, %v4549_v48  ;;  %v4546_v17 = vadd.f32 %v4545_v38, %v4544_v42  ;;  %v4609_v49 = vadd.f32 %v4608_v33, %v4607_v60  ;;  %v5449_v30 = vld [vmem:[%s5619_s29 + $0xf8] sm:$0xff] }
 0xa94   : > { %v4535_v14 = vsel %vm699_vm4, %v4395_v0, 0.0  ;;  %v4556_v1 = vsel %vm699_vm4, %v4398_v61, 0.0  ;;  %v4534_v51 = vadd.f32 %v4533_v53, %v4532_v37  ;;  %v4583_v37 = vadd.f32 %v4582_v59, %v7160_v55 }
 0xa95   : > { %v4524_v28 = vrot.slane %v4523_v27, 2  ;;  %v4330_v54 = vpop.permute.xlu1 %4329  ;;  %v4370_v39 = vpop.permute.xlu0 %4369  ;;  %v4552_v12 = vrot.slane %v4551_v32, 2  ;;  %v4536_v25 = vrot.slane %v4535_v14, 4  ;;  %v4557_v34 = vrot.slane %v4556_v1, 4 }
 0xa96   : > { %v4399_v13 = vmul.f32 %v5446_v47, %v4330_v54  ;;  %v4407_v58 = vmul.f32 %v5447_v56, %v4370_v39  ;;  %v4547_v44 = vrot.slane %v4546_v17, 1  ;;  %v4610_v29 = vrot.slane %v4609_v49, 1 }
 0xa97   : > { %v4525_v41 = vadd.f32 %v4524_v28, %v4523_v27  ;;  %v4537_v22 = vadd.f32 %v4536_v25, %v4535_v14  ;;  %v4553_v57 = vadd.f32 %v4552_v12, %v4551_v32  ;;  %v4558_v21 = vadd.f32 %v4557_v34, %v4556_v1 }
 0xa98   : > { %v4563_v7 = vsel %vm699_vm4, %v4399_v13, 0.0  ;;  %v4619_v46 = vsel %vm699_vm4, %v4407_v58, 0.0  ;;  %v4548_v61 = vadd.f32 %v4547_v44, %v4546_v17  ;;  %v4616_v12 = vadd.f32 %v4615_v9, %v7164_v15 }
 0xa99   : > { %v4526_v63 = vrot.slane %v4525_v41, 1  ;;  %v4335_v62 = vpop.permute.xlu1 %4334  ;;  %v4538_v6 = vrot.slane %v4537_v22, 2  ;;  %v4564_v3 = vrot.slane %v4563_v7, 4  ;;  %v4559_v40 = vrot.slane %v4558_v21, 2 }
 0xa9a   : > { %v4400_v36 = vmul.f32 %v5448_v16, %v4335_v62  ;;  %v4620_v23 = vrot.slane %v4619_v46, 4  ;;  %v4554_v5 = vrot.slane %v4553_v57, 1  ;;  %v4604_v17 = vadd.f32 %v4603_v26, %v7178_v2 }
 0xa9b   : > { %v4539_v43 = vadd.f32 %v4538_v6, %v4537_v22  ;;  %v4565_v20 = vadd.f32 %v4564_v3, %v4563_v7  ;;  %v4527_v35 = vadd.f32 %v4526_v63, %v4525_v41  ;;  %v4560_v50 = vadd.f32 %v4559_v40, %v4558_v21 }
 0xa9c   : > { %v4570_v42 = vsel %vm699_vm4, %v4400_v36, 0.0  ;;  %v4621_v48 = vadd.f32 %v4620_v23, %v4619_v46  ;;  %v4555_v32 = vadd.f32 %v4554_v5, %v4553_v57  ;;  %v4597_v41 = vadd.f32 %v4596_v11, %v7171_v24 }
 0xa9d   : > { %v4375_v19 = vpop.permute.xlu1 %4374  ;;  %v4540_v18 = vrot.slane %v4539_v43, 1  ;;  %v4566_v10 = vrot.slane %v4565_v20, 2  ;;  %v4571_v8 = vrot.slane %v4570_v42, 4  ;;  %v4561_v4 = vrot.slane %v4560_v50, 1 }
 0xa9e   : > { %v4408_v60 = vmul.f32 %v5449_v30, %v4375_v19  ;;  %v4622_v0 = vrot.slane %v4621_v48, 2  ;;  %v4679_v38 = vsel %vm1440_vm5, %v4534_v51, %v4527_v35  ;;  %v4611_v58 = vadd.f32 %v4610_v29, %v4609_v49 }
 0xa9f   : > { %v4541_v27 = vadd.f32 %v4540_v18, %v4539_v43  ;;  %v4567_v52 = vadd.f32 %v4566_v10, %v4565_v20  ;;  %v4572_v45 = vadd.f32 %v4571_v8, %v4570_v42  ;;  %v4562_v47 = vadd.f32 %v4561_v4, %v4560_v50 }
 0xaa0   : > { %v4626_v28 = vsel %vm699_vm4, %v4408_v60, 0.0  ;;  %v4623_v54 = vadd.f32 %v4622_v0, %v4621_v48  ;;  %v4686_v15 = vsel %vm1440_vm5, %v7174_v31, %v4583_v37  ;;  %v4617_v9 = vrot.slane %v4616_v12, 1 }
 0xaa1   : > { %v4680_v14 = vsel %vm1442_vm6, %v4541_v27, %v4679_v38  ;;  %v4568_v1 = vrot.slane %v4567_v52, 1  ;;  %v4573_v39 = vrot.slane %v4572_v45, 2  ;;  %v4627_v33 = vrot.slane %v4626_v28, 4 }
 0xaa2   : > { %v4681_v25 = vsel %vm1444_vm7, %v4548_v61, %v4680_v14  ;;  %v4624_v59 = vrot.slane %v4623_v54, 1  ;;  %v4687_v24 = vsel %vm1442_vm6, %v4597_v41, %v4686_v15  ;;  %v4618_v6 = vadd.f32 %v4617_v9, %v4616_v12 }
 0xaa3   : > { %v4682_v34 = vsel %vm1446_vm8, %v4555_v32, %v4681_v25  ;;  %v4574_v13 = vadd.f32 %v4573_v39, %v4572_v45  ;;  %v4569_v22 = vadd.f32 %v4568_v1, %v4567_v52  ;;  %v4628_v56 = vadd.f32 %v4627_v33, %v4626_v28 }
 0xaa4   : > { %v4683_v55 = vsel %vm1448_vm9, %v4562_v47, %v4682_v34  ;;  %v4688_v21 = vsel %vm1444_vm7, %v4604_v17, %v4687_v24  ;;  %v4625_v26 = vadd.f32 %v4624_v59, %v4623_v54 }
 0xaa5   : > { %v4575_v63 = vrot.slane %v4574_v13, 1  ;;  %v4629_v57 = vrot.slane %v4628_v56, 2  ;;  %v4684_v2 = vsel %vm1450_vm10, %v4569_v22, %v4683_v55  ;;  %v4689_v62 = vsel %vm1446_vm8, %v4611_v58, %v4688_v21 }
 0xaa6   : > { %v4690_v3 = vsel %vm1448_vm9, %v4618_v6, %v4689_v62 }
 0xaa7   : > { %v4576_v11 = vadd.f32 %v4575_v63, %v4574_v13  ;;  %v4630_v7 = vadd.f32 %v4629_v57, %v4628_v56  ;;  %v4691_v40 = vsel %vm1450_vm10, %v4625_v26, %v4690_v3 }
 0xaa9   : > { %v4685_v53 = vsel %vm1452_vm11, %v4576_v11, %v4684_v2  ;;  %v4631_v31 = vrot.slane %v4630_v7, 1 }
 0xaaa   : > { %4699 = vst.msk [vmem:[%s7133_s20 + $0x10] sm:$0xff] %vm699_vm4, %v4685_v53 }
 0xaab   : > { %v4632_v49 = vadd.f32 %v4631_v31, %v4630_v7 }
 0xaad   : > { %v4692_v46 = vsel %vm1452_vm11, %v4632_v49, %v4691_v40 }
 0xaae   : > { %4700 = vst.msk [vmem:[%s7133_s20 + $0x18] sm:$0xff] %vm699_vm4, %v4692_v46 }
 0xaaf PF: > { %s18_s27 = sadd.s32 1, %s5456_s27  }
 0xab0   : > { %p15_p5 = scmp.ge.s32.totalorder %s18_s27, 4  }
 0xab2   :  { %17 = sbr.rel (!%p15_p5) target bundleno = 1 (0x1), region = 88 }

</bundles_post_ra>
